<compile_context>
chip_gen: v7x
topology: tpu7x:2x2x1
jax: 0.10.0
libtpu: 0.0.40
codegen_flags: <defaults>
</compile_context>

<pallas_src>
from functools import partial

import jax
import jax.numpy as jnp
from jax.experimental import pallas as pl
from jax.experimental.pallas import tpu as pltpu


# ----------------------------------------------------------------------------
# Kernel A: fused dual T-LSTM + attention linear + message linear (per edge)
# ----------------------------------------------------------------------------
def edge_message_kernel(e_ref, dt_ref, valid_ref, hsrc_ref,
                        wd_ref, bd_ref, wh_ref, wx_ref, bg_ref,
                        attnw_ref, eosrc_ref, eoe_ref, eob_ref,
                        m_ref, a_ref, *, hidden, t_steps):
    H = hidden
    TE = dt_ref.shape[0]

    dt = dt_ref[...]                             # (TE, T)
    valid = valid_ref[...]                       # (TE, T)

    wd = wd_ref[...]                             # (2H, 2H)  block-diag [wd_e, wd_a]
    wh = wh_ref[...]                             # (2H, 8H)  gate-interleaved recurrent
    wx = wx_ref[...]                             # (Din_e, 8H)
    # hoist bias broadcasts out of the unrolled time loop
    bd_b = jnp.broadcast_to(bd_ref[...], (TE, 2 * H))
    bg_b = jnp.broadcast_to(bg_ref[...], (TE, 8 * H))

    h = jnp.zeros((TE, 2 * H), jnp.float32)       # [h_edge | h_attn]
    c = jnp.zeros((TE, 2 * H), jnp.float32)       # [c_edge | c_attn]
    h_last = jnp.zeros((TE, 2 * H), jnp.float32)  # hidden at step (len-1)

    # fully-unrolled time loop (T is small and static)
    for s in range(t_steps):
        x = e_ref[s]                              # (TE, Din_e), leading-axis load
        dts = dt[:, s:s + 1]                      # (TE, 1)
        # time-aware cell decomposition (both LSTMs at once)
        c_s = jnp.tanh(jnp.dot(c, wd, preferred_element_type=jnp.float32) + bd_b)
        c_adj = c - c_s + c_s * dts
        # one wide gate matmul: columns = [f_e,f_a, i_e,i_a, o_e,o_a, ct_e,ct_a]
        g = jax.nn.sigmoid(
            jnp.dot(h, wh, preferred_element_type=jnp.float32)
            + jnp.dot(x, wx, preferred_element_type=jnp.float32) + bg_b)   # (TE, 8H)
        f = g[:, 0:2 * H]
        i = g[:, 2 * H:4 * H]
        o = g[:, 4 * H:6 * H]
        ct = g[:, 6 * H:8 * H]                    # sigmoid candidate (T-LSTM convention)
        c = f * c_adj + i * ct
        h = o * jnp.tanh(c)
        vs = valid[:, s:s + 1]
        h_last = h_last + vs * (h - h_last)       # keep hidden of last valid step

    e_out = h_last[:, :H]                         # edge T-LSTM output
    a_hid = h_last[:, H:2 * H]                    # attention T-LSTM output

    # attn_layers[0]: Linear(H, 1, bias=False) + leaky_relu
    a = jnp.dot(a_hid, attnw_ref[...], preferred_element_type=jnp.float32)
    a = jnp.where(a > 0.0, a, 0.01 * a)

    # edge_out_layers[0] on cat(h_src, e_out) -> split-weight form (no concat)
    m = (jnp.dot(hsrc_ref[...], eosrc_ref[...], preferred_element_type=jnp.float32)
         + jnp.dot(e_out, eoe_ref[...], preferred_element_type=jnp.float32)
         + eob_ref[...])
    m = jnp.maximum(m, 0.0)

    m_ref[...] = m.astype(m_ref.dtype)
    a_ref[...] = a.astype(a_ref.dtype)


# ----------------------------------------------------------------------------
# Kernel B: sparsemax reduce + self_h_tmp + NodeUpdate + fc (per destination node)
# Fully 2-D: the K mailbox columns are unrolled (K is small and static), so no 3-D
# broadcasts / reductions have to be lowered.
# ----------------------------------------------------------------------------
def reduce_update_kernel(a_ref, m_ref, selfh_ref,
                         eosrc_ref, eob_ref,
                         nusrc_ref, nuh_ref, nub_ref,
                         fcw_ref, fcb_ref, o_ref, *, k_deg, hidden):
    K = k_deg
    H = hidden
    a = a_ref[...]                                        # (TD, K)
    TD = a.shape[0]

    # --- sparsemax over K mailbox entries (sort-free, exact, unrolled) ---
    zs = [a[:, i:i + 1] for i in range(K)]                # K columns, each (TD, 1)
    zmax = zs[0]
    for i in range(1, K):
        zmax = jnp.maximum(zmax, zs[i])
    zs = [z - zmax for z in zs]
    in_sup = []
    for i in range(K):
        k_i = jnp.zeros((TD, 1), jnp.float32)
        s_i = jnp.zeros((TD, 1), jnp.float32)
        for j in range(K):
            ge = (zs[j] >= zs[i]).astype(jnp.float32)
            k_i = k_i + ge
            s_i = s_i + ge * zs[j]
        in_sup.append((1.0 + k_i * zs[i] > s_i).astype(jnp.float32))
    ksum = in_sup[0]
    ssum = in_sup[0] * zs[0]
    for i in range(1, K):
        ksum = ksum + in_sup[i]
        ssum = ssum + in_sup[i] * zs[i]
    tau = (ssum - 1.0) / ksum                             # ksum >= 1 always

    # weighted mailbox sum: h_red = sum_i max(z_i - tau, 0) * m_i   (m lane-flattened)
    m = m_ref[...]                                        # (TD, K*H)
    h_red = jnp.zeros((TD, H), jnp.float32)
    for i in range(K):
        alpha_i = jnp.maximum(zs[i] - tau, 0.0)
        h_red = h_red + alpha_i * m[:, i * H:(i + 1) * H]

    # self_h_tmp = edge_out_layer(cat(self_h, zeros)) == self_h @ eo_w[:Din_n] + eo_b
    self_h = selfh_ref[...]
    self_h_tmp = (jnp.dot(self_h, eosrc_ref[...], preferred_element_type=jnp.float32)
                  + eob_ref[...])

    # NodeUpdate: relu(Linear(cat(self_h, h_red - self_h_tmp)))  (split-weight form)
    hh = h_red - self_h_tmp
    act = (jnp.dot(self_h, nusrc_ref[...], preferred_element_type=jnp.float32)
           + jnp.dot(hh, nuh_ref[...], preferred_element_type=jnp.float32)
           + nub_ref[...])
    act = jnp.maximum(act, 0.0)

    # final fc
    out = jnp.dot(act, fcw_ref[...], preferred_element_type=jnp.float32) + fcb_ref[...]
    o_ref[...] = out.astype(o_ref.dtype)


# ----------------------------------------------------------------------------
# Pallas wrappers
# ----------------------------------------------------------------------------
def _pad_axis(x, size, axis):
    pad = size - x.shape[axis]
    if pad == 0:
        return x
    widths = [(0, 0)] * x.ndim
    widths[axis] = (0, pad)
    return jnp.pad(x, widths)


def pallas_edge_messages(e3, dt2, valid, h_src, fp, *, hidden, tile=None):
    T, E, din_e = e3.shape
    din_n = h_src.shape[1]
    H = hidden
    if tile is None:
        tile = E if E <= 256 else 256          # big row tiles; grid=(1,) at toy sizes
    assert tile == E or tile % 8 == 0
    n_blocks = int(pl.cdiv(E, tile))
    Ep = n_blocks * tile
    e3 = _pad_axis(e3, Ep, 1)
    dt2 = _pad_axis(dt2, Ep, 0)
    valid = _pad_axis(valid, Ep, 0)
    h_src = _pad_axis(h_src, Ep, 0)

    kernel = partial(edge_message_kernel, hidden=H, t_steps=T)
    m, a = pl.pallas_call(
        kernel,
        out_shape=[jax.ShapeDtypeStruct((Ep, H), jnp.float32),
                   jax.ShapeDtypeStruct((Ep, 1), jnp.float32)],
        grid=(n_blocks,),
        in_specs=[
            pl.BlockSpec((T, tile, din_e), lambda i: (0, i, 0)),   # e (time-major)
            pl.BlockSpec((tile, T), lambda i: (i, 0)),             # delta_t
            pl.BlockSpec((tile, T), lambda i: (i, 0)),             # valid mask
            pl.BlockSpec((tile, din_n), lambda i: (i, 0)),         # h_src
            pl.BlockSpec((2 * H, 2 * H), lambda i: (0, 0)),        # WD
            pl.BlockSpec((1, 2 * H), lambda i: (0, 0)),            # BD
            pl.BlockSpec((2 * H, 8 * H), lambda i: (0, 0)),        # WH
            pl.BlockSpec((din_e, 8 * H), lambda i: (0, 0)),        # WX
            pl.BlockSpec((1, 8 * H), lambda i: (0, 0)),            # BG
            pl.BlockSpec((H, 1), lambda i: (0, 0)),                # attn_w
            pl.BlockSpec((din_n, H), lambda i: (0, 0)),            # eo_w_src
            pl.BlockSpec((H, H), lambda i: (0, 0)),                # eo_w_e
            pl.BlockSpec((1, H), lambda i: (0, 0)),                # eo_b
        ],
        out_specs=[
            pl.BlockSpec((tile, H), lambda i: (i, 0)),
            pl.BlockSpec((tile, 1), lambda i: (i, 0)),
        ],
        compiler_params=pltpu.CompilerParams(dimension_semantics=("parallel",)),
    )(e3, dt2, valid, h_src,
      fp["wd"], fp["bd"], fp["wh"], fp["wx"], fp["bg"],
      fp["attn_w"], fp["eo_w_src"], fp["eo_w_e"], fp["eo_b"])
    return m[:E], a[:E]


def pallas_reduce_update(a_mb, m_mb, self_h, fp, *, hidden, k_deg, tile=None):
    ND, K = a_mb.shape
    H = hidden
    din_n = self_h.shape[1]
    C = fp["fc_w"].shape[1]
    if tile is None:
        tile = ND if ND <= 512 else 512
    assert tile == ND or tile % 8 == 0
    n_blocks = int(pl.cdiv(ND, tile))
    NDp = n_blocks * tile
    a_mb = _pad_axis(a_mb, NDp, 0)
    m_mb = _pad_axis(m_mb, NDp, 0)
    self_h = _pad_axis(self_h, NDp, 0)

    kernel = partial(reduce_update_kernel, k_deg=k_deg, hidden=H)
    out = pl.pallas_call(
        kernel,
        out_shape=jax.ShapeDtypeStruct((NDp, C), jnp.float32),
        grid=(n_blocks,),
        in_specs=[
            pl.BlockSpec((tile, K), lambda i: (i, 0)),             # attention logits
            pl.BlockSpec((tile, K * H), lambda i: (i, 0)),         # mailbox (flattened)
            pl.BlockSpec((tile, din_n), lambda i: (i, 0)),         # self_h
            pl.BlockSpec((din_n, H), lambda i: (0, 0)),            # eo_w_src
            pl.BlockSpec((1, H), lambda i: (0, 0)),                # eo_b
            pl.BlockSpec((din_n, H), lambda i: (0, 0)),            # nu_w_self
            pl.BlockSpec((H, H), lambda i: (0, 0)),                # nu_w_h
            pl.BlockSpec((1, H), lambda i: (0, 0)),                # nu_b
            pl.BlockSpec((H, C), lambda i: (0, 0)),                # fc_w
            pl.BlockSpec((1, C), lambda i: (0, 0)),                # fc_b
        ],
        out_specs=pl.BlockSpec((tile, C), lambda i: (i, 0)),
        compiler_params=pltpu.CompilerParams(dimension_semantics=("parallel",)),
    )(a_mb, m_mb, self_h,
      fp["eo_w_src"], fp["eo_b"], fp["nu_w_self"], fp["nu_w_h"], fp["nu_b"],
      fp["fc_w"], fp["fc_b"])
    return out[:ND]


# ----------------------------------------------------------------------------
# Parameter init (deterministic, PyTorch-Linear-style uniform) + weight fusion
# ----------------------------------------------------------------------------
def _linear_init(key, din, dout, bias=True):
    kw, kb = jax.random.split(key)
    bound = 1.0 / jnp.sqrt(jnp.float32(din))
    w = jax.random.uniform(kw, (din, dout), jnp.float32, -bound, bound)
    b = (jax.random.uniform(kb, (1, dout), jnp.float32, -bound, bound)
         if bias else jnp.zeros((1, dout), jnp.float32))
    return w, b


def init_params(key, node_in_dim, node_hidden_dim, edge_in_dim, num_class):
    ks = jax.random.split(key, 12)
    h = node_hidden_dim
    p = {}
    # edge TLSTM (edge_layers[0]); gate column order [f | i | o | ct]
    p["el_wd"], p["el_bd"] = _linear_init(ks[0], h, h)
    p["el_wh"], bh = _linear_init(ks[1], h, 4 * h)
    p["el_wx"], bx = _linear_init(ks[2], edge_in_dim, 4 * h)
    p["el_bg"] = bh + bx
    # attention TLSTM (edge_attentiion_layers[0])
    p["ea_wd"], p["ea_bd"] = _linear_init(ks[3], h, h)
    p["ea_wh"], bh = _linear_init(ks[4], h, 4 * h)
    p["ea_wx"], bx = _linear_init(ks[5], edge_in_dim, 4 * h)
    p["ea_bg"] = bh + bx
    # attn_layers[0]: Linear(H, 1, bias=False)
    p["attn_w"], _ = _linear_init(ks[6], h, 1, bias=False)
    # edge_out_layers[0]: Linear(node_in_dim + H, H)
    p["eo_w"], p["eo_b"] = _linear_init(ks[7], node_in_dim + h, h)
    # node_layers[0].layer: Linear(node_in_dim + H, H)
    p["nu_w"], p["nu_b"] = _linear_init(ks[8], node_in_dim + h, h)
    # fc: Linear(H, num_class)
    p["fc_w"], p["fc_b"] = _linear_init(ks[9], h, num_class)
    return p


def fuse_params(p, node_in_dim, node_hidden_dim):
    """Build fused / split weights consumed by the two Pallas kernels."""
    H = node_hidden_dim
    z = jnp.zeros((H, H), jnp.float32)
    fp = {}
    # decomposition weights: block-diag over [c_edge | c_attn]
    fp["wd"] = jnp.concatenate(
        [jnp.concatenate([p["el_wd"], z], axis=1),
         jnp.concatenate([z, p["ea_wd"]], axis=1)], axis=0)            # (2H, 2H)
    fp["bd"] = jnp.concatenate([p["el_bd"], p["ea_bd"]], axis=1)       # (1, 2H)
    # gate weights, column blocks [f_e,f_a, i_e,i_a, o_e,o_a, ct_e,ct_a]
    wh_cols, wx_cols, bg_cols = [], [], []
    for g in range(4):
        we = p["el_wh"][:, g * H:(g + 1) * H]
        wa = p["ea_wh"][:, g * H:(g + 1) * H]
        wh_cols.append(jnp.concatenate([we, z], axis=0))   # fed by h_edge rows only
        wh_cols.append(jnp.concatenate([z, wa], axis=0))   # fed by h_attn rows only
        wx_cols.append(p["el_wx"][:, g * H:(g + 1) * H])
        wx_cols.append(p["ea_wx"][:, g * H:(g + 1) * H])
        bg_cols.append(p["el_bg"][:, g * H:(g + 1) * H])
        bg_cols.append(p["ea_bg"][:, g * H:(g + 1) * H])
    fp["wh"] = jnp.concatenate(wh_cols, axis=1)            # (2H, 8H)
    fp["wx"] = jnp.concatenate(wx_cols, axis=1)            # (Din_e, 8H)
    fp["bg"] = jnp.concatenate(bg_cols, axis=1)            # (1, 8H)
    fp["attn_w"] = p["attn_w"]
    # split weights (avoid concats / zero-concat in the kernels)
    fp["eo_w_src"] = p["eo_w"][:node_in_dim]
    fp["eo_w_e"] = p["eo_w"][node_in_dim:]
    fp["eo_b"] = p["eo_b"]
    fp["nu_w_self"] = p["nu_w"][:node_in_dim]
    fp["nu_w_h"] = p["nu_w"][node_in_dim:]
    fp["nu_b"] = p["nu_b"]
    fp["fc_w"] = p["fc_w"]
    fp["fc_b"] = p["fc_b"]
    return fp


# ----------------------------------------------------------------------------
# Forward pass (num_layers = 1), two pallas_calls total
# ----------------------------------------------------------------------------
def gtea_forward(fp, node_features, edge_features, delta_t, edge_len,
                 src_idx, layer_nid, node_hidden_dim):
    n_dst, k = src_idx.shape
    H = node_hidden_dim
    n_edges, t_steps, din_e = edge_features.shape

    h = node_features                                   # layer-0 activation
    self_h = h[layer_nid]                               # [N_dst, Din_n] (gather = glue)
    h_src = h[src_idx.reshape(-1)]                      # [E, Din_n]

    # time-major edge slab so each step is a leading-axis ref load in the kernel
    e3 = jnp.transpose(edge_features, (1, 0, 2))        # (T, E, Din_e)
    valid = (jnp.arange(t_steps, dtype=jnp.int32)[None, :]
             < edge_len[:, None]).astype(jnp.float32)   # [E, T]

    # kernel A: fused dual TLSTM + attention score + message
    m, a = pallas_edge_messages(e3, delta_t, valid, h_src, fp, hidden=H)

    # mailbox layout (contiguous reshapes, dst-major edge ordering; kept 2-D)
    a_mb = a.reshape(n_dst, k)
    m_mb = m.reshape(n_dst, k * H)

    # kernel B: sparsemax reduce + NodeUpdate + fc
    return pallas_reduce_update(a_mb, m_mb, self_h, fp, hidden=H, k_deg=k)


# ----------------------------------------------------------------------------
# Pure-JAX reference (unfused) for correctness checking
# ----------------------------------------------------------------------------
def _tlstm_ref(e, dt, lens, wd, bd, wh, wx, bg):
    hp = jax.lax.Precision.HIGHEST
    ne, T, _ = e.shape
    H = wd.shape[0]
    h = jnp.zeros((ne, H), jnp.float32)
    c = jnp.zeros((ne, H), jnp.float32)
    h_last = jnp.zeros((ne, H), jnp.float32)
    for s in range(T):
        x = e[:, s, :]
        dts = dt[:, s:s + 1]
        c_s = jnp.tanh(jnp.dot(c, wd, precision=hp) + bd)
        c_adj = c - c_s + c_s * dts
        gates = jnp.dot(h, wh, precision=hp) + jnp.dot(x, wx, precision=hp) + bg
        f = jax.nn.sigmoid(gates[:, 0:H])
        i = jax.nn.sigmoid(gates[:, H:2 * H])
        o = jax.nn.sigmoid(gates[:, 2 * H:3 * H])
        ct = jax.nn.sigmoid(gates[:, 3 * H:4 * H])
        c = f * c_adj + i * ct
        h = o * jnp.tanh(c)
        vs = (s < lens)[:, None].astype(jnp.float32)
        h_last = h_last + vs * (h - h_last)
    return h_last


def gtea_forward_ref(p, node_features, edge_features, delta_t, edge_len,
                     src_idx, layer_nid, node_hidden_dim):
    hp = jax.lax.Precision.HIGHEST
    n_dst, k = src_idx.shape
    H = node_hidden_dim
    din_n = node_features.shape[1]
    h = node_features
    self_h = h[layer_nid]
    self_h_tmp = jnp.dot(self_h, p["eo_w"][:din_n], precision=hp) + p["eo_b"]
    e_out = _tlstm_ref(edge_features, delta_t, edge_len,
                       p["el_wd"], p["el_bd"], p["el_wh"], p["el_wx"], p["el_bg"])
    a_hid = _tlstm_ref(edge_features, delta_t, edge_len,
                       p["ea_wd"], p["ea_bd"], p["ea_wh"], p["ea_wx"], p["ea_bg"])
    a = jnp.dot(a_hid, p["attn_w"], precision=hp)
    a = jnp.where(a > 0, a, 0.01 * a)
    h_src = h[src_idx.reshape(-1)]
    m = jnp.maximum(jnp.dot(jnp.concatenate([h_src, e_out], axis=1),
                            p["eo_w"], precision=hp) + p["eo_b"], 0.0)
    a_mb = a.reshape(n_dst, k)
    m_mb = m.reshape(n_dst, k, H)
    # torch-style (sorted) sparsemax
    z = a_mb - jnp.max(a_mb, axis=-1, keepdims=True)
    zs = -jnp.sort(-z, axis=-1)
    rng = jnp.arange(1, k + 1, dtype=jnp.float32)[None, :]
    is_gt = (1.0 + rng * zs > jnp.cumsum(zs, axis=-1)).astype(jnp.float32)
    kk = jnp.max(is_gt * rng, axis=-1, keepdims=True)
    taus = (jnp.sum(is_gt * zs, axis=-1, keepdims=True) - 1.0) / kk
    alpha = jnp.maximum(z - taus, 0.0)
    h_red = jnp.sum(alpha[:, :, None] * m_mb, axis=1)
    hh = h_red - self_h_tmp
    nu_in = jnp.concatenate([self_h, hh], axis=1)
    act = jnp.maximum(jnp.dot(nu_in, p["nu_w"], precision=hp) + p["nu_b"], 0.0)
    return jnp.dot(act, p["fc_w"], precision=hp) + p["fc_b"]


# ----------------------------------------------------------------------------
# Main
# ----------------------------------------------------------------------------
if __name__ == "__main__":
    NODE_IN_DIM = 16
    NODE_HIDDEN_DIM = 32
    EDGE_IN_DIM = 8
    NUM_CLASS = 6
    T = 8            # edge sequence length
    N_SRC = 16       # layer-0 nodes
    N_DST = 8        # layer-1 nodes
    K = 4            # in-edges per destination node
    E = N_DST * K    # 32 edges

    key = jax.random.PRNGKey(0)
    k_par, k_nf, k_ef, k_dt, k_len, k_src, k_nid = jax.random.split(key, 7)

    params = init_params(k_par, NODE_IN_DIM, NODE_HIDDEN_DIM, EDGE_IN_DIM, NUM_CLASS)
    fused = fuse_params(params, NODE_IN_DIM, NODE_HIDDEN_DIM)

    node_features = jax.random.normal(k_nf, (N_SRC, NODE_IN_DIM), jnp.float32)
    edge_features = jax.random.normal(k_ef, (E, T, EDGE_IN_DIM), jnp.float32)
    delta_t = jax.random.uniform(k_dt, (E, T), jnp.float32, 0.0, 1.0)
    edge_len = jax.random.randint(k_len, (E,), 1, T + 1, jnp.int32)   # >= 1 required
    src_idx = jax.random.randint(k_src, (N_DST, K), 0, N_SRC, jnp.int32)
    layer_nid = jax.random.randint(k_nid, (N_DST,), 0, N_SRC, jnp.int32)

    fwd = jax.jit(partial(gtea_forward, node_hidden_dim=NODE_HIDDEN_DIM))
    out = fwd(fused, node_features, edge_features, delta_t, edge_len, src_idx, layer_nid)
    out = jax.block_until_ready(out)

    assert out.shape == (N_DST, NUM_CLASS)
    assert bool(jnp.all(jnp.isfinite(out)))

    ref = gtea_forward_ref(params, node_features, edge_features, delta_t, edge_len,
                           src_idx, layer_nid, NODE_HIDDEN_DIM)
    max_err = float(jnp.max(jnp.abs(out - ref)))
    assert max_err < 1e-2, f"max abs err {max_err}"
    print("KERNEL_OK")
</pallas_src>

<mosaic_0001>
module attributes {stable_mosaic.version = 11 : i64} {
  func.func @edge_message_kernel(%arg0: i32, %arg1: memref<8x32x8xf32, #tpu.memory_space<vmem>>, %arg2: memref<32x8xf32, #tpu.memory_space<vmem>>, %arg3: memref<32x8xf32, #tpu.memory_space<vmem>>, %arg4: memref<32x16xf32, #tpu.memory_space<vmem>>, %arg5: memref<64x64xf32, #tpu.memory_space<vmem>>, %arg6: memref<1x64xf32, #tpu.memory_space<vmem>>, %arg7: memref<64x256xf32, #tpu.memory_space<vmem>>, %arg8: memref<8x256xf32, #tpu.memory_space<vmem>>, %arg9: memref<1x256xf32, #tpu.memory_space<vmem>>, %arg10: memref<32x1xf32, #tpu.memory_space<vmem>>, %arg11: memref<16x32xf32, #tpu.memory_space<vmem>>, %arg12: memref<32x32xf32, #tpu.memory_space<vmem>>, %arg13: memref<1x32xf32, #tpu.memory_space<vmem>>, %arg14: memref<32x32xf32, #tpu.memory_space<vmem>>, %arg15: memref<32x1xf32, #tpu.memory_space<vmem>>) attributes {dimension_semantics = [#tpu.dimension_semantics<parallel>], iteration_bounds = array<i64: 1>, scalar_prefetch = 0 : i64, scratch_operands = 0 : i64, tpu.core_type = #tpu.core_type<tc>, window_params = [{transform_indices = @transform_0, window_bounds = array<i64: 8, 32, 8>}, {transform_indices = @transform_1, window_bounds = array<i64: 32, 8>}, {transform_indices = @transform_2, window_bounds = array<i64: 32, 8>}, {transform_indices = @transform_3, window_bounds = array<i64: 32, 16>}, {pipeline_mode = #tpu.pipeline_mode<synchronous>, transform_indices = @transform_4, window_bounds = array<i64: 64, 64>}, {pipeline_mode = #tpu.pipeline_mode<synchronous>, transform_indices = @transform_5, window_bounds = array<i64: 1, 64>}, {pipeline_mode = #tpu.pipeline_mode<synchronous>, transform_indices = @transform_6, window_bounds = array<i64: 64, 256>}, {pipeline_mode = #tpu.pipeline_mode<synchronous>, transform_indices = @transform_7, window_bounds = array<i64: 8, 256>}, {pipeline_mode = #tpu.pipeline_mode<synchronous>, transform_indices = @transform_8, window_bounds = array<i64: 1, 256>}, {pipeline_mode = #tpu.pipeline_mode<synchronous>, transform_indices = @transform_9, window_bounds = array<i64: 32, 1>}, {pipeline_mode = #tpu.pipeline_mode<synchronous>, transform_indices = @transform_10, window_bounds = array<i64: 16, 32>}, {pipeline_mode = #tpu.pipeline_mode<synchronous>, transform_indices = @transform_11, window_bounds = array<i64: 32, 32>}, {pipeline_mode = #tpu.pipeline_mode<synchronous>, transform_indices = @transform_12, window_bounds = array<i64: 1, 32>}, {transform_indices = @transform_13, window_bounds = array<i64: 32, 32>}, {transform_indices = @transform_14, window_bounds = array<i64: 32, 1>}]} {
    %c0 = arith.constant 0 : index
    %c0_0 = arith.constant 0 : index
    %0 = vector.load %arg2[%c0, %c0_0] : memref<32x8xf32, #tpu.memory_space<vmem>>, vector<32x8xf32>
    %c0_1 = arith.constant 0 : index
    %c0_2 = arith.constant 0 : index
    %1 = vector.load %arg3[%c0_1, %c0_2] : memref<32x8xf32, #tpu.memory_space<vmem>>, vector<32x8xf32>
    %c0_3 = arith.constant 0 : index
    %c0_4 = arith.constant 0 : index
    %2 = vector.load %arg5[%c0_3, %c0_4] : memref<64x64xf32, #tpu.memory_space<vmem>>, vector<64x64xf32>
    %c0_5 = arith.constant 0 : index
    %c0_6 = arith.constant 0 : index
    %3 = vector.load %arg7[%c0_5, %c0_6] : memref<64x256xf32, #tpu.memory_space<vmem>>, vector<64x256xf32>
    %c0_7 = arith.constant 0 : index
    %c0_8 = arith.constant 0 : index
    %4 = vector.load %arg8[%c0_7, %c0_8] : memref<8x256xf32, #tpu.memory_space<vmem>>, vector<8x256xf32>
    %c0_9 = arith.constant 0 : index
    %c0_10 = arith.constant 0 : index
    %5 = vector.load %arg6[%c0_9, %c0_10] : memref<1x64xf32, #tpu.memory_space<vmem>>, vector<1x64xf32>
    %6 = vector.shape_cast %5 : vector<1x64xf32> to vector<1x64xf32>
    %7 = vector.broadcast %6 : vector<1x64xf32> to vector<32x64xf32>
    %c0_11 = arith.constant 0 : index
    %c0_12 = arith.constant 0 : index
    %8 = vector.load %arg9[%c0_11, %c0_12] : memref<1x256xf32, #tpu.memory_space<vmem>>, vector<1x256xf32>
    %9 = vector.shape_cast %8 : vector<1x256xf32> to vector<1x256xf32>
    %10 = vector.broadcast %9 : vector<1x256xf32> to vector<32x256xf32>
    %cst = arith.constant 0.000000e+00 : f32
    %11 = vector.broadcast %cst : f32 to vector<32x64xf32>
    %cst_13 = arith.constant 0.000000e+00 : f32
    %12 = vector.broadcast %cst_13 : f32 to vector<32x64xf32>
    %cst_14 = arith.constant 0.000000e+00 : f32
    %13 = vector.broadcast %cst_14 : f32 to vector<32x64xf32>
    %c0_15 = arith.constant 0 : index
    %c0_16 = arith.constant 0 : index
    %c0_17 = arith.constant 0 : index
    %14 = vector.load %arg1[%c0_15, %c0_16, %c0_17] : memref<8x32x8xf32, #tpu.memory_space<vmem>>, vector<1x32x8xf32>
    %15 = vector.shape_cast %14 : vector<1x32x8xf32> to vector<32x8xf32>
    %16 = vector.extract_strided_slice %0 {offsets = [0, 0], sizes = [32, 1], strides = [1, 1]} : vector<32x8xf32> to vector<32x1xf32>
    %cst_18 = arith.constant dense<0.000000e+00> : vector<32x64xf32>
    %17 = tpu.matmul %12, %2, %cst_18 {dimension_numbers = #tpu.dot_dimension_numbers<[1], [0], [0], [1], [0, 0, 1, 1], [], []>} : vector<32x64xf32>, vector<64x64xf32>, vector<32x64xf32> -> vector<32x64xf32>
    %18 = arith.addf %17, %7 : vector<32x64xf32>
    %19 = math.tanh %18 : vector<32x64xf32>
    %20 = arith.subf %12, %19 : vector<32x64xf32>
    %21 = vector.broadcast %16 : vector<32x1xf32> to vector<32x64xf32>
    %22 = arith.mulf %19, %21 : vector<32x64xf32>
    %23 = arith.addf %20, %22 : vector<32x64xf32>
    %cst_19 = arith.constant dense<0.000000e+00> : vector<32x256xf32>
    %24 = tpu.matmul %11, %3, %cst_19 {dimension_numbers = #tpu.dot_dimension_numbers<[1], [0], [0], [1], [0, 0, 1, 1], [], []>} : vector<32x64xf32>, vector<64x256xf32>, vector<32x256xf32> -> vector<32x256xf32>
    %cst_20 = arith.constant dense<0.000000e+00> : vector<32x256xf32>
    %25 = tpu.matmul %15, %4, %cst_20 {dimension_numbers = #tpu.dot_dimension_numbers<[1], [0], [0], [1], [0, 0, 1, 1], [], []>} : vector<32x8xf32>, vector<8x256xf32>, vector<32x256xf32> -> vector<32x256xf32>
    %26 = arith.addf %24, %25 : vector<32x256xf32>
    %27 = arith.addf %26, %10 : vector<32x256xf32>
    %28 = arith.negf %27 : vector<32x256xf32>
    %29 = math.exp %28 : vector<32x256xf32>
    %cst_21 = arith.constant 1.000000e+00 : f32
    %30 = vector.broadcast %cst_21 : f32 to vector<32x256xf32>
    %31 = arith.addf %30, %29 : vector<32x256xf32>
    %32 = arith.divf %30, %31 : vector<32x256xf32>
    %33 = vector.extract_strided_slice %32 {offsets = [0, 0], sizes = [32, 64], strides = [1, 1]} : vector<32x256xf32> to vector<32x64xf32>
    %34 = vector.extract_strided_slice %32 {offsets = [0, 64], sizes = [32, 64], strides = [1, 1]} : vector<32x256xf32> to vector<32x64xf32>
    %35 = vector.extract_strided_slice %32 {offsets = [0, 128], sizes = [32, 64], strides = [1, 1]} : vector<32x256xf32> to vector<32x64xf32>
    %36 = vector.extract_strided_slice %32 {offsets = [0, 192], sizes = [32, 64], strides = [1, 1]} : vector<32x256xf32> to vector<32x64xf32>
    %37 = arith.mulf %33, %23 : vector<32x64xf32>
    %38 = arith.mulf %34, %36 : vector<32x64xf32>
    %39 = arith.addf %37, %38 : vector<32x64xf32>
    %40 = math.tanh %39 : vector<32x64xf32>
    %41 = arith.mulf %35, %40 : vector<32x64xf32>
    %42 = vector.extract_strided_slice %1 {offsets = [0, 0], sizes = [32, 1], strides = [1, 1]} : vector<32x8xf32> to vector<32x1xf32>
    %43 = arith.subf %41, %13 : vector<32x64xf32>
    %44 = vector.broadcast %42 : vector<32x1xf32> to vector<32x64xf32>
    %45 = arith.mulf %44, %43 : vector<32x64xf32>
    %46 = arith.addf %13, %45 : vector<32x64xf32>
    %c1 = arith.constant 1 : index
    %c0_22 = arith.constant 0 : index
    %c0_23 = arith.constant 0 : index
    %47 = vector.load %arg1[%c1, %c0_22, %c0_23] : memref<8x32x8xf32, #tpu.memory_space<vmem>>, vector<1x32x8xf32>
    %48 = vector.shape_cast %47 : vector<1x32x8xf32> to vector<32x8xf32>
    %49 = vector.extract_strided_slice %0 {offsets = [0, 1], sizes = [32, 1], strides = [1, 1]} : vector<32x8xf32> to vector<32x1xf32>
    %cst_24 = arith.constant dense<0.000000e+00> : vector<32x64xf32>
    %50 = tpu.matmul %39, %2, %cst_24 {dimension_numbers = #tpu.dot_dimension_numbers<[1], [0], [0], [1], [0, 0, 1, 1], [], []>} : vector<32x64xf32>, vector<64x64xf32>, vector<32x64xf32> -> vector<32x64xf32>
    %51 = arith.addf %50, %7 : vector<32x64xf32>
    %52 = math.tanh %51 : vector<32x64xf32>
    %53 = arith.subf %39, %52 : vector<32x64xf32>
    %54 = vector.broadcast %49 : vector<32x1xf32> to vector<32x64xf32>
    %55 = arith.mulf %52, %54 : vector<32x64xf32>
    %56 = arith.addf %53, %55 : vector<32x64xf32>
    %cst_25 = arith.constant dense<0.000000e+00> : vector<32x256xf32>
    %57 = tpu.matmul %41, %3, %cst_25 {dimension_numbers = #tpu.dot_dimension_numbers<[1], [0], [0], [1], [0, 0, 1, 1], [], []>} : vector<32x64xf32>, vector<64x256xf32>, vector<32x256xf32> -> vector<32x256xf32>
    %cst_26 = arith.constant dense<0.000000e+00> : vector<32x256xf32>
    %58 = tpu.matmul %48, %4, %cst_26 {dimension_numbers = #tpu.dot_dimension_numbers<[1], [0], [0], [1], [0, 0, 1, 1], [], []>} : vector<32x8xf32>, vector<8x256xf32>, vector<32x256xf32> -> vector<32x256xf32>
    %59 = arith.addf %57, %58 : vector<32x256xf32>
    %60 = arith.addf %59, %10 : vector<32x256xf32>
    %61 = arith.negf %60 : vector<32x256xf32>
    %62 = math.exp %61 : vector<32x256xf32>
    %cst_27 = arith.constant 1.000000e+00 : f32
    %63 = vector.broadcast %cst_27 : f32 to vector<32x256xf32>
    %64 = arith.addf %63, %62 : vector<32x256xf32>
    %65 = arith.divf %63, %64 : vector<32x256xf32>
    %66 = vector.extract_strided_slice %65 {offsets = [0, 0], sizes = [32, 64], strides = [1, 1]} : vector<32x256xf32> to vector<32x64xf32>
    %67 = vector.extract_strided_slice %65 {offsets = [0, 64], sizes = [32, 64], strides = [1, 1]} : vector<32x256xf32> to vector<32x64xf32>
    %68 = vector.extract_strided_slice %65 {offsets = [0, 128], sizes = [32, 64], strides = [1, 1]} : vector<32x256xf32> to vector<32x64xf32>
    %69 = vector.extract_strided_slice %65 {offsets = [0, 192], sizes = [32, 64], strides = [1, 1]} : vector<32x256xf32> to vector<32x64xf32>
    %70 = arith.mulf %66, %56 : vector<32x64xf32>
    %71 = arith.mulf %67, %69 : vector<32x64xf32>
    %72 = arith.addf %70, %71 : vector<32x64xf32>
    %73 = math.tanh %72 : vector<32x64xf32>
    %74 = arith.mulf %68, %73 : vector<32x64xf32>
    %75 = vector.extract_strided_slice %1 {offsets = [0, 1], sizes = [32, 1], strides = [1, 1]} : vector<32x8xf32> to vector<32x1xf32>
    %76 = arith.subf %74, %46 : vector<32x64xf32>
    %77 = vector.broadcast %75 : vector<32x1xf32> to vector<32x64xf32>
    %78 = arith.mulf %77, %76 : vector<32x64xf32>
    %79 = arith.addf %46, %78 : vector<32x64xf32>
    %c2 = arith.constant 2 : index
    %c0_28 = arith.constant 0 : index
    %c0_29 = arith.constant 0 : index
    %80 = vector.load %arg1[%c2, %c0_28, %c0_29] : memref<8x32x8xf32, #tpu.memory_space<vmem>>, vector<1x32x8xf32>
    %81 = vector.shape_cast %80 : vector<1x32x8xf32> to vector<32x8xf32>
    %82 = vector.extract_strided_slice %0 {offsets = [0, 2], sizes = [32, 1], strides = [1, 1]} : vector<32x8xf32> to vector<32x1xf32>
    %cst_30 = arith.constant dense<0.000000e+00> : vector<32x64xf32>
    %83 = tpu.matmul %72, %2, %cst_30 {dimension_numbers = #tpu.dot_dimension_numbers<[1], [0], [0], [1], [0, 0, 1, 1], [], []>} : vector<32x64xf32>, vector<64x64xf32>, vector<32x64xf32> -> vector<32x64xf32>
    %84 = arith.addf %83, %7 : vector<32x64xf32>
    %85 = math.tanh %84 : vector<32x64xf32>
    %86 = arith.subf %72, %85 : vector<32x64xf32>
    %87 = vector.broadcast %82 : vector<32x1xf32> to vector<32x64xf32>
    %88 = arith.mulf %85, %87 : vector<32x64xf32>
    %89 = arith.addf %86, %88 : vector<32x64xf32>
    %cst_31 = arith.constant dense<0.000000e+00> : vector<32x256xf32>
    %90 = tpu.matmul %74, %3, %cst_31 {dimension_numbers = #tpu.dot_dimension_numbers<[1], [0], [0], [1], [0, 0, 1, 1], [], []>} : vector<32x64xf32>, vector<64x256xf32>, vector<32x256xf32> -> vector<32x256xf32>
    %cst_32 = arith.constant dense<0.000000e+00> : vector<32x256xf32>
    %91 = tpu.matmul %81, %4, %cst_32 {dimension_numbers = #tpu.dot_dimension_numbers<[1], [0], [0], [1], [0, 0, 1, 1], [], []>} : vector<32x8xf32>, vector<8x256xf32>, vector<32x256xf32> -> vector<32x256xf32>
    %92 = arith.addf %90, %91 : vector<32x256xf32>
    %93 = arith.addf %92, %10 : vector<32x256xf32>
    %94 = arith.negf %93 : vector<32x256xf32>
    %95 = math.exp %94 : vector<32x256xf32>
    %cst_33 = arith.constant 1.000000e+00 : f32
    %96 = vector.broadcast %cst_33 : f32 to vector<32x256xf32>
    %97 = arith.addf %96, %95 : vector<32x256xf32>
    %98 = arith.divf %96, %97 : vector<32x256xf32>
    %99 = vector.extract_strided_slice %98 {offsets = [0, 0], sizes = [32, 64], strides = [1, 1]} : vector<32x256xf32> to vector<32x64xf32>
    %100 = vector.extract_strided_slice %98 {offsets = [0, 64], sizes = [32, 64], strides = [1, 1]} : vector<32x256xf32> to vector<32x64xf32>
    %101 = vector.extract_strided_slice %98 {offsets = [0, 128], sizes = [32, 64], strides = [1, 1]} : vector<32x256xf32> to vector<32x64xf32>
    %102 = vector.extract_strided_slice %98 {offsets = [0, 192], sizes = [32, 64], strides = [1, 1]} : vector<32x256xf32> to vector<32x64xf32>
    %103 = arith.mulf %99, %89 : vector<32x64xf32>
    %104 = arith.mulf %100, %102 : vector<32x64xf32>
    %105 = arith.addf %103, %104 : vector<32x64xf32>
    %106 = math.tanh %105 : vector<32x64xf32>
    %107 = arith.mulf %101, %106 : vector<32x64xf32>
    %108 = vector.extract_strided_slice %1 {offsets = [0, 2], sizes = [32, 1], strides = [1, 1]} : vector<32x8xf32> to vector<32x1xf32>
    %109 = arith.subf %107, %79 : vector<32x64xf32>
    %110 = vector.broadcast %108 : vector<32x1xf32> to vector<32x64xf32>
    %111 = arith.mulf %110, %109 : vector<32x64xf32>
    %112 = arith.addf %79, %111 : vector<32x64xf32>
    %c3 = arith.constant 3 : index
    %c0_34 = arith.constant 0 : index
    %c0_35 = arith.constant 0 : index
    %113 = vector.load %arg1[%c3, %c0_34, %c0_35] : memref<8x32x8xf32, #tpu.memory_space<vmem>>, vector<1x32x8xf32>
    %114 = vector.shape_cast %113 : vector<1x32x8xf32> to vector<32x8xf32>
    %115 = vector.extract_strided_slice %0 {offsets = [0, 3], sizes = [32, 1], strides = [1, 1]} : vector<32x8xf32> to vector<32x1xf32>
    %cst_36 = arith.constant dense<0.000000e+00> : vector<32x64xf32>
    %116 = tpu.matmul %105, %2, %cst_36 {dimension_numbers = #tpu.dot_dimension_numbers<[1], [0], [0], [1], [0, 0, 1, 1], [], []>} : vector<32x64xf32>, vector<64x64xf32>, vector<32x64xf32> -> vector<32x64xf32>
    %117 = arith.addf %116, %7 : vector<32x64xf32>
    %118 = math.tanh %117 : vector<32x64xf32>
    %119 = arith.subf %105, %118 : vector<32x64xf32>
    %120 = vector.broadcast %115 : vector<32x1xf32> to vector<32x64xf32>
    %121 = arith.mulf %118, %120 : vector<32x64xf32>
    %122 = arith.addf %119, %121 : vector<32x64xf32>
    %cst_37 = arith.constant dense<0.000000e+00> : vector<32x256xf32>
    %123 = tpu.matmul %107, %3, %cst_37 {dimension_numbers = #tpu.dot_dimension_numbers<[1], [0], [0], [1], [0, 0, 1, 1], [], []>} : vector<32x64xf32>, vector<64x256xf32>, vector<32x256xf32> -> vector<32x256xf32>
    %cst_38 = arith.constant dense<0.000000e+00> : vector<32x256xf32>
    %124 = tpu.matmul %114, %4, %cst_38 {dimension_numbers = #tpu.dot_dimension_numbers<[1], [0], [0], [1], [0, 0, 1, 1], [], []>} : vector<32x8xf32>, vector<8x256xf32>, vector<32x256xf32> -> vector<32x256xf32>
    %125 = arith.addf %123, %124 : vector<32x256xf32>
    %126 = arith.addf %125, %10 : vector<32x256xf32>
    %127 = arith.negf %126 : vector<32x256xf32>
    %128 = math.exp %127 : vector<32x256xf32>
    %cst_39 = arith.constant 1.000000e+00 : f32
    %129 = vector.broadcast %cst_39 : f32 to vector<32x256xf32>
    %130 = arith.addf %129, %128 : vector<32x256xf32>
    %131 = arith.divf %129, %130 : vector<32x256xf32>
    %132 = vector.extract_strided_slice %131 {offsets = [0, 0], sizes = [32, 64], strides = [1, 1]} : vector<32x256xf32> to vector<32x64xf32>
    %133 = vector.extract_strided_slice %131 {offsets = [0, 64], sizes = [32, 64], strides = [1, 1]} : vector<32x256xf32> to vector<32x64xf32>
    %134 = vector.extract_strided_slice %131 {offsets = [0, 128], sizes = [32, 64], strides = [1, 1]} : vector<32x256xf32> to vector<32x64xf32>
    %135 = vector.extract_strided_slice %131 {offsets = [0, 192], sizes = [32, 64], strides = [1, 1]} : vector<32x256xf32> to vector<32x64xf32>
    %136 = arith.mulf %132, %122 : vector<32x64xf32>
    %137 = arith.mulf %133, %135 : vector<32x64xf32>
    %138 = arith.addf %136, %137 : vector<32x64xf32>
    %139 = math.tanh %138 : vector<32x64xf32>
    %140 = arith.mulf %134, %139 : vector<32x64xf32>
    %141 = vector.extract_strided_slice %1 {offsets = [0, 3], sizes = [32, 1], strides = [1, 1]} : vector<32x8xf32> to vector<32x1xf32>
    %142 = arith.subf %140, %112 : vector<32x64xf32>
    %143 = vector.broadcast %141 : vector<32x1xf32> to vector<32x64xf32>
    %144 = arith.mulf %143, %142 : vector<32x64xf32>
    %145 = arith.addf %112, %144 : vector<32x64xf32>
    %c4 = arith.constant 4 : index
    %c0_40 = arith.constant 0 : index
    %c0_41 = arith.constant 0 : index
    %146 = vector.load %arg1[%c4, %c0_40, %c0_41] : memref<8x32x8xf32, #tpu.memory_space<vmem>>, vector<1x32x8xf32>
    %147 = vector.shape_cast %146 : vector<1x32x8xf32> to vector<32x8xf32>
    %148 = vector.extract_strided_slice %0 {offsets = [0, 4], sizes = [32, 1], strides = [1, 1]} : vector<32x8xf32> to vector<32x1xf32>
    %cst_42 = arith.constant dense<0.000000e+00> : vector<32x64xf32>
    %149 = tpu.matmul %138, %2, %cst_42 {dimension_numbers = #tpu.dot_dimension_numbers<[1], [0], [0], [1], [0, 0, 1, 1], [], []>} : vector<32x64xf32>, vector<64x64xf32>, vector<32x64xf32> -> vector<32x64xf32>
    %150 = arith.addf %149, %7 : vector<32x64xf32>
    %151 = math.tanh %150 : vector<32x64xf32>
    %152 = arith.subf %138, %151 : vector<32x64xf32>
    %153 = vector.broadcast %148 : vector<32x1xf32> to vector<32x64xf32>
    %154 = arith.mulf %151, %153 : vector<32x64xf32>
    %155 = arith.addf %152, %154 : vector<32x64xf32>
    %cst_43 = arith.constant dense<0.000000e+00> : vector<32x256xf32>
    %156 = tpu.matmul %140, %3, %cst_43 {dimension_numbers = #tpu.dot_dimension_numbers<[1], [0], [0], [1], [0, 0, 1, 1], [], []>} : vector<32x64xf32>, vector<64x256xf32>, vector<32x256xf32> -> vector<32x256xf32>
    %cst_44 = arith.constant dense<0.000000e+00> : vector<32x256xf32>
    %157 = tpu.matmul %147, %4, %cst_44 {dimension_numbers = #tpu.dot_dimension_numbers<[1], [0], [0], [1], [0, 0, 1, 1], [], []>} : vector<32x8xf32>, vector<8x256xf32>, vector<32x256xf32> -> vector<32x256xf32>
    %158 = arith.addf %156, %157 : vector<32x256xf32>
    %159 = arith.addf %158, %10 : vector<32x256xf32>
    %160 = arith.negf %159 : vector<32x256xf32>
    %161 = math.exp %160 : vector<32x256xf32>
    %cst_45 = arith.constant 1.000000e+00 : f32
    %162 = vector.broadcast %cst_45 : f32 to vector<32x256xf32>
    %163 = arith.addf %162, %161 : vector<32x256xf32>
    %164 = arith.divf %162, %163 : vector<32x256xf32>
    %165 = vector.extract_strided_slice %164 {offsets = [0, 0], sizes = [32, 64], strides = [1, 1]} : vector<32x256xf32> to vector<32x64xf32>
    %166 = vector.extract_strided_slice %164 {offsets = [0, 64], sizes = [32, 64], strides = [1, 1]} : vector<32x256xf32> to vector<32x64xf32>
    %167 = vector.extract_strided_slice %164 {offsets = [0, 128], sizes = [32, 64], strides = [1, 1]} : vector<32x256xf32> to vector<32x64xf32>
    %168 = vector.extract_strided_slice %164 {offsets = [0, 192], sizes = [32, 64], strides = [1, 1]} : vector<32x256xf32> to vector<32x64xf32>
    %169 = arith.mulf %165, %155 : vector<32x64xf32>
    %170 = arith.mulf %166, %168 : vector<32x64xf32>
    %171 = arith.addf %169, %170 : vector<32x64xf32>
    %172 = math.tanh %171 : vector<32x64xf32>
    %173 = arith.mulf %167, %172 : vector<32x64xf32>
    %174 = vector.extract_strided_slice %1 {offsets = [0, 4], sizes = [32, 1], strides = [1, 1]} : vector<32x8xf32> to vector<32x1xf32>
    %175 = arith.subf %173, %145 : vector<32x64xf32>
    %176 = vector.broadcast %174 : vector<32x1xf32> to vector<32x64xf32>
    %177 = arith.mulf %176, %175 : vector<32x64xf32>
    %178 = arith.addf %145, %177 : vector<32x64xf32>
    %c5 = arith.constant 5 : index
    %c0_46 = arith.constant 0 : index
    %c0_47 = arith.constant 0 : index
    %179 = vector.load %arg1[%c5, %c0_46, %c0_47] : memref<8x32x8xf32, #tpu.memory_space<vmem>>, vector<1x32x8xf32>
    %180 = vector.shape_cast %179 : vector<1x32x8xf32> to vector<32x8xf32>
    %181 = vector.extract_strided_slice %0 {offsets = [0, 5], sizes = [32, 1], strides = [1, 1]} : vector<32x8xf32> to vector<32x1xf32>
    %cst_48 = arith.constant dense<0.000000e+00> : vector<32x64xf32>
    %182 = tpu.matmul %171, %2, %cst_48 {dimension_numbers = #tpu.dot_dimension_numbers<[1], [0], [0], [1], [0, 0, 1, 1], [], []>} : vector<32x64xf32>, vector<64x64xf32>, vector<32x64xf32> -> vector<32x64xf32>
    %183 = arith.addf %182, %7 : vector<32x64xf32>
    %184 = math.tanh %183 : vector<32x64xf32>
    %185 = arith.subf %171, %184 : vector<32x64xf32>
    %186 = vector.broadcast %181 : vector<32x1xf32> to vector<32x64xf32>
    %187 = arith.mulf %184, %186 : vector<32x64xf32>
    %188 = arith.addf %185, %187 : vector<32x64xf32>
    %cst_49 = arith.constant dense<0.000000e+00> : vector<32x256xf32>
    %189 = tpu.matmul %173, %3, %cst_49 {dimension_numbers = #tpu.dot_dimension_numbers<[1], [0], [0], [1], [0, 0, 1, 1], [], []>} : vector<32x64xf32>, vector<64x256xf32>, vector<32x256xf32> -> vector<32x256xf32>
    %cst_50 = arith.constant dense<0.000000e+00> : vector<32x256xf32>
    %190 = tpu.matmul %180, %4, %cst_50 {dimension_numbers = #tpu.dot_dimension_numbers<[1], [0], [0], [1], [0, 0, 1, 1], [], []>} : vector<32x8xf32>, vector<8x256xf32>, vector<32x256xf32> -> vector<32x256xf32>
    %191 = arith.addf %189, %190 : vector<32x256xf32>
    %192 = arith.addf %191, %10 : vector<32x256xf32>
    %193 = arith.negf %192 : vector<32x256xf32>
    %194 = math.exp %193 : vector<32x256xf32>
    %cst_51 = arith.constant 1.000000e+00 : f32
    %195 = vector.broadcast %cst_51 : f32 to vector<32x256xf32>
    %196 = arith.addf %195, %194 : vector<32x256xf32>
    %197 = arith.divf %195, %196 : vector<32x256xf32>
    %198 = vector.extract_strided_slice %197 {offsets = [0, 0], sizes = [32, 64], strides = [1, 1]} : vector<32x256xf32> to vector<32x64xf32>
    %199 = vector.extract_strided_slice %197 {offsets = [0, 64], sizes = [32, 64], strides = [1, 1]} : vector<32x256xf32> to vector<32x64xf32>
    %200 = vector.extract_strided_slice %197 {offsets = [0, 128], sizes = [32, 64], strides = [1, 1]} : vector<32x256xf32> to vector<32x64xf32>
    %201 = vector.extract_strided_slice %197 {offsets = [0, 192], sizes = [32, 64], strides = [1, 1]} : vector<32x256xf32> to vector<32x64xf32>
    %202 = arith.mulf %198, %188 : vector<32x64xf32>
    %203 = arith.mulf %199, %201 : vector<32x64xf32>
    %204 = arith.addf %202, %203 : vector<32x64xf32>
    %205 = math.tanh %204 : vector<32x64xf32>
    %206 = arith.mulf %200, %205 : vector<32x64xf32>
    %207 = vector.extract_strided_slice %1 {offsets = [0, 5], sizes = [32, 1], strides = [1, 1]} : vector<32x8xf32> to vector<32x1xf32>
    %208 = arith.subf %206, %178 : vector<32x64xf32>
    %209 = vector.broadcast %207 : vector<32x1xf32> to vector<32x64xf32>
    %210 = arith.mulf %209, %208 : vector<32x64xf32>
    %211 = arith.addf %178, %210 : vector<32x64xf32>
    %c6 = arith.constant 6 : index
    %c0_52 = arith.constant 0 : index
    %c0_53 = arith.constant 0 : index
    %212 = vector.load %arg1[%c6, %c0_52, %c0_53] : memref<8x32x8xf32, #tpu.memory_space<vmem>>, vector<1x32x8xf32>
    %213 = vector.shape_cast %212 : vector<1x32x8xf32> to vector<32x8xf32>
    %214 = vector.extract_strided_slice %0 {offsets = [0, 6], sizes = [32, 1], strides = [1, 1]} : vector<32x8xf32> to vector<32x1xf32>
    %cst_54 = arith.constant dense<0.000000e+00> : vector<32x64xf32>
    %215 = tpu.matmul %204, %2, %cst_54 {dimension_numbers = #tpu.dot_dimension_numbers<[1], [0], [0], [1], [0, 0, 1, 1], [], []>} : vector<32x64xf32>, vector<64x64xf32>, vector<32x64xf32> -> vector<32x64xf32>
    %216 = arith.addf %215, %7 : vector<32x64xf32>
    %217 = math.tanh %216 : vector<32x64xf32>
    %218 = arith.subf %204, %217 : vector<32x64xf32>
    %219 = vector.broadcast %214 : vector<32x1xf32> to vector<32x64xf32>
    %220 = arith.mulf %217, %219 : vector<32x64xf32>
    %221 = arith.addf %218, %220 : vector<32x64xf32>
    %cst_55 = arith.constant dense<0.000000e+00> : vector<32x256xf32>
    %222 = tpu.matmul %206, %3, %cst_55 {dimension_numbers = #tpu.dot_dimension_numbers<[1], [0], [0], [1], [0, 0, 1, 1], [], []>} : vector<32x64xf32>, vector<64x256xf32>, vector<32x256xf32> -> vector<32x256xf32>
    %cst_56 = arith.constant dense<0.000000e+00> : vector<32x256xf32>
    %223 = tpu.matmul %213, %4, %cst_56 {dimension_numbers = #tpu.dot_dimension_numbers<[1], [0], [0], [1], [0, 0, 1, 1], [], []>} : vector<32x8xf32>, vector<8x256xf32>, vector<32x256xf32> -> vector<32x256xf32>
    %224 = arith.addf %222, %223 : vector<32x256xf32>
    %225 = arith.addf %224, %10 : vector<32x256xf32>
    %226 = arith.negf %225 : vector<32x256xf32>
    %227 = math.exp %226 : vector<32x256xf32>
    %cst_57 = arith.constant 1.000000e+00 : f32
    %228 = vector.broadcast %cst_57 : f32 to vector<32x256xf32>
    %229 = arith.addf %228, %227 : vector<32x256xf32>
    %230 = arith.divf %228, %229 : vector<32x256xf32>
    %231 = vector.extract_strided_slice %230 {offsets = [0, 0], sizes = [32, 64], strides = [1, 1]} : vector<32x256xf32> to vector<32x64xf32>
    %232 = vector.extract_strided_slice %230 {offsets = [0, 64], sizes = [32, 64], strides = [1, 1]} : vector<32x256xf32> to vector<32x64xf32>
    %233 = vector.extract_strided_slice %230 {offsets = [0, 128], sizes = [32, 64], strides = [1, 1]} : vector<32x256xf32> to vector<32x64xf32>
    %234 = vector.extract_strided_slice %230 {offsets = [0, 192], sizes = [32, 64], strides = [1, 1]} : vector<32x256xf32> to vector<32x64xf32>
    %235 = arith.mulf %231, %221 : vector<32x64xf32>
    %236 = arith.mulf %232, %234 : vector<32x64xf32>
    %237 = arith.addf %235, %236 : vector<32x64xf32>
    %238 = math.tanh %237 : vector<32x64xf32>
    %239 = arith.mulf %233, %238 : vector<32x64xf32>
    %240 = vector.extract_strided_slice %1 {offsets = [0, 6], sizes = [32, 1], strides = [1, 1]} : vector<32x8xf32> to vector<32x1xf32>
    %241 = arith.subf %239, %211 : vector<32x64xf32>
    %242 = vector.broadcast %240 : vector<32x1xf32> to vector<32x64xf32>
    %243 = arith.mulf %242, %241 : vector<32x64xf32>
    %244 = arith.addf %211, %243 : vector<32x64xf32>
    %c7 = arith.constant 7 : index
    %c0_58 = arith.constant 0 : index
    %c0_59 = arith.constant 0 : index
    %245 = vector.load %arg1[%c7, %c0_58, %c0_59] : memref<8x32x8xf32, #tpu.memory_space<vmem>>, vector<1x32x8xf32>
    %246 = vector.shape_cast %245 : vector<1x32x8xf32> to vector<32x8xf32>
    %247 = vector.extract_strided_slice %0 {offsets = [0, 7], sizes = [32, 1], strides = [1, 1]} : vector<32x8xf32> to vector<32x1xf32>
    %cst_60 = arith.constant dense<0.000000e+00> : vector<32x64xf32>
    %248 = tpu.matmul %237, %2, %cst_60 {dimension_numbers = #tpu.dot_dimension_numbers<[1], [0], [0], [1], [0, 0, 1, 1], [], []>} : vector<32x64xf32>, vector<64x64xf32>, vector<32x64xf32> -> vector<32x64xf32>
    %249 = arith.addf %248, %7 : vector<32x64xf32>
    %250 = math.tanh %249 : vector<32x64xf32>
    %251 = arith.subf %237, %250 : vector<32x64xf32>
    %252 = vector.broadcast %247 : vector<32x1xf32> to vector<32x64xf32>
    %253 = arith.mulf %250, %252 : vector<32x64xf32>
    %254 = arith.addf %251, %253 : vector<32x64xf32>
    %cst_61 = arith.constant dense<0.000000e+00> : vector<32x256xf32>
    %255 = tpu.matmul %239, %3, %cst_61 {dimension_numbers = #tpu.dot_dimension_numbers<[1], [0], [0], [1], [0, 0, 1, 1], [], []>} : vector<32x64xf32>, vector<64x256xf32>, vector<32x256xf32> -> vector<32x256xf32>
    %cst_62 = arith.constant dense<0.000000e+00> : vector<32x256xf32>
    %256 = tpu.matmul %246, %4, %cst_62 {dimension_numbers = #tpu.dot_dimension_numbers<[1], [0], [0], [1], [0, 0, 1, 1], [], []>} : vector<32x8xf32>, vector<8x256xf32>, vector<32x256xf32> -> vector<32x256xf32>
    %257 = arith.addf %255, %256 : vector<32x256xf32>
    %258 = arith.addf %257, %10 : vector<32x256xf32>
    %259 = arith.negf %258 : vector<32x256xf32>
    %260 = math.exp %259 : vector<32x256xf32>
    %cst_63 = arith.constant 1.000000e+00 : f32
    %261 = vector.broadcast %cst_63 : f32 to vector<32x256xf32>
    %262 = arith.addf %261, %260 : vector<32x256xf32>
    %263 = arith.divf %261, %262 : vector<32x256xf32>
    %264 = vector.extract_strided_slice %263 {offsets = [0, 0], sizes = [32, 64], strides = [1, 1]} : vector<32x256xf32> to vector<32x64xf32>
    %265 = vector.extract_strided_slice %263 {offsets = [0, 64], sizes = [32, 64], strides = [1, 1]} : vector<32x256xf32> to vector<32x64xf32>
    %266 = vector.extract_strided_slice %263 {offsets = [0, 128], sizes = [32, 64], strides = [1, 1]} : vector<32x256xf32> to vector<32x64xf32>
    %267 = vector.extract_strided_slice %263 {offsets = [0, 192], sizes = [32, 64], strides = [1, 1]} : vector<32x256xf32> to vector<32x64xf32>
    %268 = arith.mulf %264, %254 : vector<32x64xf32>
    %269 = arith.mulf %265, %267 : vector<32x64xf32>
    %270 = arith.addf %268, %269 : vector<32x64xf32>
    %271 = math.tanh %270 : vector<32x64xf32>
    %272 = arith.mulf %266, %271 : vector<32x64xf32>
    %273 = vector.extract_strided_slice %1 {offsets = [0, 7], sizes = [32, 1], strides = [1, 1]} : vector<32x8xf32> to vector<32x1xf32>
    %274 = arith.subf %272, %244 : vector<32x64xf32>
    %275 = vector.broadcast %273 : vector<32x1xf32> to vector<32x64xf32>
    %276 = arith.mulf %275, %274 : vector<32x64xf32>
    %277 = arith.addf %244, %276 : vector<32x64xf32>
    %278 = vector.extract_strided_slice %277 {offsets = [0, 0], sizes = [32, 32], strides = [1, 1]} : vector<32x64xf32> to vector<32x32xf32>
    %279 = vector.extract_strided_slice %277 {offsets = [0, 32], sizes = [32, 32], strides = [1, 1]} : vector<32x64xf32> to vector<32x32xf32>
    %c0_64 = arith.constant 0 : index
    %c0_65 = arith.constant 0 : index
    %280 = vector.load %arg10[%c0_64, %c0_65] : memref<32x1xf32, #tpu.memory_space<vmem>>, vector<32x1xf32>
    %cst_66 = arith.constant dense<0.000000e+00> : vector<32x1xf32>
    %281 = tpu.matmul %279, %280, %cst_66 {dimension_numbers = #tpu.dot_dimension_numbers<[1], [0], [0], [1], [0, 0, 1, 1], [], []>} : vector<32x32xf32>, vector<32x1xf32>, vector<32x1xf32> -> vector<32x1xf32>
    %cst_67 = arith.constant 0.000000e+00 : f32
    %282 = vector.broadcast %cst_67 : f32 to vector<32x1xf32>
    %283 = arith.cmpf ogt, %281, %282 : vector<32x1xf32>
    %cst_68 = arith.constant 0.00999999977 : f32
    %284 = vector.broadcast %cst_68 : f32 to vector<32x1xf32>
    %285 = arith.mulf %284, %281 : vector<32x1xf32>
    %286 = arith.select %283, %281, %285 : vector<32x1xi1>, vector<32x1xf32>
    %c0_69 = arith.constant 0 : index
    %c0_70 = arith.constant 0 : index
    %287 = vector.load %arg4[%c0_69, %c0_70] : memref<32x16xf32, #tpu.memory_space<vmem>>, vector<32x16xf32>
    %c0_71 = arith.constant 0 : index
    %c0_72 = arith.constant 0 : index
    %288 = vector.load %arg11[%c0_71, %c0_72] : memref<16x32xf32, #tpu.memory_space<vmem>>, vector<16x32xf32>
    %cst_73 = arith.constant dense<0.000000e+00> : vector<32x32xf32>
    %289 = tpu.matmul %287, %288, %cst_73 {dimension_numbers = #tpu.dot_dimension_numbers<[1], [0], [0], [1], [0, 0, 1, 1], [], []>} : vector<32x16xf32>, vector<16x32xf32>, vector<32x32xf32> -> vector<32x32xf32>
    %c0_74 = arith.constant 0 : index
    %c0_75 = arith.constant 0 : index
    %290 = vector.load %arg12[%c0_74, %c0_75] : memref<32x32xf32, #tpu.memory_space<vmem>>, vector<32x32xf32>
    %cst_76 = arith.constant dense<0.000000e+00> : vector<32x32xf32>
    %291 = tpu.matmul %278, %290, %cst_76 {dimension_numbers = #tpu.dot_dimension_numbers<[1], [0], [0], [1], [0, 0, 1, 1], [], []>} : vector<32x32xf32>, vector<32x32xf32>, vector<32x32xf32> -> vector<32x32xf32>
    %292 = arith.addf %289, %291 : vector<32x32xf32>
    %c0_77 = arith.constant 0 : index
    %c0_78 = arith.constant 0 : index
    %293 = vector.load %arg13[%c0_77, %c0_78] : memref<1x32xf32, #tpu.memory_space<vmem>>, vector<1x32xf32>
    %294 = vector.broadcast %293 : vector<1x32xf32> to vector<32x32xf32>
    %295 = arith.addf %292, %294 : vector<32x32xf32>
    %cst_79 = arith.constant 0.000000e+00 : f32
    %296 = vector.broadcast %cst_79 : f32 to vector<32x32xf32>
    %297 = arith.maximumf %295, %296 : vector<32x32xf32>
    %c0_80 = arith.constant 0 : index
    %c0_81 = arith.constant 0 : index
    %298 = vector.load %arg14[%c0_80, %c0_81] : memref<32x32xf32, #tpu.memory_space<vmem>>, vector<32x32xf32>
    tpu.vector_store %arg14[%c0_80, %c0_81], %297 {strides = array<i32>} : memref<32x32xf32, #tpu.memory_space<vmem>>, vector<32x32xf32>,
    %c0_82 = arith.constant 0 : index
    %c0_83 = arith.constant 0 : index
    %299 = vector.load %arg15[%c0_82, %c0_83] : memref<32x1xf32, #tpu.memory_space<vmem>>, vector<32x1xf32>
    tpu.vector_store %arg15[%c0_82, %c0_83], %286 {strides = array<i32>} : memref<32x1xf32, #tpu.memory_space<vmem>>, vector<32x1xf32>,
    return
  }
  func.func @transform_0(%arg0: i32) -> (i32, i32, i32) {
    %c0_i32 = arith.constant 0 : i32
    %c0_i32_0 = arith.constant 0 : i32
    %c0_i32_1 = arith.constant 0 : i32
    return %c0_i32, %arg0, %c0_i32_0 : i32, i32, i32
  }
  func.func @transform_1(%arg0: i32) -> (i32, i32) {
    %c0_i32 = arith.constant 0 : i32
    %c0_i32_0 = arith.constant 0 : i32
    return %arg0, %c0_i32 : i32, i32
  }
  func.func @transform_2(%arg0: i32) -> (i32, i32) {
    %c0_i32 = arith.constant 0 : i32
    %c0_i32_0 = arith.constant 0 : i32
    return %arg0, %c0_i32 : i32, i32
  }
  func.func @transform_3(%arg0: i32) -> (i32, i32) {
    %c0_i32 = arith.constant 0 : i32
    %c0_i32_0 = arith.constant 0 : i32
    return %arg0, %c0_i32 : i32, i32
  }
  func.func @transform_4(%arg0: i32) -> (i32, i32) {
    %c0_i32 = arith.constant 0 : i32
    %c0_i32_0 = arith.constant 0 : i32
    %c0_i32_1 = arith.constant 0 : i32
    return %c0_i32, %c0_i32_0 : i32, i32
  }
  func.func @transform_5(%arg0: i32) -> (i32, i32) {
    %c0_i32 = arith.constant 0 : i32
    %c0_i32_0 = arith.constant 0 : i32
    %c0_i32_1 = arith.constant 0 : i32
    return %c0_i32, %c0_i32_0 : i32, i32
  }
  func.func @transform_6(%arg0: i32) -> (i32, i32) {
    %c0_i32 = arith.constant 0 : i32
    %c0_i32_0 = arith.constant 0 : i32
    %c0_i32_1 = arith.constant 0 : i32
    return %c0_i32, %c0_i32_0 : i32, i32
  }
  func.func @transform_7(%arg0: i32) -> (i32, i32) {
    %c0_i32 = arith.constant 0 : i32
    %c0_i32_0 = arith.constant 0 : i32
    %c0_i32_1 = arith.constant 0 : i32
    return %c0_i32, %c0_i32_0 : i32, i32
  }
  func.func @transform_8(%arg0: i32) -> (i32, i32) {
    %c0_i32 = arith.constant 0 : i32
    %c0_i32_0 = arith.constant 0 : i32
    %c0_i32_1 = arith.constant 0 : i32
    return %c0_i32, %c0_i32_0 : i32, i32
  }
  func.func @transform_9(%arg0: i32) -> (i32, i32) {
    %c0_i32 = arith.constant 0 : i32
    %c0_i32_0 = arith.constant 0 : i32
    %c0_i32_1 = arith.constant 0 : i32
    return %c0_i32, %c0_i32_0 : i32, i32
  }
  func.func @transform_10(%arg0: i32) -> (i32, i32) {
    %c0_i32 = arith.constant 0 : i32
    %c0_i32_0 = arith.constant 0 : i32
    %c0_i32_1 = arith.constant 0 : i32
    return %c0_i32, %c0_i32_0 : i32, i32
  }
  func.func @transform_11(%arg0: i32) -> (i32, i32) {
    %c0_i32 = arith.constant 0 : i32
    %c0_i32_0 = arith.constant 0 : i32
    %c0_i32_1 = arith.constant 0 : i32
    return %c0_i32, %c0_i32_0 : i32, i32
  }
  func.func @transform_12(%arg0: i32) -> (i32, i32) {
    %c0_i32 = arith.constant 0 : i32
    %c0_i32_0 = arith.constant 0 : i32
    %c0_i32_1 = arith.constant 0 : i32
    return %c0_i32, %c0_i32_0 : i32, i32
  }
  func.func @transform_13(%arg0: i32) -> (i32, i32) {
    %c0_i32 = arith.constant 0 : i32
    %c0_i32_0 = arith.constant 0 : i32
    return %arg0, %c0_i32 : i32, i32
  }
  func.func @transform_14(%arg0: i32) -> (i32, i32) {
    %c0_i32 = arith.constant 0 : i32
    %c0_i32_0 = arith.constant 0 : i32
    return %arg0, %c0_i32 : i32, i32
  }
}

module attributes {stable_mosaic.version = 11 : i64} {
  func.func @reduce_update_kernel(%arg0: i32, %arg1: memref<8x4xf32, #tpu.memory_space<vmem>>, %arg2: memref<8x128xf32, #tpu.memory_space<vmem>>, %arg3: memref<8x16xf32, #tpu.memory_space<vmem>>, %arg4: memref<16x32xf32, #tpu.memory_space<vmem>>, %arg5: memref<1x32xf32, #tpu.memory_space<vmem>>, %arg6: memref<16x32xf32, #tpu.memory_space<vmem>>, %arg7: memref<32x32xf32, #tpu.memory_space<vmem>>, %arg8: memref<1x32xf32, #tpu.memory_space<vmem>>, %arg9: memref<32x6xf32, #tpu.memory_space<vmem>>, %arg10: memref<1x6xf32, #tpu.memory_space<vmem>>, %arg11: memref<8x6xf32, #tpu.memory_space<vmem>>) attributes {dimension_semantics = [#tpu.dimension_semantics<parallel>], iteration_bounds = array<i64: 1>, scalar_prefetch = 0 : i64, scratch_operands = 0 : i64, tpu.core_type = #tpu.core_type<tc>, window_params = [{transform_indices = @transform_0, window_bounds = array<i64: 8, 4>}, {transform_indices = @transform_1, window_bounds = array<i64: 8, 128>}, {transform_indices = @transform_2, window_bounds = array<i64: 8, 16>}, {pipeline_mode = #tpu.pipeline_mode<synchronous>, transform_indices = @transform_3, window_bounds = array<i64: 16, 32>}, {pipeline_mode = #tpu.pipeline_mode<synchronous>, transform_indices = @transform_4, window_bounds = array<i64: 1, 32>}, {pipeline_mode = #tpu.pipeline_mode<synchronous>, transform_indices = @transform_5, window_bounds = array<i64: 16, 32>}, {pipeline_mode = #tpu.pipeline_mode<synchronous>, transform_indices = @transform_6, window_bounds = array<i64: 32, 32>}, {pipeline_mode = #tpu.pipeline_mode<synchronous>, transform_indices = @transform_7, window_bounds = array<i64: 1, 32>}, {pipeline_mode = #tpu.pipeline_mode<synchronous>, transform_indices = @transform_8, window_bounds = array<i64: 32, 6>}, {pipeline_mode = #tpu.pipeline_mode<synchronous>, transform_indices = @transform_9, window_bounds = array<i64: 1, 6>}, {transform_indices = @transform_10, window_bounds = array<i64: 8, 6>}]} {
    %c0 = arith.constant 0 : index
    %c0_0 = arith.constant 0 : index
    %0 = vector.load %arg1[%c0, %c0_0] : memref<8x4xf32, #tpu.memory_space<vmem>>, vector<8x4xf32>
    %1 = vector.extract_strided_slice %0 {offsets = [0, 0], sizes = [8, 1], strides = [1, 1]} : vector<8x4xf32> to vector<8x1xf32>
    %2 = vector.extract_strided_slice %0 {offsets = [0, 1], sizes = [8, 1], strides = [1, 1]} : vector<8x4xf32> to vector<8x1xf32>
    %3 = vector.extract_strided_slice %0 {offsets = [0, 2], sizes = [8, 1], strides = [1, 1]} : vector<8x4xf32> to vector<8x1xf32>
    %4 = vector.extract_strided_slice %0 {offsets = [0, 3], sizes = [8, 1], strides = [1, 1]} : vector<8x4xf32> to vector<8x1xf32>
    %5 = arith.maximumf %1, %2 : vector<8x1xf32>
    %6 = arith.maximumf %5, %3 : vector<8x1xf32>
    %7 = arith.maximumf %6, %4 : vector<8x1xf32>
    %8 = arith.subf %1, %7 : vector<8x1xf32>
    %9 = arith.subf %2, %7 : vector<8x1xf32>
    %10 = arith.subf %3, %7 : vector<8x1xf32>
    %11 = arith.subf %4, %7 : vector<8x1xf32>
    %cst = arith.constant 0.000000e+00 : f32
    %12 = vector.broadcast %cst : f32 to vector<8x1xf32>
    %cst_1 = arith.constant 0.000000e+00 : f32
    %13 = vector.broadcast %cst_1 : f32 to vector<8x1xf32>
    %14 = arith.cmpf oge, %8, %8 : vector<8x1xf32>
    %15 = arith.extui %14 : vector<8x1xi1> to vector<8x1xi32>
    %16 = arith.sitofp %15 : vector<8x1xi32> to vector<8x1xf32>
    %17 = arith.addf %12, %16 : vector<8x1xf32>
    %18 = arith.mulf %16, %8 : vector<8x1xf32>
    %19 = arith.addf %13, %18 : vector<8x1xf32>
    %20 = arith.cmpf oge, %9, %8 : vector<8x1xf32>
    %21 = arith.extui %20 : vector<8x1xi1> to vector<8x1xi32>
    %22 = arith.sitofp %21 : vector<8x1xi32> to vector<8x1xf32>
    %23 = arith.addf %17, %22 : vector<8x1xf32>
    %24 = arith.mulf %22, %9 : vector<8x1xf32>
    %25 = arith.addf %19, %24 : vector<8x1xf32>
    %26 = arith.cmpf oge, %10, %8 : vector<8x1xf32>
    %27 = arith.extui %26 : vector<8x1xi1> to vector<8x1xi32>
    %28 = arith.sitofp %27 : vector<8x1xi32> to vector<8x1xf32>
    %29 = arith.addf %23, %28 : vector<8x1xf32>
    %30 = arith.mulf %28, %10 : vector<8x1xf32>
    %31 = arith.addf %25, %30 : vector<8x1xf32>
    %32 = arith.cmpf oge, %11, %8 : vector<8x1xf32>
    %33 = arith.extui %32 : vector<8x1xi1> to vector<8x1xi32>
    %34 = arith.sitofp %33 : vector<8x1xi32> to vector<8x1xf32>
    %35 = arith.addf %29, %34 : vector<8x1xf32>
    %36 = arith.mulf %34, %11 : vector<8x1xf32>
    %37 = arith.addf %31, %36 : vector<8x1xf32>
    %38 = arith.mulf %35, %8 : vector<8x1xf32>
    %cst_2 = arith.constant 1.000000e+00 : f32
    %39 = vector.broadcast %cst_2 : f32 to vector<8x1xf32>
    %40 = arith.addf %39, %38 : vector<8x1xf32>
    %41 = arith.cmpf ogt, %40, %37 : vector<8x1xf32>
    %42 = arith.extui %41 : vector<8x1xi1> to vector<8x1xi32>
    %43 = arith.sitofp %42 : vector<8x1xi32> to vector<8x1xf32>
    %cst_3 = arith.constant 0.000000e+00 : f32
    %44 = vector.broadcast %cst_3 : f32 to vector<8x1xf32>
    %cst_4 = arith.constant 0.000000e+00 : f32
    %45 = vector.broadcast %cst_4 : f32 to vector<8x1xf32>
    %46 = arith.cmpf oge, %8, %9 : vector<8x1xf32>
    %47 = arith.extui %46 : vector<8x1xi1> to vector<8x1xi32>
    %48 = arith.sitofp %47 : vector<8x1xi32> to vector<8x1xf32>
    %49 = arith.addf %44, %48 : vector<8x1xf32>
    %50 = arith.mulf %48, %8 : vector<8x1xf32>
    %51 = arith.addf %45, %50 : vector<8x1xf32>
    %52 = arith.cmpf oge, %9, %9 : vector<8x1xf32>
    %53 = arith.extui %52 : vector<8x1xi1> to vector<8x1xi32>
    %54 = arith.sitofp %53 : vector<8x1xi32> to vector<8x1xf32>
    %55 = arith.addf %49, %54 : vector<8x1xf32>
    %56 = arith.mulf %54, %9 : vector<8x1xf32>
    %57 = arith.addf %51, %56 : vector<8x1xf32>
    %58 = arith.cmpf oge, %10, %9 : vector<8x1xf32>
    %59 = arith.extui %58 : vector<8x1xi1> to vector<8x1xi32>
    %60 = arith.sitofp %59 : vector<8x1xi32> to vector<8x1xf32>
    %61 = arith.addf %55, %60 : vector<8x1xf32>
    %62 = arith.mulf %60, %10 : vector<8x1xf32>
    %63 = arith.addf %57, %62 : vector<8x1xf32>
    %64 = arith.cmpf oge, %11, %9 : vector<8x1xf32>
    %65 = arith.extui %64 : vector<8x1xi1> to vector<8x1xi32>
    %66 = arith.sitofp %65 : vector<8x1xi32> to vector<8x1xf32>
    %67 = arith.addf %61, %66 : vector<8x1xf32>
    %68 = arith.mulf %66, %11 : vector<8x1xf32>
    %69 = arith.addf %63, %68 : vector<8x1xf32>
    %70 = arith.mulf %67, %9 : vector<8x1xf32>
    %cst_5 = arith.constant 1.000000e+00 : f32
    %71 = vector.broadcast %cst_5 : f32 to vector<8x1xf32>
    %72 = arith.addf %71, %70 : vector<8x1xf32>
    %73 = arith.cmpf ogt, %72, %69 : vector<8x1xf32>
    %74 = arith.extui %73 : vector<8x1xi1> to vector<8x1xi32>
    %75 = arith.sitofp %74 : vector<8x1xi32> to vector<8x1xf32>
    %cst_6 = arith.constant 0.000000e+00 : f32
    %76 = vector.broadcast %cst_6 : f32 to vector<8x1xf32>
    %cst_7 = arith.constant 0.000000e+00 : f32
    %77 = vector.broadcast %cst_7 : f32 to vector<8x1xf32>
    %78 = arith.cmpf oge, %8, %10 : vector<8x1xf32>
    %79 = arith.extui %78 : vector<8x1xi1> to vector<8x1xi32>
    %80 = arith.sitofp %79 : vector<8x1xi32> to vector<8x1xf32>
    %81 = arith.addf %76, %80 : vector<8x1xf32>
    %82 = arith.mulf %80, %8 : vector<8x1xf32>
    %83 = arith.addf %77, %82 : vector<8x1xf32>
    %84 = arith.cmpf oge, %9, %10 : vector<8x1xf32>
    %85 = arith.extui %84 : vector<8x1xi1> to vector<8x1xi32>
    %86 = arith.sitofp %85 : vector<8x1xi32> to vector<8x1xf32>
    %87 = arith.addf %81, %86 : vector<8x1xf32>
    %88 = arith.mulf %86, %9 : vector<8x1xf32>
    %89 = arith.addf %83, %88 : vector<8x1xf32>
    %90 = arith.cmpf oge, %10, %10 : vector<8x1xf32>
    %91 = arith.extui %90 : vector<8x1xi1> to vector<8x1xi32>
    %92 = arith.sitofp %91 : vector<8x1xi32> to vector<8x1xf32>
    %93 = arith.addf %87, %92 : vector<8x1xf32>
    %94 = arith.mulf %92, %10 : vector<8x1xf32>
    %95 = arith.addf %89, %94 : vector<8x1xf32>
    %96 = arith.cmpf oge, %11, %10 : vector<8x1xf32>
    %97 = arith.extui %96 : vector<8x1xi1> to vector<8x1xi32>
    %98 = arith.sitofp %97 : vector<8x1xi32> to vector<8x1xf32>
    %99 = arith.addf %93, %98 : vector<8x1xf32>
    %100 = arith.mulf %98, %11 : vector<8x1xf32>
    %101 = arith.addf %95, %100 : vector<8x1xf32>
    %102 = arith.mulf %99, %10 : vector<8x1xf32>
    %cst_8 = arith.constant 1.000000e+00 : f32
    %103 = vector.broadcast %cst_8 : f32 to vector<8x1xf32>
    %104 = arith.addf %103, %102 : vector<8x1xf32>
    %105 = arith.cmpf ogt, %104, %101 : vector<8x1xf32>
    %106 = arith.extui %105 : vector<8x1xi1> to vector<8x1xi32>
    %107 = arith.sitofp %106 : vector<8x1xi32> to vector<8x1xf32>
    %cst_9 = arith.constant 0.000000e+00 : f32
    %108 = vector.broadcast %cst_9 : f32 to vector<8x1xf32>
    %cst_10 = arith.constant 0.000000e+00 : f32
    %109 = vector.broadcast %cst_10 : f32 to vector<8x1xf32>
    %110 = arith.cmpf oge, %8, %11 : vector<8x1xf32>
    %111 = arith.extui %110 : vector<8x1xi1> to vector<8x1xi32>
    %112 = arith.sitofp %111 : vector<8x1xi32> to vector<8x1xf32>
    %113 = arith.addf %108, %112 : vector<8x1xf32>
    %114 = arith.mulf %112, %8 : vector<8x1xf32>
    %115 = arith.addf %109, %114 : vector<8x1xf32>
    %116 = arith.cmpf oge, %9, %11 : vector<8x1xf32>
    %117 = arith.extui %116 : vector<8x1xi1> to vector<8x1xi32>
    %118 = arith.sitofp %117 : vector<8x1xi32> to vector<8x1xf32>
    %119 = arith.addf %113, %118 : vector<8x1xf32>
    %120 = arith.mulf %118, %9 : vector<8x1xf32>
    %121 = arith.addf %115, %120 : vector<8x1xf32>
    %122 = arith.cmpf oge, %10, %11 : vector<8x1xf32>
    %123 = arith.extui %122 : vector<8x1xi1> to vector<8x1xi32>
    %124 = arith.sitofp %123 : vector<8x1xi32> to vector<8x1xf32>
    %125 = arith.addf %119, %124 : vector<8x1xf32>
    %126 = arith.mulf %124, %10 : vector<8x1xf32>
    %127 = arith.addf %121, %126 : vector<8x1xf32>
    %128 = arith.cmpf oge, %11, %11 : vector<8x1xf32>
    %129 = arith.extui %128 : vector<8x1xi1> to vector<8x1xi32>
    %130 = arith.sitofp %129 : vector<8x1xi32> to vector<8x1xf32>
    %131 = arith.addf %125, %130 : vector<8x1xf32>
    %132 = arith.mulf %130, %11 : vector<8x1xf32>
    %133 = arith.addf %127, %132 : vector<8x1xf32>
    %134 = arith.mulf %131, %11 : vector<8x1xf32>
    %cst_11 = arith.constant 1.000000e+00 : f32
    %135 = vector.broadcast %cst_11 : f32 to vector<8x1xf32>
    %136 = arith.addf %135, %134 : vector<8x1xf32>
    %137 = arith.cmpf ogt, %136, %133 : vector<8x1xf32>
    %138 = arith.extui %137 : vector<8x1xi1> to vector<8x1xi32>
    %139 = arith.sitofp %138 : vector<8x1xi32> to vector<8x1xf32>
    %140 = arith.mulf %43, %8 : vector<8x1xf32>
    %141 = arith.addf %43, %75 : vector<8x1xf32>
    %142 = arith.mulf %75, %9 : vector<8x1xf32>
    %143 = arith.addf %140, %142 : vector<8x1xf32>
    %144 = arith.addf %141, %107 : vector<8x1xf32>
    %145 = arith.mulf %107, %10 : vector<8x1xf32>
    %146 = arith.addf %143, %145 : vector<8x1xf32>
    %147 = arith.addf %144, %139 : vector<8x1xf32>
    %148 = arith.mulf %139, %11 : vector<8x1xf32>
    %149 = arith.addf %146, %148 : vector<8x1xf32>
    %cst_12 = arith.constant 1.000000e+00 : f32
    %150 = vector.broadcast %cst_12 : f32 to vector<8x1xf32>
    %151 = arith.subf %149, %150 : vector<8x1xf32>
    %152 = arith.divf %151, %147 : vector<8x1xf32>
    %c0_13 = arith.constant 0 : index
    %c0_14 = arith.constant 0 : index
    %153 = vector.load %arg2[%c0_13, %c0_14] : memref<8x128xf32, #tpu.memory_space<vmem>>, vector<8x128xf32>
    %cst_15 = arith.constant 0.000000e+00 : f32
    %154 = vector.broadcast %cst_15 : f32 to vector<8x32xf32>
    %155 = arith.subf %8, %152 : vector<8x1xf32>
    %cst_16 = arith.constant 0.000000e+00 : f32
    %156 = vector.broadcast %cst_16 : f32 to vector<8x1xf32>
    %157 = arith.maximumf %155, %156 : vector<8x1xf32>
    %158 = vector.extract_strided_slice %153 {offsets = [0, 0], sizes = [8, 32], strides = [1, 1]} : vector<8x128xf32> to vector<8x32xf32>
    %159 = vector.broadcast %157 : vector<8x1xf32> to vector<8x32xf32>
    %160 = arith.mulf %159, %158 : vector<8x32xf32>
    %161 = arith.addf %154, %160 : vector<8x32xf32>
    %162 = arith.subf %9, %152 : vector<8x1xf32>
    %cst_17 = arith.constant 0.000000e+00 : f32
    %163 = vector.broadcast %cst_17 : f32 to vector<8x1xf32>
    %164 = arith.maximumf %162, %163 : vector<8x1xf32>
    %165 = vector.extract_strided_slice %153 {offsets = [0, 32], sizes = [8, 32], strides = [1, 1]} : vector<8x128xf32> to vector<8x32xf32>
    %166 = vector.broadcast %164 : vector<8x1xf32> to vector<8x32xf32>
    %167 = arith.mulf %166, %165 : vector<8x32xf32>
    %168 = arith.addf %161, %167 : vector<8x32xf32>
    %169 = arith.subf %10, %152 : vector<8x1xf32>
    %cst_18 = arith.constant 0.000000e+00 : f32
    %170 = vector.broadcast %cst_18 : f32 to vector<8x1xf32>
    %171 = arith.maximumf %169, %170 : vector<8x1xf32>
    %172 = vector.extract_strided_slice %153 {offsets = [0, 64], sizes = [8, 32], strides = [1, 1]} : vector<8x128xf32> to vector<8x32xf32>
    %173 = vector.broadcast %171 : vector<8x1xf32> to vector<8x32xf32>
    %174 = arith.mulf %173, %172 : vector<8x32xf32>
    %175 = arith.addf %168, %174 : vector<8x32xf32>
    %176 = arith.subf %11, %152 : vector<8x1xf32>
    %cst_19 = arith.constant 0.000000e+00 : f32
    %177 = vector.broadcast %cst_19 : f32 to vector<8x1xf32>
    %178 = arith.maximumf %176, %177 : vector<8x1xf32>
    %179 = vector.extract_strided_slice %153 {offsets = [0, 96], sizes = [8, 32], strides = [1, 1]} : vector<8x128xf32> to vector<8x32xf32>
    %180 = vector.broadcast %178 : vector<8x1xf32> to vector<8x32xf32>
    %181 = arith.mulf %180, %179 : vector<8x32xf32>
    %182 = arith.addf %175, %181 : vector<8x32xf32>
    %c0_20 = arith.constant 0 : index
    %c0_21 = arith.constant 0 : index
    %183 = vector.load %arg3[%c0_20, %c0_21] : memref<8x16xf32, #tpu.memory_space<vmem>>, vector<8x16xf32>
    %c0_22 = arith.constant 0 : index
    %c0_23 = arith.constant 0 : index
    %184 = vector.load %arg4[%c0_22, %c0_23] : memref<16x32xf32, #tpu.memory_space<vmem>>, vector<16x32xf32>
    %cst_24 = arith.constant dense<0.000000e+00> : vector<8x32xf32>
    %185 = tpu.matmul %183, %184, %cst_24 {dimension_numbers = #tpu.dot_dimension_numbers<[1], [0], [0], [1], [0, 0, 1, 1], [], []>} : vector<8x16xf32>, vector<16x32xf32>, vector<8x32xf32> -> vector<8x32xf32>
    %c0_25 = arith.constant 0 : index
    %c0_26 = arith.constant 0 : index
    %186 = vector.load %arg5[%c0_25, %c0_26] : memref<1x32xf32, #tpu.memory_space<vmem>>, vector<1x32xf32>
    %187 = vector.broadcast %186 : vector<1x32xf32> to vector<8x32xf32>
    %188 = arith.addf %185, %187 : vector<8x32xf32>
    %189 = arith.subf %182, %188 : vector<8x32xf32>
    %c0_27 = arith.constant 0 : index
    %c0_28 = arith.constant 0 : index
    %190 = vector.load %arg6[%c0_27, %c0_28] : memref<16x32xf32, #tpu.memory_space<vmem>>, vector<16x32xf32>
    %cst_29 = arith.constant dense<0.000000e+00> : vector<8x32xf32>
    %191 = tpu.matmul %183, %190, %cst_29 {dimension_numbers = #tpu.dot_dimension_numbers<[1], [0], [0], [1], [0, 0, 1, 1], [], []>} : vector<8x16xf32>, vector<16x32xf32>, vector<8x32xf32> -> vector<8x32xf32>
    %c0_30 = arith.constant 0 : index
    %c0_31 = arith.constant 0 : index
    %192 = vector.load %arg7[%c0_30, %c0_31] : memref<32x32xf32, #tpu.memory_space<vmem>>, vector<32x32xf32>
    %cst_32 = arith.constant dense<0.000000e+00> : vector<8x32xf32>
    %193 = tpu.matmul %189, %192, %cst_32 {dimension_numbers = #tpu.dot_dimension_numbers<[1], [0], [0], [1], [0, 0, 1, 1], [], []>} : vector<8x32xf32>, vector<32x32xf32>, vector<8x32xf32> -> vector<8x32xf32>
    %194 = arith.addf %191, %193 : vector<8x32xf32>
    %c0_33 = arith.constant 0 : index
    %c0_34 = arith.constant 0 : index
    %195 = vector.load %arg8[%c0_33, %c0_34] : memref<1x32xf32, #tpu.memory_space<vmem>>, vector<1x32xf32>
    %196 = vector.broadcast %195 : vector<1x32xf32> to vector<8x32xf32>
    %197 = arith.addf %194, %196 : vector<8x32xf32>
    %cst_35 = arith.constant 0.000000e+00 : f32
    %198 = vector.broadcast %cst_35 : f32 to vector<8x32xf32>
    %199 = arith.maximumf %197, %198 : vector<8x32xf32>
    %c0_36 = arith.constant 0 : index
    %c0_37 = arith.constant 0 : index
    %200 = vector.load %arg9[%c0_36, %c0_37] : memref<32x6xf32, #tpu.memory_space<vmem>>, vector<32x6xf32>
    %cst_38 = arith.constant dense<0.000000e+00> : vector<8x6xf32>
    %201 = tpu.matmul %199, %200, %cst_38 {dimension_numbers = #tpu.dot_dimension_numbers<[1], [0], [0], [1], [0, 0, 1, 1], [], []>} : vector<8x32xf32>, vector<32x6xf32>, vector<8x6xf32> -> vector<8x6xf32>
    %c0_39 = arith.constant 0 : index
    %c0_40 = arith.constant 0 : index
    %202 = vector.load %arg10[%c0_39, %c0_40] : memref<1x6xf32, #tpu.memory_space<vmem>>, vector<1x6xf32>
    %203 = vector.broadcast %202 : vector<1x6xf32> to vector<8x6xf32>
    %204 = arith.addf %201, %203 : vector<8x6xf32>
    %c0_41 = arith.constant 0 : index
    %c0_42 = arith.constant 0 : index
    %205 = vector.load %arg11[%c0_41, %c0_42] : memref<8x6xf32, #tpu.memory_space<vmem>>, vector<8x6xf32>
    tpu.vector_store %arg11[%c0_41, %c0_42], %204 {strides = array<i32>} : memref<8x6xf32, #tpu.memory_space<vmem>>, vector<8x6xf32>,
    return
  }
  func.func @transform_0(%arg0: i32) -> (i32, i32) {
    %c0_i32 = arith.constant 0 : i32
    %c0_i32_0 = arith.constant 0 : i32
    return %arg0, %c0_i32 : i32, i32
  }
  func.func @transform_1(%arg0: i32) -> (i32, i32) {
    %c0_i32 = arith.constant 0 : i32
    %c0_i32_0 = arith.constant 0 : i32
    return %arg0, %c0_i32 : i32, i32
  }
  func.func @transform_2(%arg0: i32) -> (i32, i32) {
    %c0_i32 = arith.constant 0 : i32
    %c0_i32_0 = arith.constant 0 : i32
    return %arg0, %c0_i32 : i32, i32
  }
  func.func @transform_3(%arg0: i32) -> (i32, i32) {
    %c0_i32 = arith.constant 0 : i32
    %c0_i32_0 = arith.constant 0 : i32
    %c0_i32_1 = arith.constant 0 : i32
    return %c0_i32, %c0_i32_0 : i32, i32
  }
  func.func @transform_4(%arg0: i32) -> (i32, i32) {
    %c0_i32 = arith.constant 0 : i32
    %c0_i32_0 = arith.constant 0 : i32
    %c0_i32_1 = arith.constant 0 : i32
    return %c0_i32, %c0_i32_0 : i32, i32
  }
  func.func @transform_5(%arg0: i32) -> (i32, i32) {
    %c0_i32 = arith.constant 0 : i32
    %c0_i32_0 = arith.constant 0 : i32
    %c0_i32_1 = arith.constant 0 : i32
    return %c0_i32, %c0_i32_0 : i32, i32
  }
  func.func @transform_6(%arg0: i32) -> (i32, i32) {
    %c0_i32 = arith.constant 0 : i32
    %c0_i32_0 = arith.constant 0 : i32
    %c0_i32_1 = arith.constant 0 : i32
    return %c0_i32, %c0_i32_0 : i32, i32
  }
  func.func @transform_7(%arg0: i32) -> (i32, i32) {
    %c0_i32 = arith.constant 0 : i32
    %c0_i32_0 = arith.constant 0 : i32
    %c0_i32_1 = arith.constant 0 : i32
    return %c0_i32, %c0_i32_0 : i32, i32
  }
  func.func @transform_8(%arg0: i32) -> (i32, i32) {
    %c0_i32 = arith.constant 0 : i32
    %c0_i32_0 = arith.constant 0 : i32
    %c0_i32_1 = arith.constant 0 : i32
    return %c0_i32, %c0_i32_0 : i32, i32
  }
  func.func @transform_9(%arg0: i32) -> (i32, i32) {
    %c0_i32 = arith.constant 0 : i32
    %c0_i32_0 = arith.constant 0 : i32
    %c0_i32_1 = arith.constant 0 : i32
    return %c0_i32, %c0_i32_0 : i32, i32
  }
  func.func @transform_10(%arg0: i32) -> (i32, i32) {
    %c0_i32 = arith.constant 0 : i32
    %c0_i32_0 = arith.constant 0 : i32
    return %arg0, %c0_i32 : i32, i32
  }
}

</mosaic_0001>

<bundles_post_ra>
// kernel: gtea_forward.3
= control target key start
LH: loop header
LB: loop body
LE: loop exit
PB: predicated region body
PF: predicated region fallthrough
CT: control target
= control target key end

     0   :  { %s1212_s0 = inlined_call_operand.vmem [shape: f32[8,4], index: 0, kind: input, shape index: {}]   ;;  %s1213_s1 = inlined_call_operand.vmem [shape: f32[8,128], index: 1, kind: input, shape index: {}]   ;;  %s1214_s2 = inlined_call_operand.vmem [shape: f32[8,16], index: 2, kind: input, shape index: {}]   ;;  %s1215_s3 = inlined_call_operand.vmem [shape: f32[16,32], index: 3, kind: input, shape index: {}]   ;;  %s1216_s4 = inlined_call_operand.vmem [shape: f32[1,32], index: 4, kind: input, shape index: {}]   ;;  %s1217_s5 = inlined_call_operand.vmem [shape: f32[16,32], index: 5, kind: input, shape index: {}]   ;;  %s1218_s6 = inlined_call_operand.vmem [shape: f32[32,32], index: 6, kind: input, shape index: {}]   ;;  %s1219_s7 = inlined_call_operand.vmem [shape: f32[1,32], index: 7, kind: input, shape index: {}]   ;;  %s1220_s8 = inlined_call_operand.vmem [shape: f32[32,6], index: 8, kind: input, shape index: {}]   ;;  %s1221_s9 = inlined_call_operand.vmem [shape: f32[1,6], index: 9, kind: input, shape index: {}]   ;;  %s1222_s10 = inlined_call_operand.hbm [shape: f32[8,6], index: 10, kind: output, shape index: {}]  }
   0x1   :  { %v36_v0 = vld [vmem:[%s1212_s0] sm:$0xff] }
   0x2   :  { %15 = vsyncpa [#allocation3], 0  ;;  %s920_s15 = smov 127   ;;  %s921_s16 = smov 125   ;;  %v926_v15 = vmov 0.0  }
   0x3   :  { %38 = vrot.lane.b32.xlu0 %v36_v0, %s920_s15  ;;  %46 = vrot.lane.b32.xlu1 %v36_v0, %s921_s16  ;;  %s922_s17 = smov 126   ;;  %s923_s18 = smov 2  }
   0x4   :  { %s924_s0 = smov 1   ;;  %s925_s19 = smov 3  }
   0x5   :  { %s936_s28 = smov [#allocation2]  }
   0x6   :  { %s724_s29 = sshll.u32 %s936_s28, 4  ;;  %s725_s29 = int_to_ptr.vmem [resolvable:$true] %s724_s29 }
   0x7   :  { %42 = vrot.lane.b32.xlu0 %v36_v0, %s922_s17  ;;  %p901_p1 = scmp.lt.s32.totalorder %s725_s29, %s725_s29 }
  0x75   :  { %v39_v1 = vpop.permute.xlu0 %38  ;;  %v47_v4 = vpop.permute.xlu1 %46 }
  0x76   :  { %v41_v2 = vmax.f32 %v36_v0, %v39_v1 }
  0x79   :  { %v43_v3 = vpop.permute.xlu0 %42 }
  0x7a   :  { %v45_v5 = vmax.f32 %v41_v2, %v43_v3 }
  0x7c   :  { %v49_v6 = vmax.f32 %v45_v5, %v47_v4 }
  0x7e   :  { %56 = vrot.lane.b32.xlu0 %v49_v6, %s923_s18  ;;  %52 = vrot.lane.b32.xlu1 %v49_v6, %s924_s0  ;;  %v1000_v7 = vsub.f32 %v36_v0, %v49_v6 }
  0x80   :  { %vm64_vm12 = vcmp.ge.f32.partialorder %v1000_v7, %v1000_v7 }
  0x81   :  { %v732_v2 = vsel %vm64_vm12, 1.0, %v926_v15 }
  0x82   :  { %60 = vrot.lane.b32.xlu1 %v49_v6, %s925_s19  ;;  %71 = vrot.lane.b32.xlu0 %v1000_v7, %s924_s0 }
  0x86   :  { %88 = vrot.lane.b32.xlu1 %v1000_v7, %s923_s18  ;;  %105 = vrot.lane.b32.xlu0 %v1000_v7, %s925_s19 }
  0xf0   :  { %v57_v8 = vpop.permute.xlu0 %56  ;;  %v53_v9 = vpop.permute.xlu1 %52 }
  0xf1   :  { %v1009_v10 = vsub.f32 %v36_v0, %v57_v8  ;;  %v1011_v11 = vsub.f32 %v36_v0, %v53_v9 }
  0xf3   :  { %200 = vrot.lane.b32.xlu1 %v1009_v10, %s920_s15  ;;  %151 = vrot.lane.b32.xlu0 %v1011_v11, %s924_s0  ;;  %vm137_vm1 = vcmp.ge.f32.partialorder %v1011_v11, %v1011_v11  ;;  %vm217_vm4 = vcmp.ge.f32.partialorder %v1009_v10, %v1009_v10 }
  0xf4   :  { %v61_v12 = vpop.permute.xlu1 %60  ;;  %v72_v14 = vpop.permute.xlu0 %71  ;;  %v738_v17 = vsel %vm137_vm1, 1.0, %v926_v15  ;;  %v744_v27 = vsel %vm217_vm4, 1.0, %v926_v15  ;;  %vm930_vm4 = vmmov 0  }
  0xf5   :  { %v1017_v13 = vsub.f32 %v36_v0, %v61_v12  ;;  %vm74_vm0 = vcmp.ge.f32.partialorder %v1011_v11, %v72_v14  ;;  %v145_v22 = vmul.f32 %v738_v17, %v1011_v11  ;;  %v225_v28 = vmul.f32 %v744_v27, %v1009_v10  ;;  %780 = vmatprep.mubr.msk.f32.mxu1 %vm930_vm4, %v926_v15 }
  0xf6   :  { %v733_v16 = vsel %vm74_vm0, 1.0, %v926_v15  ;;  %798 = vmatprep.mubr.msk.f32.mxu0 %vm930_vm4, %v926_v15 }
  0xf7   :  { %168 = vrot.lane.b32.xlu1 %v1011_v11, %s923_s18  ;;  %263 = vrot.lane.b32.xlu0 %v1017_v13, %s922_s17  ;;  %v847_v18 = vpack.i.bf16 %v738_v17, %v733_v16  ;;  %v82_v20 = vmul.f32 %v733_v16, %v1011_v11  ;;  %vm297_vm11 = vcmp.ge.f32.partialorder %v1017_v13, %v1017_v13 }
  0xf8   :  { %v89_v19 = vpop.permute.xlu1 %88  ;;  %v106_v21 = vpop.permute.xlu0 %105  ;;  %v750_v46 = vsel %vm297_vm11, 1.0, %v926_v15 }
  0xf9   :  { %vm91_vm2 = vcmp.ge.f32.partialorder %v1009_v10, %v89_v19  ;;  %vm108_vm3 = vcmp.ge.f32.partialorder %v1017_v13, %v106_v21  ;;  %v305_v50 = vmul.f32 %v750_v46, %v1017_v13  ;;  %v68_v21 = vmul.f32 %v732_v2, %v1000_v7 }
  0xfa   :  { %v734_v23 = vsel %vm91_vm2, 1.0, %v926_v15  ;;  %v735_v25 = vsel %vm108_vm3, 1.0, %v926_v15 }
  0xfb   :  { %231 = vrot.lane.b32.xlu1 %v1009_v10, %s924_s0  ;;  %280 = vrot.lane.b32.xlu0 %v1017_v13, %s920_s15  ;;  %v99_v24 = vmul.f32 %v734_v23, %v1009_v10  ;;  %v116_v26 = vmul.f32 %v735_v25, %v1017_v13 }
  0xff   :  { %128 = vrot.lane.b32.xlu1 %v1011_v11, %s920_s15  ;;  %254 = vrot.lane.b32.xlu0 %v1017_v13, %s921_s16 }
 0x103   :  { %191 = vrot.lane.b32.xlu1 %v1009_v10, %s922_s17  ;;  %848 = vrot.lane.b32.xlu0 %v847_v18, %s920_s15 }
 0x107   :  { %84 = vrot.lane.b32.xlu1 %v82_v20, %s920_s15 }
 0x10b   :  { %147 = vrot.lane.b32.xlu1 %v145_v22, %s920_s15 }
 0x10f   :  { %101 = vrot.lane.b32.xlu1 %v99_v24, %s922_s17 }
 0x113   :  { %118 = vrot.lane.b32.xlu1 %v116_v26, %s921_s16 }
 0x117   :  { %227 = vrot.lane.b32.xlu1 %v225_v28, %s922_s17 }
 0x165   :  { %v201_v29 = vpop.permute.xlu1 %200  ;;  %v152_v30 = vpop.permute.xlu0 %151 }
 0x166   :  { %vm154_vm5 = vcmp.ge.f32.partialorder %v1009_v10, %v152_v30  ;;  %vm203_vm6 = vcmp.ge.f32.partialorder %v1011_v11, %v201_v29 }
 0x167   :  { %v739_v31 = vsel %vm154_vm5, 1.0, %v926_v15  ;;  %v743_v35 = vsel %vm203_vm6, 1.0, %v926_v15  ;;  %vm398_vm5 = vcmask 130048   ;;  %vm479_vm6 = vcmask 261120  }
 0x168   :  { %v852_v32 = vpack.i.bf16 %v739_v31, %v734_v23  ;;  %v211_v43 = vmul.f32 %v743_v35, %v1011_v11  ;;  %v162_v49 = vmul.f32 %v739_v31, %v1009_v10 }
 0x169   :  { %v169_v33 = vpop.permute.xlu1 %168  ;;  %v264_v34 = vpop.permute.xlu0 %263 }
 0x16a   :  { %vm171_vm7 = vcmp.ge.f32.partialorder %v1017_v13, %v169_v33  ;;  %vm266_vm8 = vcmp.ge.f32.partialorder %v1011_v11, %v264_v34  ;;  %853 = vrot.lane.b32.xlu0 %v852_v32, %s922_s17 }
 0x16b   :  { %v740_v36 = vsel %vm171_vm7, 1.0, %v926_v15  ;;  %v748_v37 = vsel %vm266_vm8, 1.0, %v926_v15  ;;  %vm716_vm7 = vcmask 48128  }
 0x16c   :  { %v862_v38 = vpack.i.bf16 %v740_v36, %v735_v25  ;;  %v857_v39 = vpack.i.bf16 %v748_v37, %v743_v35  ;;  %v179_v51 = vmul.f32 %v740_v36, %v1017_v13  ;;  %v274_v52 = vmul.f32 %v748_v37, %v1011_v11 }
 0x16d   :  { %v232_v40 = vpop.permute.xlu1 %231  ;;  %v281_v41 = vpop.permute.xlu0 %280 }
 0x16e   :  { %vm234_vm9 = vcmp.ge.f32.partialorder %v1017_v13, %v232_v40  ;;  %vm283_vm10 = vcmp.ge.f32.partialorder %v1009_v10, %v281_v41  ;;  %863 = vrot.lane.b32.xlu0 %v862_v38, %s921_s16  ;;  %858 = vrot.lane.b32.xlu1 %v857_v39, %s920_s15 }
 0x16f   :  { %v749_v42 = vsel %vm283_vm10, 1.0, %v926_v15  ;;  %v745_v45 = vsel %vm234_vm9, 1.0, %v926_v15 }
 0x170   :  { %v867_v44 = vpack.i.bf16 %v749_v42, %v744_v27  ;;  %v872_v47 = vpack.i.bf16 %v750_v46, %v745_v45  ;;  %v242_v48 = vmul.f32 %v745_v45, %v1017_v13  ;;  %v291_v53 = vmul.f32 %v749_v42, %v1009_v10 }
 0x171   :  { %v1090_v54 = vpop.permute.xlu1 %128  ;;  %v1094_v58 = vpop.permute.xlu0 %254 }
 0x172   :  { %213 = vrot.lane.b32.xlu1 %v211_v43, %s920_s15  ;;  %868 = vrot.lane.b32.xlu0 %v867_v44, %s922_s17  ;;  %vm131_vm13 = vcmp.ge.f32.partialorder %v1000_v7, %v1090_v54  ;;  %vm257_vm15 = vcmp.ge.f32.partialorder %v1000_v7, %v1094_v58 }
 0x173   :  { %v737_v4 = vsel %vm131_vm13, 1.0, %v926_v15  ;;  %v747_v30 = vsel %vm257_vm15, 1.0, %v926_v15 }
 0x174   :  { %v135_v19 = vmul.f32 %v737_v4, %v1000_v7 }
 0x175   :  { %v1092_v55 = vpop.permute.xlu1 %191  ;;  %v849_v60 = vpop.permute.xlu0 %848 }
 0x176   :  { %244 = vrot.lane.b32.xlu1 %v242_v48, %s921_s16  ;;  %873 = vrot.lane.b32.xlu0 %v872_v47, %s921_s16  ;;  %v884_v3 = vadd.low.f32.bf16 %v732_v2, %v849_v60  ;;  %vm194_vm14 = vcmp.ge.f32.partialorder %v1000_v7, %v1092_v55  ;;  %v885_v6 = vadd.high.f32.bf16 %v737_v4, %v849_v60 }
 0x177   :  { %v742_v14 = vsel %vm194_vm14, 1.0, %v926_v15  ;;  %v261_v47 = vmul.f32 %v747_v30, %v1000_v7 }
 0x178   :  { %v198_v23 = vmul.f32 %v742_v14, %v1000_v7 }
 0x179   :  { %v85_v56 = vpop.permute.xlu1 %84 }
 0x17a   :  { %307 = vrot.lane.b32.xlu1 %v305_v50, %s921_s16  ;;  %164 = vrot.lane.b32.xlu0 %v162_v49, %s922_s17  ;;  %v87_v29 = vadd.f32 %v85_v56, %v68_v21 }
 0x17d   :  { %v148_v57 = vpop.permute.xlu1 %147 }
 0x17e   :  { %181 = vrot.lane.b32.xlu0 %v179_v51, %s921_s16  ;;  %v150_v26 = vadd.f32 %v148_v57, %v135_v19 }
 0x181   :  { %v102_v59 = vpop.permute.xlu1 %101 }
 0x182   :  { %276 = vrot.lane.b32.xlu0 %v274_v52, %s920_s15  ;;  %v104_v34 = vadd.f32 %v102_v59, %v87_v29 }
 0x185   :  { %v119_v61 = vpop.permute.xlu1 %118 }
 0x186   :  { %293 = vrot.lane.b32.xlu0 %v291_v53, %s922_s17  ;;  %v121_v41 = vadd.f32 %v119_v61, %v104_v34 }
 0x189   :  { %v228_v63 = vpop.permute.xlu1 %227 }
 0x1dc   :  { %v854_v62 = vpop.permute.xlu0 %853 }
 0x1dd   :  { %v886_v8 = vadd.low.f32.bf16 %v884_v3, %v854_v62  ;;  %v887_v9 = vadd.high.f32.bf16 %v885_v6, %v854_v62 }
 0x1e0   :  { %v864_v0 = vpop.permute.xlu0 %863  ;;  %v859_v1 = vpop.permute.xlu1 %858 }
 0x1e1   :  { %v888_v12 = vadd.low.f32.bf16 %v886_v8, %v864_v0  ;;  %v889_v17 = vadd.high.f32.bf16 %v887_v9, %v864_v0  ;;  %v890_v18 = vadd.low.f32.bf16 %v742_v14, %v859_v1  ;;  %v893_v33 = vadd.high.f32.bf16 %v747_v30, %v859_v1 }
 0x1e2   :  { %v927_v9 = vmov 2   ;;  %v931_v30 = vmov 3  }
 0x1e3   :  { %v122_v22 = vmul.f32 %v888_v12, %v1000_v7  ;;  %v185_v28 = vmul.f32 %v889_v17, %v1090_v54  ;;  %878 = vset.pattern.permute.xlu0 %v927_v9  ;;  %v928_v12 = vmov 1  }
 0x1e4   :  { %v869_v5 = vpop.permute.xlu0 %868  ;;  %v214_v24 = vpop.permute.xlu1 %213  ;;  %877 = vset.pattern.permute.xlu1 %v928_v12 }
 0x1e5   :  { %v891_v20 = vadd.low.f32.bf16 %v890_v18, %v869_v5  ;;  %v216_v31 = vadd.f32 %v214_v24, %v198_v23  ;;  %v123_v35 = vadd.f32 1.0, %v122_v22  ;;  %v186_v39 = vadd.f32 1.0, %v185_v28  ;;  %v389_v18 = vld [vmem:[%s1215_s3] sm:$0xff] }
 0x1e6   :  { %v894_v40 = vadd.high.f32.bf16 %v893_v33, %v869_v5  ;;  %v932_v33 = vmov 0  }
 0x1e7   :  { %v230_v42 = vadd.f32 %v228_v63, %v216_v31  ;;  %vm124_vm1 = vcmp.gt.f32.partialorder %v123_v35, %v121_v41  ;;  %v329_v41 = vld [vmem:[%s1213_s1] sm:$0xff] }
 0x1e8   :  { %v874_v16 = vpop.permute.xlu0 %873  ;;  %v245_v44 = vpop.permute.xlu1 %244  ;;  %v736_v52 = vsel %vm124_vm1, 1.0, %v926_v15 }
 0x1e9   :  { %v892_v27 = vadd.low.f32.bf16 %v891_v20, %v874_v16  ;;  %v895_v43 = vadd.high.f32.bf16 %v894_v40, %v874_v16  ;;  %v247_v49 = vadd.f32 %v245_v44, %v230_v42  ;;  %v316_v1 = vmul.f32 %v736_v52, %v1000_v7  ;;  %v388_v20 = vld [vmem:[%s1214_s2] sm:$0xff] }
 0x1eb   :  { %v248_v37 = vmul.f32 %v892_v27, %v1092_v55  ;;  %v311_v51 = vmul.f32 %v895_v43, %v1094_v58 }
 0x1ec   :  { %v165_v25 = vpop.permute.xlu0 %164  ;;  %v308_v59 = vpop.permute.xlu1 %307 }
 0x1ed   :  { %v167_v32 = vadd.f32 %v165_v25, %v150_v26  ;;  %v249_v46 = vadd.f32 1.0, %v248_v37  ;;  %v312_v61 = vadd.f32 1.0, %v311_v51 }
 0x1ef   :  { %vm250_vm2 = vcmp.gt.f32.partialorder %v249_v46, %v247_v49 }
 0x1f0   :  { %v182_v36 = vpop.permute.xlu0 %181  ;;  %v746_v62 = vsel %vm250_vm2, 1.0, %v926_v15 }
 0x1f1   :  { %v184_v38 = vadd.f32 %v182_v36, %v167_v32  ;;  %v321_v5 = vmul.f32 %v746_v62, %v1092_v55  ;;  %v390_v55 = vld [vmem:[%s1215_s3 + $0x8] sm:$0xff] }
 0x1f2   :  { %v813_v19 = vpack.c.bf16 %v390_v55, %v389_v18  ;;  %v474_v36 = vld [vmem:[%s1217_s5 + $0x8] sm:$0xff] }
 0x1f3   :  { %vm187_vm0 = vcmp.gt.f32.partialorder %v186_v39, %v184_v38  ;;  %v477_v38 = vld [vmem:[%s1218_s6 + $0x10] sm:$0xff]  ;;  %v478_v39 = vld [vmem:[%s1218_s6 + $0x18] sm:$0xff] }
 0x1f4   :  { %v277_v45 = vpop.permute.xlu0 %276  ;;  %v741_v48 = vsel %vm187_vm0, 1.0, %v926_v15  ;;  %v819_v40 = vpack.c.bf16 %v478_v39, %v477_v38 }
 0x1f5   :  { %v279_v50 = vadd.f32 %v277_v45, %v261_v47  ;;  %v317_v56 = vadd.f32 %v741_v48, %v736_v52  ;;  %v318_v63 = vmul.f32 %v741_v48, %v1090_v54  ;;  %v753_v52 = vld [vmem:[%s1216_s4] ss:$0 sm:$0xff] }
 0x1f7   :  { %v320_v0 = vadd.f32 %v746_v62, %v317_v56  ;;  %v319_v4 = vadd.f32 %v318_v63, %v316_v1  ;;  %v633_v62 = vld [vmem:[%s1220_s8 + $0x8] sm:$0xff] }
 0x1f8   :  { %v294_v53 = vpop.permute.xlu0 %293 }
 0x1f9   :  { %v296_v57 = vadd.f32 %v294_v53, %v279_v50  ;;  %v322_v8 = vadd.f32 %v321_v5, %v319_v4 }
 0x1fb   :  { %v310_v60 = vadd.f32 %v308_v59, %v296_v57 }
 0x1fd   :  { %vm313_vm3 = vcmp.gt.f32.partialorder %v312_v61, %v310_v60  ;;  %v632_v61 = vld [vmem:[%s1220_s8] sm:$0xff] }
 0x1fe   :  { %v751_v2 = vsel %vm313_vm3, 1.0, %v926_v15  ;;  %v825_v63 = vpack.c.bf16 %v633_v62, %v632_v61 }
 0x1ff   :  { %v323_v3 = vadd.f32 %v751_v2, %v320_v0  ;;  %v324_v6 = vmul.f32 %v751_v2, %v1094_v58  ;;  %v929_v58 = vmov 0.0|0.0   ;;  %v634_v2 = vld [vmem:[%s1220_s8 + $0x10] sm:$0xff] }
 0x200   :  { %812 = vmatprep.subr.bf16.mxu1 %v929_v58  ;;  %821 = vmatprep.subr.bf16.mxu0 %v929_v58 }
 0x201   :  { %882 = vrcp.f32 %v323_v3  ;;  %v325_v14 = vadd.f32 %v324_v6, %v322_v8  ;;  %814 = vmatpush3.bf16.msra.mxu1 %v813_v19  ;;  %v635_v3 = vld [vmem:[%s1220_s8 + $0x18] sm:$0xff]  ;;  %v757_v6 = vld [vmem:[%s1219_s7] ss:$0 sm:$0xff]  ;;  %s896_s8 = scalar_lea.vmem %s725_s29, 128 }
 0x202   :  { %815 = vmatprep.subr.bf16.mxu1 %v929_v58  ;;  %v828_v4 = vpack.c.bf16 %v635_v3, %v634_v2  ;;  %p897_p0 = scmp.ne.s32.totalorder %s725_s29, %s896_s8  ;;  %p902_p2 = scmp.lt.s32.totalorder %s896_s8, %s896_s8 }
 0x203   :  { %v752_v54 = vadd.f32 -1.0, %v325_v14 }
 0x204   :  { %781 = vmatmul.mubr.msk.f32.vlgmr.msra.gmra.mrb[0].mxu1 %vm398_vm5, %v388_v20  ;;  %p903_p3 = por %p902_p2, %p901_p1 }
 0x205   :  { %791 = vmatprep.mubr.msk.f32.mxu1 %vm930_vm4, %v926_v15 }
 0x206   :  { %p904_p4 = pnand %p903_p3, %p897_p0 }
 0x20b   :  { %v883_v16 = vpop.eup %882 }
 0x20c   :  { %v328_v17 = vmul.f32 %v883_v16, %v752_v54  ;;  %v758_v54 = vld [vmem:[%s1221_s9] ss:$0 sm:$0xff] }
 0x20e   :  { %356 = vrot.lane.b32.xlu1 %v328_v17, %s923_s18  ;;  %340 = vrot.lane.b32.xlu0 %v328_v17, %s924_s0  ;;  %v330_v31 = vsub.f32 %v1000_v7, %v328_v17  ;;  %v473_v7 = vld [vmem:[%s1217_s5] sm:$0xff]  ;;  %s933_s5 = smov 96   ;;  %s935_s18 = smov 32  }
 0x20f   :  { %v822_v37 = vpack.c.bf16 %v474_v36, %v473_v7 }
 0x210   :  { %v331_v32 = vmax.f32 %v330_v31, 0.0 }
 0x211   :  { %823 = vmatpush3.bf16.msra.mxu0 %v822_v37 }
 0x212   :  { %372 = vrot.lane.b32.xlu0 %v328_v17, %s925_s19  ;;  %824 = vmatprep.subr.bf16.mxu0 %v929_v58 }
 0x214   :  { %799 = vmatmul.mubr.msk.f32.vlgmr.msra.gmra.mrb[0].mxu0 %vm398_vm5, %v388_v20 }
 0x215   :  { %809 = vmatprep.mubr.msk.f32.mxu0 %vm930_vm4, %v926_v15  ;;  %826 = vmatpush3.bf16.msra.mxu0 %v825_v63 }
 0x216   :  { %827 = vmatprep.subr.bf16.mxu0 %v929_v58 }
 0x219   :  { %829 = vmatpush3.bf16.msra.mxu0 %v828_v4 }
 0x280   :  { %v357_v21 = vpop.permute.xlu1 %356  ;;  %v341_v22 = vpop.permute.xlu0 %340 }
 0x281   :  { %v359_v23 = vsub.f32 %v1009_v10, %v357_v21  ;;  %v343_v24 = vsub.f32 %v1011_v11, %v341_v22  ;;  %v475_v10 = vld [vmem:[%s1218_s6] sm:$0xff]  ;;  %v476_v11 = vld [vmem:[%s1218_s6 + $0x8] sm:$0xff]  ;;  %s934_s6 = smov 64  }
 0x283   :  { %v360_v25 = vmax.f32 %v359_v23, 0.0  ;;  %v344_v26 = vmax.f32 %v343_v24, 0.0 }
 0x284   :  { %v373_v27 = vpop.permute.xlu0 %372 }
 0x285   :  { %v375_v28 = vsub.f32 %v1017_v13, %v373_v27  ;;  %363 = vperm.xlu0 %878, %v360_v25   ;;  %347 = vperm.xlu1 %877, %v344_v26   ;;  %v816_v13 = vpack.c.bf16 %v476_v11, %v475_v10 }
 0x287   :  { %v376_v29 = vmax.f32 %v375_v28, 0.0  ;;  %817 = vmatpush3.bf16.msra.mxu1 %v816_v13 }
 0x288   :  { %818 = vmatprep.subr.bf16.mxu1 %v929_v58 }
 0x289   :  { %879 = vset.pattern.permute.xlu1 %v931_v30  ;;  %881 = vset.pattern.permute.xlu0 %v931_v30 }
 0x28a   :  { %379 = vperm.xlu1 %879, %v376_v29  }
 0x28b   :  { %820 = vmatpush3.bf16.msra.mxu1 %v819_v40 }
 0x28e   :  { %880 = vset.pattern.permute.xlu1 %v932_v33 }
 0x28f   :  { %334 = vperm.xlu1 %880, %v331_v32  }
 0x2d7   :  { %v468_v34 = vpop.f32.mrb[0].mxu1 }
 0x2d8   :  { %v782_v35 = vpop.f32.mrb[1].mxu1  ;;  %v469_v56 = vadd.f32 %v753_v52, %v468_v34 }
 0x2e7   :  { %v619_v0 = vpop.f32.mrb[0].mxu0 }
 0x2e8   :  { %v800_v1 = vpop.f32.mrb[1].mxu0 }
 0x304   :  { %v348_v42 = vpop.permute.xlu1 %347  ;;  %v364_v43 = vpop.permute.xlu0 %363 }
 0x305   :  { %v350_v44 = vmul.f32 %v348_v42, %v329_v41  ;;  %v366_v45 = vmul.f32 %v364_v43, %v329_v41 }
 0x307   :  { %352 = vrot.lane.b32.xlu0 %v350_v44, %s933_s5  ;;  %368 = vrot.lane.b32.xlu1 %v366_v45, %s934_s6 }
 0x309   :  { %v380_v46 = vpop.permute.xlu1 %379 }
 0x30a   :  { %v382_v47 = vmul.f32 %v380_v46, %v329_v41 }
 0x30c   :  { %384 = vrot.lane.b32.xlu0 %v382_v47, %s935_s18 }
 0x30e   :  { %v335_v48 = vpop.permute.xlu1 %334 }
 0x30f   :  { %v337_v49 = vmul.f32 %v335_v48, %v329_v41 }
 0x379   :  { %v353_v50 = vpop.permute.xlu0 %352  ;;  %v369_v53 = vpop.permute.xlu1 %368 }
 0x37a   :  { %v355_v51 = vadd.f32 %v353_v50, %v337_v49 }
 0x37c   :  { %v371_v15 = vadd.f32 %v369_v53, %v355_v51 }
 0x37e   :  { %v385_v57 = vpop.permute.xlu0 %384 }
 0x37f   :  { %v387_v59 = vadd.f32 %v385_v57, %v371_v15 }
 0x381   :  { %v472_v60 = vsub.f32 %v387_v59, %v469_v56 }
 0x383   :  { %792 = vmatmul.mubr.msk.f32.vlgmr.msra.gmra.mrb[2].mxu1 %vm479_vm6, %v472_v60 }
 0x456   :  { %v549_v5 = vpop.f32.mrb[2].mxu1 }
 0x457   :  { %v620_v8 = vadd.f32 %v619_v0, %v549_v5  ;;  %v793_v9 = vpop.f32.mrb[3].mxu1 }
 0x459   :  { %v630_v12 = vadd.f32 %v757_v6, %v620_v8 }
 0x45b   :  { %v631_v14 = vmax.f32 %v630_v12, 0.0 }
 0x45d   :  { %810 = vmatmul.mubr.msk.f32.vlgmr.msra.gmra.mrb[2].mxu0 %vm479_vm6, %v631_v14 }
 0x530   :  { %v712_v16 = vpop.f32.mrb[2].mxu0 }
 0x531   :  { %v713_v17 = vadd.f32 %v758_v54, %v712_v16  ;;  %v811_v18 = vpop.f32.mrb[3].mxu0 }
 0x533   :  { %717 = vst.msk [vmem:[#allocation2] sm:$0xff] %vm716_vm7, %v713_v17 }
 0x534   :  { %907 = shalt.err (!%p904_p4)
}
 0x535   :  { %s908_s11 = scalar_lea.hbm %s1222_s10, 128 }
 0x536   :  { %p909_p5 = scmp.ne.s32.totalorder %s1222_s10, %s908_s11  ;;  %p912_p6 = scmp.lt.u32.totalorder %s908_s11, %s1222_s10 }
 0x538   :  { %p914_p7 = pnand %p912_p6, %p909_p5 }
 0x53a   :  { %917 = shalt.err (!%p914_p7)
}
 0x53b   :  { %727 = dma.vmem_to_hbm [thread:$0]  %s725_s29, 128, %s1222_s10, [#allocation3]  }
 0x53c   :  { %918 = dma.done.wait [#allocation3], 128  }
 0x53d   :  { %919 = vsyncadd [#allocation3], 4294967168 }
 0x53e   :  { %731 = vsyncpa [#allocation3], 1 }

// kernel: gtea_forward.2
= control target key start
LH: loop header
LB: loop body
LE: loop exit
PB: predicated region body
PF: predicated region fallthrough
CT: control target
= control target key end

     0   :  { %v6900_v2 = vmov 0.0   ;;  %vm228_vm0 = vcmask 64512   ;;  %v6898_v7 = vmov 0   ;;  %v89_v49 = vlaneseq  ;;  %s5405_s25 = smov 64   ;;  %s6875_s7 = inlined_call_operand.vmem [shape: f32[8,256], index: 7, kind: input, shape index: {}]   ;;  %s6876_s0 = inlined_call_operand.vmem [shape: f32[8,32,8], index: 0, kind: input, shape index: {}]   ;;  %s6877_s6 = inlined_call_operand.vmem [shape: f32[64,256], index: 6, kind: input, shape index: {}]   ;;  %s6878_s4 = inlined_call_operand.vmem [shape: f32[64,64], index: 4, kind: input, shape index: {}]   ;;  %s6879_s1 = inlined_call_operand.vmem [shape: f32[32,8], index: 1, kind: input, shape index: {}]   ;;  %s6880_s8 = inlined_call_operand.vmem [shape: f32[1,256], index: 8, kind: input, shape index: {}]   ;;  %s6881_s5 = inlined_call_operand.vmem [shape: f32[1,64], index: 5, kind: input, shape index: {}]   ;;  %s6882_s2 = inlined_call_operand.vmem [shape: f32[32,8], index: 2, kind: input, shape index: {}]   ;;  %s6883_s11 = inlined_call_operand.vmem [shape: f32[32,32], index: 11, kind: input, shape index: {}]   ;;  %s6884_s9 = inlined_call_operand.vmem [shape: f32[32,1], index: 9, kind: input, shape index: {}]   ;;  %s6885_s10 = inlined_call_operand.vmem [shape: f32[16,32], index: 10, kind: input, shape index: {}]   ;;  %s6886_s3 = inlined_call_operand.vmem [shape: f32[32,16], index: 3, kind: input, shape index: {}]   ;;  %s6887_s14 = inlined_call_operand.vmem [shape: f32[32,1], index: 14, kind: output, shape index: {1}]   ;;  %s6888_s12 = inlined_call_operand.vmem [shape: f32[1,32], index: 12, kind: input, shape index: {}]   ;;  %s6889_s13 = inlined_call_operand.vmem [shape: f32[32,32], index: 13, kind: output, shape index: {0}]  }
   0x1   :  { %v5492_v0 = vld [vmem:[%s6875_s7 + $0x8] sm:$0xff]  ;;  %v5497_v1 = vld [vmem:[%s6875_s7] sm:$0xff]  ;;  %305 = vmatprep.mubr.f32.mxu1 %v6900_v2  ;;  %4414 = vmatprep.mubr.f32.mxu0 %v6900_v2  ;;  %v65_v5 = vld [vmem:[%s6877_s6 + $0x18] sm:$0xff]  ;;  %vm103_vm1 = vcmask 523264   ;;  %vm3747_vm2 = vcmask 261120   ;;  %vm3956_vm3 = vcmask 130048  }
   0x2   :  { %v99_v3 = vld [vmem:[%s6876_s0] sm:$0xff]  ;;  %241 = vmatprep.subr.mxu1 %v5492_v0  ;;  %v63_v4 = vld [vmem:[%s6877_s6 + $0x8] sm:$0xff]  ;;  %4971 = vset.pattern.permute.xlu0 %v6898_v7  ;;  %v64_v9 = vld [vmem:[%s6877_s6 + $0x10] sm:$0xff]  ;;  %v90_v50 = vshrl.u32 %v89_v49, 7  ;;  %vm4073_vm5 = vcmask 7168  }
   0x3   :  { %v62_v6 = vld [vmem:[%s6877_s6] sm:$0xff]  ;;  %242 = vmatpush1.msra.mxu1 %v5497_v1  ;;  %v5516_v8 = vpack.c.bf16 %v65_v5, %v63_v4  ;;  %v67_v10 = vld [vmem:[%s6877_s6 + $0x28] sm:$0xff]  ;;  %4972 = vset.pattern.permute.xlu1 %v6898_v7  ;;  %v69_v12 = vld [vmem:[%s6877_s6 + $0x38] sm:$0xff] }
   0x4   :  { %4087 = vmatmul.mubr.msk.f32.vlgmr.msra.gmra.mrb[0].mxu1 %vm228_vm0, %v99_v3  ;;  %v5526_v11 = vpack.c.bf16 %v64_v9, %v62_v6  ;;  %v66_v13 = vld [vmem:[%s6877_s6 + $0x20] sm:$0xff]  ;;  %v68_v14 = vld [vmem:[%s6877_s6 + $0x30] sm:$0xff]  ;;  %v100_v15 = vld [vmem:[%s6876_s0 + $0x8] sm:$0xff]  ;;  %v5542_v16 = vpack.c.bf16 %v69_v12, %v67_v10  ;;  %v91_v51 = vsub.s32 0, %v90_v50  ;;  %v95_v53 = vsub.s32 1, %v90_v50 }
   0x5   :  { %4629 = vmatprep.subr.bf16.mxu1 %v5516_v8  ;;  %311 = vmatprep.mubr.f32.mxu1 %v6900_v2  ;;  %v71_v17 = vld [vmem:[%s6877_s6 + $0x48] sm:$0xff]  ;;  %v73_v18 = vld [vmem:[%s6877_s6 + $0x58] sm:$0xff]  ;;  %v5551_v19 = vpack.c.bf16 %v68_v14, %v66_v13  ;;  %v54_v20 = vld [vmem:[%s6878_s4] sm:$0xff] }
   0x6   :  { %4631 = vmatpush1.bf16.msra.mxu1 %v5526_v11  ;;  %v5557_v21 = vpack.c.bf16 %v73_v18, %v71_v17  ;;  %v70_v22 = vld [vmem:[%s6877_s6 + $0x40] sm:$0xff]  ;;  %v72_v23 = vld [vmem:[%s6877_s6 + $0x50] sm:$0xff]  ;;  %v55_v24 = vld [vmem:[%s6878_s4 + $0x8] sm:$0xff] }
   0x7   :  { %4633 = vmatprep.subr.bf16.mxu1 %v5542_v16  ;;  %v101_v25 = vld [vmem:[%s6876_s0 + $0x10] sm:$0xff]  ;;  %v5572_v26 = vpack.c.bf16 %v55_v24, %v54_v20  ;;  %v75_v27 = vld [vmem:[%s6877_s6 + $0x68] sm:$0xff]  ;;  %v77_v28 = vld [vmem:[%s6877_s6 + $0x78] sm:$0xff]  ;;  %v5591_v32 = vpack.c.bf16 %v72_v23, %v70_v22 }
   0x8   :  { %4088 = vmatmul.mubr.msk.f32.gmra.mrb[2].mxu1 %vm228_vm0, %v100_v15  ;;  %v56_v29 = vld [vmem:[%s6878_s4 + $0x10] sm:$0xff]  ;;  %v57_v30 = vld [vmem:[%s6878_s4 + $0x18] sm:$0xff]  ;;  %v58_v31 = vld [vmem:[%s6878_s4 + $0x20] sm:$0xff]  ;;  %v5604_v36 = vpack.c.bf16 %v77_v28, %v75_v27 }
   0x9   :  { %317 = vmatprep.mubr.f32.mxu1 %v6900_v2  ;;  %4613 = vmatprep.subr.bf16.mxu0 %v5572_v26  ;;  %v74_v33 = vld [vmem:[%s6877_s6 + $0x60] sm:$0xff]  ;;  %v5597_v34 = vpack.c.bf16 %v57_v30, %v56_v29  ;;  %v59_v35 = vld [vmem:[%s6878_s4 + $0x28] sm:$0xff]  ;;  %v76_v37 = vld [vmem:[%s6877_s6 + $0x70] sm:$0xff] }
   0xa   :  { %4635 = vmatpush1.bf16.msra.mxu1 %v5551_v19  ;;  %4615 = vmatpush3.bf16.msra.mxu0 %v5572_v26  ;;  %v5612_v38 = vld [vmem:[%s6879_s1] sm:$0xff]  ;;  %v5617_v39 = vld [vmem:[%s6879_s1 + $0x10] sm:$0xff]  ;;  %v5621_v40 = vpack.c.bf16 %v59_v35, %v58_v31  ;;  %v102_v41 = vld [vmem:[%s6876_s0 + $0x18] sm:$0xff]  ;;  %v5635_v44 = vpack.c.bf16 %v76_v37, %v74_v33 }
   0xb   :  { %4637 = vmatprep.subr.bf16.mxu1 %v5557_v21  ;;  %4617 = vmatprep.subr.bf16.mxu0 %v5597_v34  ;;  %v60_v42 = vld [vmem:[%s6878_s4 + $0x30] sm:$0xff]  ;;  %v61_v43 = vld [vmem:[%s6878_s4 + $0x38] sm:$0xff]  ;;  %v5640_v45 = vld [vmem:[%s6879_s1 + $0x8] sm:$0xff] }
   0xc   :  { %4089 = vmatmul.mubr.msk.f32.gmra.mrb[4].mxu1 %vm228_vm0, %v101_v25  ;;  %202 = vperm.xlu0 %4971, %v5612_v38   ;;  %v5648_v46 = vld [vmem:[%s6879_s1 + $0x18] sm:$0xff]  ;;  %v5652_v47 = vpack.c.bf16 %v61_v43, %v60_v42  ;;  %v4099_v48 = vld [vmem:[%s6876_s0 + $0x20] sm:$0xff] }
   0xd   :  { %323 = vmatprep.mubr.f32.mxu1 %v6900_v2  ;;  %212 = vperm.xlu1 %4972, %v5617_v39   ;;  %v87_v52 = vld [vmem:[%s6880_s8] sm:$0x3] }
   0xe   :  { %4639 = vmatpush1.bf16.msra.mxu1 %v5591_v32  ;;  %4619 = vmatpush3.bf16.msra.mxu0 %v5597_v34  ;;  %v5700_v54 = vrot.slane %v87_v52, %v91_v51  ;;  %v5702_v55 = vrot.slane %v87_v52, %v95_v53  ;;  %v5709_v63 = vld [vmem:[%s6881_s5] ss:$0 sm:$0xff] }
   0xf   :  { %4641 = vmatprep.subr.bf16.mxu1 %v5604_v36  ;;  %4621 = vmatprep.subr.bf16.mxu0 %v5621_v40 }
  0x10   :  { %4090 = vmatmul.mubr.msk.f32.gmra.mrb[6].mxu1 %vm228_vm0, %v102_v41  ;;  %207 = vperm.xlu0 %4971, %v5640_v45  }
  0x11   :  { %394 = vmatprep.mubr.f32.mxu1 %v6900_v2  ;;  %217 = vperm.xlu1 %4972, %v5648_v46  }
  0x12   :  { %4643 = vmatpush1.bf16.msra.mxu1 %v5635_v44  ;;  %4623 = vmatpush3.bf16.msra.mxu0 %v5621_v40 }
  0x13   :  { %685 = vmatprep.subr.mxu1 %v5492_v0  ;;  %4625 = vmatprep.subr.bf16.mxu0 %v5652_v47 }
  0x15   :  { %395 = vmatmul.mubr.f32.vlgmr.msra.gmra.mrb[0].mxu1 %v6900_v2 }
  0x16   :  { %400 = vmatprep.mubr.f32.mxu1 %v6900_v2  ;;  %686 = vmatpush1.msra.mxu1 %v5497_v1 }
  0x17   :  { %4627 = vmatpush3.bf16.msra.mxu0 %v5652_v47  ;;  %4661 = vmatprep.subr.bf16.mxu1 %v5516_v8 }
  0x18   :  { %4645 = vmatprep.subr.bf16.mxu0 %v5572_v26 }
  0x19   :  { %401 = vmatmul.mubr.f32.gmra.mrb[2].mxu1 %v6900_v2 }
  0x1a   :  { %406 = vmatprep.mubr.f32.mxu1 %v6900_v2  ;;  %4415 = vmatmul.mubr.f32.vlgmr.msra.gmra.mrb[0].mxu0 %v6900_v2 }
  0x1b   :  { %4417 = vmatprep.mubr.f32.mxu0 %v6900_v2  ;;  %4647 = vmatpush3.bf16.msra.mxu0 %v5572_v26 }
  0x1c   :  { %4649 = vmatprep.subr.bf16.mxu0 %v5597_v34 }
  0x1d   :  { %407 = vmatmul.mubr.f32.gmra.mrb[4].mxu1 %v6900_v2 }
  0x1e   :  { %412 = vmatprep.mubr.f32.mxu1 %v6900_v2  ;;  %4418 = vmatmul.mubr.f32.gmra.mrb[2].mxu0 %v6900_v2 }
  0x1f   :  { %4651 = vmatpush3.bf16.msra.mxu0 %v5597_v34 }
  0x20   :  { %4653 = vmatprep.subr.bf16.mxu0 %v5621_v40 }
  0x21   :  { %413 = vmatmul.mubr.f32.gmra.mrb[6].mxu1 %v6900_v2 }
  0x22   :  { %749 = vmatprep.mubr.f32.mxu1 %v6900_v2 }
  0x23   :  { %4655 = vmatpush3.bf16.msra.mxu0 %v5621_v40 }
  0x24   :  { %4657 = vmatprep.subr.bf16.mxu0 %v5652_v47 }
  0x25   :  { %4107 = vmatmul.mubr.msk.f32.vlgmr.msra.gmra.mrb[8].mxu1 %vm228_vm0, %v4099_v48 }
  0x26   :  { %4663 = vmatpush1.bf16.msra.mxu1 %v5526_v11  ;;  %755 = vmatprep.mubr.f32.mxu1 %v6900_v2 }
  0x27   :  { %4659 = vmatpush3.bf16.msra.mxu0 %v5652_v47  ;;  %4665 = vmatprep.subr.bf16.mxu1 %v5542_v16 }
  0x28   :  { %4677 = vmatprep.subr.bf16.mxu0 %v5572_v26 }
  0x2a   :  { %4667 = vmatpush1.bf16.msra.mxu1 %v5551_v19 }
  0x2b   :  { %4669 = vmatprep.subr.bf16.mxu1 %v5557_v21 }
  0x2e   :  { %4671 = vmatpush1.bf16.msra.mxu1 %v5591_v32 }
  0x2f   :  { %4673 = vmatprep.subr.bf16.mxu1 %v5604_v36 }
  0x32   :  { %4675 = vmatpush1.bf16.msra.mxu1 %v5635_v44 }
  0x33   :  { %4709 = vmatprep.subr.bf16.mxu1 %v5572_v26 }
  0x8b   :  { %v203_v48 = vpop.permute.xlu0 %202 }
  0xe8   :  { %v396_v56 = vpop.f32.mrb[0].mxu1 }
  0xe9   :  { %v419_v57 = vadd.f32 %v396_v56, %v5700_v54  ;;  %v398_v58 = vpop.f32.mrb[1].mxu1 }
  0xea   :  { %v420_v59 = vadd.f32 %v398_v58, %v5702_v55 }
  0xeb   :  { %v4091_v60 = vmul.f32 -1.442695, %v419_v57 }
  0xec   :  { %v4092_v61 = vmul.f32 -1.442695, %v420_v59  ;;  %v402_v62 = vpop.f32.mrb[2].mxu1 }
  0xed   :  { %5006 = vpow2.f32 %v4091_v60  ;;  %v421_v3 = vadd.f32 %v402_v62, %v5700_v54  ;;  %v404_v4 = vpop.f32.mrb[3].mxu1  ;;  %v4416_v5 = vpop.f32.mrb[0].mxu0  ;;  %v4100_v62 = vld [vmem:[%s6876_s0 + $0x28] sm:$0xff] }
  0xee   :  { %5008 = vpow2.f32 %v4092_v61  ;;  %v422_v6 = vadd.f32 %v404_v4, %v5702_v55  ;;  %v173_v9 = vpop.f32.mrb[1].mxu0  ;;  %v179_v15 = vadd.f32 %v4416_v5, %v5709_v63  ;;  %v208_v60 = vpop.permute.xlu0 %207  ;;  %4108 = vmatmul.mubr.msk.f32.gmra.mrb[10].mxu1 %vm228_vm0, %v4100_v62 }
  0xef   :  { %v4093_v10 = vmul.f32 -1.442695, %v421_v3  ;;  %v174_v12 = vadd.f32 %v5709_v63, %v173_v9  ;;  %v213_v5 = vpop.permute.xlu1 %212  ;;  %761 = vmatprep.mubr.f32.mxu1 %v6900_v2 }
  0xf0   :  { %v4094_v13 = vmul.f32 -1.442695, %v422_v6  ;;  %v408_v14 = vpop.f32.mrb[4].mxu1 }
  0xf1   :  { %5010 = vpow2.f32 %v4093_v10  ;;  %v423_v17 = vadd.f32 %v408_v14, %v5700_v54  ;;  %v410_v18 = vpop.f32.mrb[5].mxu1  ;;  %v4419_v20 = vpop.f32.mrb[2].mxu0 }
  0xf2   :  { %5012 = vpow2.f32 %v4094_v13  ;;  %v424_v22 = vadd.f32 %v410_v18, %v5702_v55  ;;  %v183_v23 = vpop.f32.mrb[3].mxu0  ;;  %v189_v25 = vadd.f32 %v4419_v20, %v5709_v63 }
  0xf3   :  { %v4095_v24 = vmul.f32 -1.442695, %v423_v17  ;;  %5014 = vtanh.f32 %v174_v12  ;;  %v184_v29 = vadd.f32 %v5709_v63, %v183_v23  ;;  %v4101_v17 = vld [vmem:[%s6876_s0 + $0x30] sm:$0xff] }
  0xf4   :  { %v4096_v27 = vmul.f32 -1.442695, %v424_v22  ;;  %5016 = vtanh.f32 %v179_v15  ;;  %v414_v28 = vpop.f32.mrb[6].mxu1  ;;  %4109 = vmatmul.mubr.msk.f32.gmra.mrb[12].mxu1 %vm228_vm0, %v4101_v17 }
  0xf5   :  { %5018 = vpow2.f32 %v4095_v24  ;;  %v425_v30 = vadd.f32 %v414_v28, %v5700_v54  ;;  %v416_v31 = vpop.f32.mrb[7].mxu1  ;;  %767 = vmatprep.mubr.f32.mxu1 %v6900_v2 }
  0xf6   :  { %5020 = vpow2.f32 %v4096_v27  ;;  %v426_v33 = vadd.f32 %v416_v31, %v5702_v55 }
  0xf7   :  { %v5007_v35 = vpop.eup %5006  ;;  %v4097_v37 = vmul.f32 -1.442695, %v425_v30  ;;  %5022 = vtanh.f32 %v189_v25  ;;  %v218_v30 = vpop.permute.xlu1 %217 }
  0xf8   :  { %v5009_v41 = vpop.eup %5008  ;;  %v451_v42 = vadd.f32 1.0, %v5007_v35  ;;  %v4098_v43 = vmul.f32 -1.442695, %v426_v33  ;;  %5024 = vtanh.f32 %v184_v29  ;;  %v4102_v33 = vld [vmem:[%s6876_s0 + $0x38] sm:$0xff] }
  0xf9   :  { %v452_v49 = vadd.f32 1.0, %v5009_v41  ;;  %5026 = vpow2.f32 %v4097_v37  ;;  %4110 = vmatmul.mubr.msk.f32.gmra.mrb[14].mxu1 %vm228_vm0, %v4102_v33 }
  0xfa   :  { %5028 = vrcp.f32 %v451_v42  ;;  %850 = vmatprep.mubr.f32.mxu1 %v6900_v2 }
  0xfb   :  { %v5011_v50 = vpop.eup %5010  ;;  %5030 = vrcp.f32 %v452_v49 }
  0xfc   :  { %v5013_v51 = vpop.eup %5012  ;;  %v453_v52 = vadd.f32 1.0, %v5011_v50  ;;  %5032 = vpow2.f32 %v4098_v43 }
  0xfd   :  { %v5015_v53 = vpop.eup %5014  ;;  %v454_v56 = vadd.f32 1.0, %v5013_v51 }
  0xfe   :  { %v5017_v57 = vpop.eup %5016  ;;  %5034 = vrcp.f32 %v453_v52  ;;  %v196_v58 = vsub.f32 0.0, %v5015_v53  ;;  %v220_v59 = vmul.f32 %v5015_v53, %v203_v48 }
  0xff   :  { %v5019_v61 = vpop.eup %5018  ;;  %5036 = vrcp.f32 %v454_v56  ;;  %v197_v12 = vsub.f32 0.0, %v5017_v57  ;;  %v221_v13 = vmul.f32 %v5017_v57, %v208_v60 }
 0x100   :  { %v5021_v3 = vpop.eup %5020  ;;  %v455_v4 = vadd.f32 1.0, %v5019_v61  ;;  %v224_v10 = vadd.f32 %v220_v59, %v196_v58  ;;  %v6896_v61 = vmov 1  }
 0x101   :  { %v5023_v6 = vpop.eup %5022  ;;  %v456_v9 = vadd.f32 1.0, %v5021_v3  ;;  %v225_v23 = vadd.f32 %v221_v13, %v197_v12  ;;  %4974 = vset.pattern.permute.xlu1 %v6896_v61  ;;  %4973 = vset.pattern.permute.xlu0 %v6896_v61 }
 0x102   :  { %v5025_v14 = vpop.eup %5024  ;;  %5038 = vrcp.f32 %v455_v4  ;;  %v199_v37 = vsub.f32 0.0, %v5023_v6  ;;  %v223_v43 = vmul.f32 %v5023_v6, %v218_v30 }
 0x103   :  { %v5027_v15 = vpop.eup %5026  ;;  %5040 = vrcp.f32 %v456_v9  ;;  %v198_v24 = vsub.f32 0.0, %v5025_v14  ;;  %v222_v25 = vmul.f32 %v5025_v14, %v213_v5 }
 0x104   :  { %v5029_v18 = vpop.eup %5028  ;;  %v457_v20 = vadd.f32 1.0, %v5027_v15  ;;  %v227_v52 = vadd.f32 %v223_v43, %v199_v37 }
 0x105   :  { %v5031_v22 = vpop.eup %5030  ;;  %v475_v27 = vmul.f32 %v5029_v18, %v224_v10  ;;  %v226_v42 = vadd.f32 %v222_v25, %v198_v24 }
 0x106   :  { %v5033_v28 = vpop.eup %5032  ;;  %5042 = vrcp.f32 %v457_v20  ;;  %v479_v29 = vmul.f32 %v5031_v22, %v5029_v18 }
 0x107   :  { %v458_v31 = vadd.f32 1.0, %v5033_v28 }
 0x108   :  { %v5035_v35 = vpop.eup %5034  ;;  %487 = vrot.lane.b32.xlu0 %v479_v29, %s5405_s25 }
 0x109   :  { %v5037_v41 = vpop.eup %5036  ;;  %5044 = vrcp.f32 %v458_v31  ;;  %v476_v48 = vmul.f32 %v5035_v35, %v225_v23 }
 0x10a   :  { %v480_v49 = vmul.f32 %v5037_v41, %v5035_v35 }
 0x10c   :  { %v5039_v50 = vpop.eup %5038  ;;  %489 = vrot.lane.b32.xlu1 %v480_v49, %s5405_s25 }
 0x10d   :  { %v5041_v51 = vpop.eup %5040  ;;  %v477_v53 = vmul.f32 %v5039_v50, %v226_v42 }
 0x10e   :  { %v481_v56 = vmul.f32 %v5041_v51, %v5039_v50 }
 0x110   :  { %v5043_v57 = vpop.eup %5042  ;;  %491 = vrot.lane.b32.xlu0 %v481_v56, %s5405_s25 }
 0x111   :  { %v478_v58 = vmul.f32 %v5043_v57, %v227_v52 }
 0x113   :  { %v5045_v59 = vpop.eup %5044 }
 0x114   :  { %v482_v60 = vmul.f32 %v5045_v59, %v5043_v57  ;;  %650 = vperm.xlu0 %4973, %v5612_v38  }
 0x116   :  { %493 = vrot.lane.b32.xlu1 %v482_v60, %s5405_s25 }
 0x118   :  { %662 = vperm.xlu0 %4973, %v5648_v46  }
 0x11a   :  { %654 = vperm.xlu1 %4974, %v5640_v45  }
 0x11e   :  { %658 = vperm.xlu1 %4974, %v5617_v39  }
 0x17a   :  { %v488_v62 = vpop.permute.xlu0 %487 }
 0x17b   :  { %v5746_v3 = vadd.f32 %v488_v62, %v475_v27 }
 0x17d   :  { %5046 = vtanh.f32 %v5746_v3  ;;  %4436 = vmatprep.mubr.msk.f32.mxu0 %vm103_vm1, %v5746_v3 }
 0x17e   :  { %v490_v4 = vpop.permute.xlu1 %489 }
 0x17f   :  { %v5751_v5 = vadd.f32 %v490_v4, %v476_v48 }
 0x181   :  { %5048 = vtanh.f32 %v5751_v5  ;;  %4437 = vmatmul.mubr.msk.f32.vlgmr.msra.gmra.mrb[4].mxu0 %vm103_vm1, %v5751_v5 }
 0x182   :  { %v492_v6 = vpop.permute.xlu0 %491  ;;  %4679 = vmatpush3.bf16.msra.mxu0 %v5572_v26 }
 0x183   :  { %v5757_v9 = vadd.f32 %v492_v6, %v477_v53  ;;  %4681 = vmatprep.subr.bf16.mxu0 %v5597_v34 }
 0x185   :  { %5050 = vtanh.f32 %v5757_v9  ;;  %4439 = vmatprep.mubr.msk.f32.mxu0 %vm103_vm1, %v5757_v9 }
 0x186   :  { %4683 = vmatpush3.bf16.msra.mxu0 %v5597_v34 }
 0x187   :  { %v5047_v10 = vpop.eup %5046  ;;  %4685 = vmatprep.subr.bf16.mxu0 %v5621_v40 }
 0x188   :  { %v5765_v12 = vmul.f32 %v5047_v10, %v5031_v22  ;;  %v494_v13 = vpop.permute.xlu1 %493 }
 0x189   :  { %v5767_v14 = vadd.f32 %v494_v13, %v478_v58 }
 0x18a   :  { %4111 = vmatmul.mubr.msk.f32.vlgmr.msra.gmra.mrb[8].mxu1 %vm103_vm1, %v5765_v12  ;;  %4687 = vmatpush3.bf16.msra.mxu0 %v5621_v40 }
 0x18b   :  { %v5049_v15 = vpop.eup %5048  ;;  %5052 = vtanh.f32 %v5767_v14  ;;  %4440 = vmatmul.mubr.msk.f32.gmra.mrb[6].mxu0 %vm103_vm1, %v5767_v14  ;;  %856 = vmatprep.mubr.f32.mxu1 %v6900_v2 }
 0x18c   :  { %v5776_v17 = vmul.f32 %v5049_v15, %v5037_v41  ;;  %4689 = vmatprep.subr.bf16.mxu0 %v5652_v47  ;;  %4711 = vmatpush3.bf16.msra.mxu1 %v5572_v26 }
 0x18d   :  { %4713 = vmatprep.subr.bf16.mxu1 %v5597_v34 }
 0x18e   :  { %4112 = vmatmul.mubr.msk.f32.gmra.mrb[10].mxu1 %vm103_vm1, %v5776_v17  ;;  %4691 = vmatpush3.bf16.msra.mxu0 %v5652_v47 }
 0x18f   :  { %v5051_v18 = vpop.eup %5050  ;;  %862 = vmatprep.mubr.f32.mxu1 %v6900_v2  ;;  %1141 = vmatprep.subr.mxu0 %v5492_v0 }
 0x190   :  { %v5786_v20 = vmul.f32 %v5051_v18, %v5041_v51  ;;  %4715 = vmatpush3.bf16.msra.mxu1 %v5597_v34 }
 0x191   :  { %4717 = vmatprep.subr.bf16.mxu1 %v5621_v40 }
 0x192   :  { %4113 = vmatmul.mubr.msk.f32.gmra.mrb[12].mxu1 %vm103_vm1, %v5786_v20 }
 0x193   :  { %868 = vmatprep.mubr.f32.mxu1 %v6900_v2 }
 0x194   :  { %4719 = vmatpush3.bf16.msra.mxu1 %v5621_v40 }
 0x195   :  { %v5053_v22 = vpop.eup %5052  ;;  %4721 = vmatprep.subr.bf16.mxu1 %v5652_v47 }
 0x196   :  { %v5795_v23 = vmul.f32 %v5053_v22, %v5045_v59 }
 0x198   :  { %4114 = vmatmul.mubr.msk.f32.gmra.mrb[14].mxu1 %vm103_vm1, %v5795_v23 }
 0x199   :  { %4723 = vmatpush3.bf16.msra.mxu1 %v5652_v47 }
 0x19a   :  { %1597 = vmatprep.subr.mxu1 %v5492_v0 }
 0x254   :  { %v4438_v24 = vpop.f32.mrb[4].mxu0 }
 0x255   :  { %v622_v25 = vpop.f32.mrb[5].mxu0  ;;  %v628_v51 = vadd.f32 %v4438_v24, %v5709_v63 }
 0x256   :  { %v623_v49 = vadd.f32 %v5709_v63, %v622_v25 }
 0x25d   :  { %v852_v27 = vpop.f32.mrb[8].mxu1 }
 0x25e   :  { %v4441_v28 = vpop.f32.mrb[6].mxu0  ;;  %v875_v29 = vadd.f32 %v852_v27, %v5700_v54  ;;  %v854_v30 = vpop.f32.mrb[9].mxu1 }
 0x25f   :  { %v632_v31 = vpop.f32.mrb[7].mxu0  ;;  %v876_v33 = vadd.f32 %v854_v30, %v5702_v55 }
 0x260   :  { %v4115_v35 = vmul.f32 -1.442695, %v875_v29  ;;  %v633_v62 = vadd.f32 %v5709_v63, %v632_v31 }
 0x261   :  { %v4116_v37 = vmul.f32 -1.442695, %v876_v33  ;;  %v858_v41 = vpop.f32.mrb[10].mxu1 }
 0x262   :  { %v877_v42 = vadd.f32 %v858_v41, %v5700_v54  ;;  %v860_v43 = vpop.f32.mrb[11].mxu1  ;;  %5054 = vpow2.f32 %v4115_v35  ;;  %v638_v35 = vadd.f32 %v4441_v28, %v5709_v63 }
 0x263   :  { %v878_v48 = vadd.f32 %v860_v43, %v5702_v55  ;;  %5056 = vpow2.f32 %v4116_v37  ;;  %v651_v37 = vpop.permute.xlu0 %650 }
 0x264   :  { %v4117_v50 = vmul.f32 -1.442695, %v877_v42 }
 0x265   :  { %v4118_v52 = vmul.f32 -1.442695, %v878_v48  ;;  %v864_v53 = vpop.f32.mrb[12].mxu1 }
 0x266   :  { %5058 = vpow2.f32 %v4117_v50  ;;  %v879_v56 = vadd.f32 %v864_v53, %v5700_v54  ;;  %v866_v57 = vpop.f32.mrb[13].mxu1 }
 0x267   :  { %5060 = vpow2.f32 %v4118_v52  ;;  %v880_v58 = vadd.f32 %v866_v57, %v5702_v55 }
 0x268   :  { %5062 = vtanh.f32 %v623_v49  ;;  %v4119_v59 = vmul.f32 -1.442695, %v879_v56  ;;  %v655_v49 = vpop.permute.xlu1 %654 }
 0x269   :  { %5064 = vtanh.f32 %v628_v51  ;;  %v4120_v60 = vmul.f32 -1.442695, %v880_v58 }
 0x26a   :  { %5066 = vpow2.f32 %v4119_v59 }
 0x26b   :  { %5068 = vpow2.f32 %v4120_v60  ;;  %v870_v4 = vpop.f32.mrb[14].mxu1 }
 0x26c   :  { %v881_v6 = vadd.f32 %v870_v4, %v5700_v54  ;;  %v872_v10 = vpop.f32.mrb[15].mxu1  ;;  %v5055_v13 = vpop.eup %5054  ;;  %5070 = vtanh.f32 %v633_v62 }
 0x26d   :  { %v882_v15 = vadd.f32 %v872_v10, %v5702_v55  ;;  %v5057_v18 = vpop.eup %5056  ;;  %v907_v22 = vadd.f32 1.0, %v5055_v13  ;;  %v659_v59 = vpop.permute.xlu1 %658 }
 0x26e   :  { %v4121_v24 = vmul.f32 -1.442695, %v881_v6  ;;  %v908_v25 = vadd.f32 1.0, %v5057_v18 }
 0x26f   :  { %5072 = vrcp.f32 %v907_v22  ;;  %v4122_v33 = vmul.f32 -1.442695, %v882_v15 }
 0x270   :  { %v5059_v27 = vpop.eup %5058  ;;  %5074 = vrcp.f32 %v908_v25 }
 0x271   :  { %v5061_v29 = vpop.eup %5060  ;;  %v909_v30 = vadd.f32 1.0, %v5059_v27  ;;  %5076 = vpow2.f32 %v4121_v24 }
 0x272   :  { %v5063_v31 = vpop.eup %5062  ;;  %v910_v41 = vadd.f32 1.0, %v5061_v29 }
 0x273   :  { %v5065_v42 = vpop.eup %5064  ;;  %5078 = vrcp.f32 %v909_v30  ;;  %v645_v50 = vsub.f32 %v5746_v3, %v5063_v31  ;;  %v665_v51 = vmul.f32 %v5063_v31, %v651_v37 }
 0x274   :  { %v5067_v43 = vpop.eup %5066  ;;  %5080 = vrcp.f32 %v910_v41  ;;  %v646_v56 = vsub.f32 %v5751_v5, %v5065_v42  ;;  %v666_v28 = vmul.f32 %v5065_v42, %v655_v49 }
 0x275   :  { %v5069_v48 = vpop.eup %5068  ;;  %v911_v52 = vadd.f32 1.0, %v5067_v43  ;;  %5082 = vpow2.f32 %v4122_v33  ;;  %v669_v58 = vadd.f32 %v665_v51, %v645_v50 }
 0x276   :  { %5084 = vtanh.f32 %v638_v35  ;;  %v912_v53 = vadd.f32 1.0, %v5069_v48  ;;  %v5071_v57 = vpop.eup %5070  ;;  %v670_v10 = vadd.f32 %v666_v28, %v646_v56  ;;  %v663_v35 = vpop.permute.xlu0 %662 }
 0x277   :  { %5086 = vrcp.f32 %v911_v52  ;;  %v647_v3 = vsub.f32 %v5757_v9, %v5071_v57  ;;  %v667_v13 = vmul.f32 %v5071_v57, %v659_v59  ;;  %v4125_v59 = vld [vmem:[%s6876_s0 + $0x50] sm:$0xff] }
 0x278   :  { %5088 = vrcp.f32 %v912_v53  ;;  %v6894_v53 = vmov 2  }
 0x279   :  { %v5073_v60 = vpop.eup %5072  ;;  %v671_v33 = vadd.f32 %v667_v13, %v647_v3  ;;  %4976 = vset.pattern.permute.xlu0 %v6894_v53  ;;  %4975 = vset.pattern.permute.xlu1 %v6894_v53 }
 0x27a   :  { %v5815_v62 = vpop.eup %5074  ;;  %v931_v4 = vmul.f32 %v5073_v60, %v669_v58 }
 0x27b   :  { %v5077_v6 = vpop.eup %5076  ;;  %v935_v15 = vmul.f32 %v5815_v62, %v5073_v60  ;;  %v4126_v60 = vld [vmem:[%s6876_s0 + $0x58] sm:$0xff] }
 0x27c   :  { %v913_v22 = vadd.f32 1.0, %v5077_v6 }
 0x27d   :  { %v5079_v18 = vpop.eup %5078  ;;  %943 = vrot.lane.b32.xlu1 %v935_v15, %s5405_s25 }
 0x27e   :  { %v5819_v24 = vpop.eup %5080  ;;  %v932_v5 = vmul.f32 %v5079_v18, %v670_v10  ;;  %5090 = vrcp.f32 %v913_v22 }
 0x27f   :  { %v5083_v25 = vpop.eup %5082  ;;  %v936_v27 = vmul.f32 %v5819_v24, %v5079_v18 }
 0x280   :  { %v5085_v29 = vpop.eup %5084  ;;  %v914_v30 = vadd.f32 1.0, %v5083_v25 }
 0x281   :  { %v5087_v31 = vpop.eup %5086  ;;  %945 = vrot.lane.b32.xlu0 %v936_v27, %s5405_s25  ;;  %v648_v42 = vsub.f32 %v5767_v14, %v5085_v29  ;;  %v668_v43 = vmul.f32 %v5085_v29, %v663_v35 }
 0x282   :  { %v5824_v9 = vpop.eup %5088  ;;  %5092 = vrcp.f32 %v914_v30  ;;  %v933_v37 = vmul.f32 %v5087_v31, %v671_v33 }
 0x283   :  { %v937_v41 = vmul.f32 %v5824_v9, %v5087_v31  ;;  %v672_v48 = vadd.f32 %v668_v43, %v648_v42 }
 0x285   :  { %947 = vrot.lane.b32.xlu1 %v937_v41, %s5405_s25 }
 0x288   :  { %v5091_v49 = vpop.eup %5090 }
 0x289   :  { %v934_v50 = vmul.f32 %v5091_v49, %v672_v48  ;;  %1106 = vperm.xlu1 %4975, %v5612_v38  }
 0x28c   :  { %v5829_v51 = vpop.eup %5092 }
 0x28d   :  { %v938_v52 = vmul.f32 %v5829_v51, %v5091_v49  ;;  %1114 = vperm.xlu1 %4975, %v5617_v39  }
 0x28f   :  { %949 = vrot.lane.b32.xlu0 %v938_v52, %s5405_s25 }
 0x291   :  { %1118 = vperm.xlu1 %4975, %v5648_v46   ;;  %v4123_v46 = vld [vmem:[%s6876_s0 + $0x40] sm:$0xff] }
 0x293   :  { %1110 = vperm.xlu0 %4976, %v5640_v45  }
 0x2ef   :  { %v944_v14 = vpop.permute.xlu1 %943 }
 0x2f0   :  { %v5839_v56 = vadd.f32 %v944_v14, %v931_v4 }
 0x2f2   :  { %4458 = vmatprep.mubr.msk.f32.mxu0 %vm103_vm1, %v5839_v56  ;;  %5094 = vtanh.f32 %v5839_v56 }
 0x2f3   :  { %v946_v28 = vpop.permute.xlu0 %945 }
 0x2f4   :  { %v5843_v57 = vadd.f32 %v946_v28, %v932_v5 }
 0x2f6   :  { %4459 = vmatmul.mubr.msk.f32.vlgmr.msra.gmra.mrb[8].mxu0 %vm103_vm1, %v5843_v57  ;;  %5096 = vtanh.f32 %v5843_v57 }
 0x2f7   :  { %v948_v58 = vpop.permute.xlu1 %947  ;;  %1142 = vmatpush1.msra.mxu0 %v5497_v1  ;;  %v4124_v1 = vld [vmem:[%s6876_s0 + $0x48] sm:$0xff] }
 0x2f8   :  { %v5848_v38 = vadd.f32 %v948_v58, %v933_v37  ;;  %4693 = vmatprep.subr.bf16.mxu0 %v5516_v8 }
 0x2fa   :  { %4461 = vmatprep.mubr.msk.f32.mxu0 %vm103_vm1, %v5848_v38  ;;  %5098 = vtanh.f32 %v5848_v38 }
 0x2fc   :  { %v5095_v4 = vpop.eup %5094 }
 0x2fd   :  { %v5890_v6 = vmul.f32 %v5095_v4, %v5815_v62 }
 0x300   :  { %v5097_v10 = vpop.eup %5096 }
 0x301   :  { %v950_v39 = vpop.permute.xlu0 %949  ;;  %v5898_v3 = vmul.f32 %v5097_v10, %v5819_v24 }
 0x302   :  { %v5853_v45 = vadd.f32 %v950_v39, %v934_v50 }
 0x304   :  { %4462 = vmatmul.mubr.msk.f32.gmra.mrb[10].mxu0 %vm103_vm1, %v5853_v45  ;;  %5100 = vtanh.f32 %v5853_v45  ;;  %v5099_v13 = vpop.eup %5098 }
 0x305   :  { %1205 = vmatprep.mubr.f32.mxu0 %v6900_v2  ;;  %v5906_v62 = vmul.f32 %v5099_v13, %v5824_v9 }
 0x308   :  { %4131 = vmatmul.mubr.msk.f32.vlgmr.msra.gmra.mrb[12].mxu0 %vm228_vm0, %v4123_v46 }
 0x309   :  { %4695 = vmatpush1.bf16.msra.mxu0 %v5526_v11  ;;  %1211 = vmatprep.mubr.f32.mxu0 %v6900_v2 }
 0x30a   :  { %4697 = vmatprep.subr.bf16.mxu0 %v5542_v16 }
 0x30c   :  { %4132 = vmatmul.mubr.msk.f32.gmra.mrb[14].mxu0 %vm228_vm0, %v4124_v1 }
 0x30d   :  { %4699 = vmatpush1.bf16.msra.mxu0 %v5551_v19  ;;  %1217 = vmatprep.mubr.f32.mxu0 %v6900_v2 }
 0x30e   :  { %4701 = vmatprep.subr.bf16.mxu0 %v5557_v21  ;;  %v5101_v15 = vpop.eup %5100 }
 0x30f   :  { %v5914_v18 = vmul.f32 %v5101_v15, %v5829_v51 }
 0x310   :  { %4133 = vmatmul.mubr.msk.f32.gmra.mrb[16].mxu0 %vm228_vm0, %v4125_v59 }
 0x311   :  { %4703 = vmatpush1.bf16.msra.mxu0 %v5591_v32  ;;  %1223 = vmatprep.mubr.f32.mxu0 %v6900_v2 }
 0x312   :  { %4705 = vmatprep.subr.bf16.mxu0 %v5604_v36 }
 0x314   :  { %4134 = vmatmul.mubr.msk.f32.gmra.mrb[18].mxu0 %vm228_vm0, %v4126_v60 }
 0x315   :  { %4707 = vmatpush1.bf16.msra.mxu0 %v5635_v44  ;;  %1306 = vmatprep.mubr.f32.mxu0 %v6900_v2 }
 0x316   :  { %4741 = vmatprep.subr.bf16.mxu0 %v5572_v26 }
 0x318   :  { %4135 = vmatmul.mubr.msk.f32.vlgmr.msra.gmra.mrb[12].mxu0 %vm103_vm1, %v5890_v6 }
 0x319   :  { %1312 = vmatprep.mubr.f32.mxu0 %v6900_v2  ;;  %4743 = vmatpush3.bf16.msra.mxu0 %v5572_v26 }
 0x31a   :  { %4745 = vmatprep.subr.bf16.mxu0 %v5597_v34 }
 0x31c   :  { %4136 = vmatmul.mubr.msk.f32.gmra.mrb[14].mxu0 %vm103_vm1, %v5898_v3 }
 0x31d   :  { %1318 = vmatprep.mubr.f32.mxu0 %v6900_v2  ;;  %4747 = vmatpush3.bf16.msra.mxu0 %v5597_v34 }
 0x31e   :  { %4749 = vmatprep.subr.bf16.mxu0 %v5621_v40 }
 0x320   :  { %4137 = vmatmul.mubr.msk.f32.gmra.mrb[16].mxu0 %vm103_vm1, %v5906_v62 }
 0x321   :  { %1324 = vmatprep.mubr.f32.mxu0 %v6900_v2  ;;  %4751 = vmatpush3.bf16.msra.mxu0 %v5621_v40 }
 0x322   :  { %4753 = vmatprep.subr.bf16.mxu0 %v5652_v47 }
 0x324   :  { %4138 = vmatmul.mubr.msk.f32.gmra.mrb[18].mxu0 %vm103_vm1, %v5914_v18 }
 0x325   :  { %4755 = vmatpush3.bf16.msra.mxu0 %v5652_v47 }
 0x326   :  { %2053 = vmatprep.subr.mxu0 %v5492_v0 }
 0x3c9   :  { %v4460_v22 = vpop.f32.mrb[8].mxu0 }
 0x3ca   :  { %v1078_v24 = vpop.f32.mrb[9].mxu0  ;;  %v1084_v48 = vadd.f32 %v4460_v22, %v5709_v63 }
 0x3cb   :  { %v1079_v35 = vadd.f32 %v5709_v63, %v1078_v24 }
 0x3d7   :  { %v4463_v5 = vpop.f32.mrb[10].mxu0 }
 0x3d8   :  { %v1088_v25 = vpop.f32.mrb[11].mxu0  ;;  %v1094_v24 = vadd.f32 %v4463_v5, %v5709_v63  ;;  %v1111_v5 = vpop.permute.xlu0 %1110 }
 0x3d9   :  { %v1089_v58 = vadd.f32 %v5709_v63, %v1088_v25 }
 0x3eb   :  { %v1308_v27 = vpop.f32.mrb[12].mxu0 }
 0x3ec   :  { %v1331_v29 = vadd.f32 %v1308_v27, %v5700_v54  ;;  %v1310_v30 = vpop.f32.mrb[13].mxu0 }
 0x3ed   :  { %v1332_v33 = vadd.f32 %v1310_v30, %v5702_v55 }
 0x3ee   :  { %v4139_v31 = vmul.f32 -1.442695, %v1331_v29 }
 0x3ef   :  { %v4140_v9 = vmul.f32 -1.442695, %v1332_v33  ;;  %v1314_v37 = vpop.f32.mrb[14].mxu0  ;;  %v1107_v33 = vpop.permute.xlu1 %1106 }
 0x3f0   :  { %5102 = vpow2.f32 %v4139_v31  ;;  %v1333_v41 = vadd.f32 %v1314_v37, %v5700_v54  ;;  %v1316_v42 = vpop.f32.mrb[15].mxu0 }
 0x3f1   :  { %5104 = vpow2.f32 %v4140_v9  ;;  %v1334_v0 = vadd.f32 %v1316_v42, %v5702_v55 }
 0x3f2   :  { %v4141_v43 = vmul.f32 -1.442695, %v1333_v41  ;;  %5106 = vtanh.f32 %v1079_v35 }
 0x3f3   :  { %v4142_v49 = vmul.f32 -1.442695, %v1334_v0  ;;  %v1320_v50 = vpop.f32.mrb[16].mxu0 }
 0x3f4   :  { %5108 = vpow2.f32 %v4141_v43  ;;  %v1335_v51 = vadd.f32 %v1320_v50, %v5700_v54  ;;  %v1322_v52 = vpop.f32.mrb[17].mxu0 }
 0x3f5   :  { %5110 = vpow2.f32 %v4142_v49  ;;  %v1336_v14 = vadd.f32 %v1322_v52, %v5702_v55  ;;  %v1115_v49 = vpop.permute.xlu1 %1114 }
 0x3f6   :  { %v4143_v28 = vmul.f32 -1.442695, %v1335_v51  ;;  %5112 = vtanh.f32 %v1084_v48 }
 0x3f7   :  { %v4144_v39 = vmul.f32 -1.442695, %v1336_v14  ;;  %v1326_v46 = vpop.f32.mrb[18].mxu0 }
 0x3f8   :  { %5114 = vpow2.f32 %v4143_v28  ;;  %v1337_v1 = vadd.f32 %v1326_v46, %v5700_v54  ;;  %v1328_v59 = vpop.f32.mrb[19].mxu0 }
 0x3f9   :  { %5116 = vpow2.f32 %v4144_v39  ;;  %v1338_v60 = vadd.f32 %v1328_v59, %v5702_v55 }
 0x3fa   :  { %v5103_v4 = vpop.eup %5102  ;;  %v4145_v10 = vmul.f32 -1.442695, %v1337_v1  ;;  %5118 = vtanh.f32 %v1089_v58 }
 0x3fb   :  { %v5105_v13 = vpop.eup %5104  ;;  %v1363_v15 = vadd.f32 1.0, %v5103_v4  ;;  %v4146_v22 = vmul.f32 -1.442695, %v1338_v60 }
 0x3fc   :  { %v1364_v27 = vadd.f32 1.0, %v5105_v13  ;;  %5120 = vpow2.f32 %v4145_v10  ;;  %v5107_v25 = vpop.eup %5106 }
 0x3fd   :  { %5122 = vrcp.f32 %v1363_v15  ;;  %v1101_v41 = vsub.f32 %v5839_v56, %v5107_v25  ;;  %v1121_v42 = vmul.f32 %v5107_v25, %v1107_v33 }
 0x3fe   :  { %v5109_v29 = vpop.eup %5108  ;;  %5124 = vrcp.f32 %v1364_v27 }
 0x3ff   :  { %v5111_v30 = vpop.eup %5110  ;;  %v1365_v31 = vadd.f32 1.0, %v5109_v29  ;;  %5126 = vpow2.f32 %v4146_v22  ;;  %v1125_v14 = vadd.f32 %v1121_v42, %v1101_v41 }
 0x400   :  { %5128 = vtanh.f32 %v1094_v24  ;;  %v1366_v35 = vadd.f32 1.0, %v5111_v30  ;;  %v5113_v9 = vpop.eup %5112 }
 0x401   :  { %5130 = vrcp.f32 %v1365_v31  ;;  %v1102_v51 = vsub.f32 %v5843_v57, %v5113_v9  ;;  %v1122_v52 = vmul.f32 %v5113_v9, %v1111_v5  ;;  %v1119_v57 = vpop.permute.xlu1 %1118  ;;  %v5958_v5 = vld [vmem:[%s6879_s1 + $0x8] sm:$0xff] }
 0x402   :  { %v5115_v37 = vpop.eup %5114  ;;  %5132 = vrcp.f32 %v1366_v35 }
 0x403   :  { %v5117_v63 = vpop.eup %5116  ;;  %v1367_v0 = vadd.f32 1.0, %v5115_v37  ;;  %v1126_v60 = vadd.f32 %v1122_v52, %v1102_v51 }
 0x404   :  { %v1368_v43 = vadd.f32 1.0, %v5117_v63  ;;  %v5119_v48 = vpop.eup %5118 }
 0x405   :  { %5134 = vrcp.f32 %v1367_v0  ;;  %v1103_v4 = vsub.f32 %v5848_v38, %v5119_v48  ;;  %v1123_v10 = vmul.f32 %v5119_v48, %v1115_v49  ;;  %v5964_v0 = vld [vmem:[%s6879_s1] sm:$0xff]  ;;  %v5976_v48 = vld [vmem:[%s6879_s1 + $0x10] sm:$0xff] }
 0x406   :  { %v5121_v50 = vpop.eup %5120  ;;  %5136 = vrcp.f32 %v1368_v43  ;;  %v5970_v43 = vld [vmem:[%s6879_s1 + $0x18] sm:$0xff] }
 0x407   :  { %v5123_v28 = vpop.eup %5122  ;;  %v1369_v58 = vadd.f32 1.0, %v5121_v50  ;;  %v1127_v25 = vadd.f32 %v1123_v10, %v1103_v4  ;;  %v4150_v4 = vld [vmem:[%s6876_s0 + $0x78] sm:$0xff] }
 0x408   :  { %v5935_v39 = vpop.eup %5124  ;;  %v1387_v56 = vmul.f32 %v5123_v28, %v1125_v14 }
 0x409   :  { %v5127_v46 = vpop.eup %5126  ;;  %5138 = vrcp.f32 %v1369_v58  ;;  %v1391_v1 = vmul.f32 %v5935_v39, %v5123_v28  ;;  %v5990_v28 = vld [vmem:[%s6875_s7] sm:$0xff] }
 0x40a   :  { %v5129_v59 = vpop.eup %5128  ;;  %v1370_v13 = vadd.f32 1.0, %v5127_v46 }
 0x40b   :  { %v5131_v15 = vpop.eup %5130  ;;  %1399 = vrot.lane.b32.xlu0 %v1391_v1, %s5405_s25  ;;  %v1104_v29 = vsub.f32 %v5853_v45, %v5129_v59  ;;  %v1124_v30 = vmul.f32 %v5129_v59, %v1119_v57  ;;  %v6892_v45 = vmov 3   ;;  %v4147_v1 = vld [vmem:[%s6876_s0 + $0x60] sm:$0xff]  ;;  %v4148_v59 = vld [vmem:[%s6876_s0 + $0x68] sm:$0xff] }
 0x40c   :  { %v5940_v22 = vpop.eup %5132  ;;  %5140 = vrcp.f32 %v1370_v13  ;;  %v1388_v24 = vmul.f32 %v5131_v15, %v1126_v60  ;;  %4978 = vset.pattern.permute.xlu1 %v6892_v45  ;;  %4977 = vset.pattern.permute.xlu0 %v6892_v45  ;;  %v4149_v60 = vld [vmem:[%s6876_s0 + $0x70] sm:$0xff] }
 0x40d   :  { %v1392_v27 = vmul.f32 %v5940_v22, %v5131_v15  ;;  %v1128_v9 = vadd.f32 %v1124_v30, %v1104_v29 }
 0x40f   :  { %v5135_v33 = vpop.eup %5134  ;;  %1401 = vrot.lane.b32.xlu1 %v1392_v27, %s5405_s25 }
 0x410   :  { %v5945_v38 = vpop.eup %5136  ;;  %v1389_v31 = vmul.f32 %v5135_v33, %v1127_v25  ;;  %v6068_v25 = vld [vmem:[%s6875_s7 + $0x8] sm:$0xff] }
 0x411   :  { %v1393_v35 = vmul.f32 %v5945_v38, %v5135_v33 }
 0x413   :  { %v5139_v37 = vpop.eup %5138  ;;  %1403 = vrot.lane.b32.xlu0 %v1393_v35, %s5405_s25 }
 0x414   :  { %v1390_v41 = vmul.f32 %v5139_v37, %v1128_v9 }
 0x416   :  { %v5949_v42 = vpop.eup %5140 }
 0x417   :  { %v1394_v63 = vmul.f32 %v5949_v42, %v5139_v37  ;;  %1562 = vperm.xlu0 %4977, %v5964_v0  }
 0x419   :  { %1405 = vrot.lane.b32.xlu1 %v1394_v63, %s5405_s25 }
 0x41b   :  { %1574 = vperm.xlu0 %4977, %v5970_v43  }
 0x41d   :  { %1566 = vperm.xlu1 %4978, %v5958_v5  }
 0x421   :  { %1570 = vperm.xlu1 %4978, %v5976_v48  }
 0x47d   :  { %v1400_v49 = vpop.permute.xlu0 %1399 }
 0x47e   :  { %v5979_v50 = vadd.f32 %v1400_v49, %v1387_v56 }
 0x480   :  { %4480 = vmatprep.mubr.msk.f32.mxu1 %vm103_vm1, %v5979_v50  ;;  %5142 = vtanh.f32 %v5979_v50 }
 0x481   :  { %v1402_v51 = vpop.permute.xlu1 %1401 }
 0x482   :  { %v5983_v52 = vadd.f32 %v1402_v51, %v1388_v24 }
 0x484   :  { %4481 = vmatmul.mubr.msk.f32.vlgmr.msra.gmra.mrb[16].mxu1 %vm103_vm1, %v5983_v52  ;;  %5144 = vtanh.f32 %v5983_v52 }
 0x485   :  { %v1404_v14 = vpop.permute.xlu0 %1403  ;;  %1598 = vmatpush1.msra.mxu1 %v5990_v28 }
 0x486   :  { %v5993_v58 = vadd.f32 %v1404_v14, %v1389_v31  ;;  %4725 = vmatprep.subr.bf16.mxu1 %v5516_v8 }
 0x488   :  { %4483 = vmatprep.mubr.msk.f32.mxu1 %vm103_vm1, %v5993_v58  ;;  %5146 = vtanh.f32 %v5993_v58 }
 0x48a   :  { %v5143_v10 = vpop.eup %5142 }
 0x48b   :  { %v1406_v56 = vpop.permute.xlu1 %1405  ;;  %v6035_v13 = vmul.f32 %v5143_v10, %v5935_v39 }
 0x48c   :  { %v5998_v46 = vadd.f32 %v1406_v56, %v1390_v41 }
 0x48e   :  { %4484 = vmatmul.mubr.msk.f32.gmra.mrb[18].mxu1 %vm103_vm1, %v5998_v46  ;;  %5148 = vtanh.f32 %v5998_v46  ;;  %v5145_v15 = vpop.eup %5144 }
 0x48f   :  { %1661 = vmatprep.mubr.f32.mxu1 %v6900_v2  ;;  %v6043_v57 = vmul.f32 %v5145_v15, %v5940_v22 }
 0x492   :  { %4155 = vmatmul.mubr.msk.f32.vlgmr.msra.gmra.mrb[20].mxu1 %vm228_vm0, %v4147_v1  ;;  %v5147_v24 = vpop.eup %5146 }
 0x493   :  { %4727 = vmatpush1.bf16.msra.mxu1 %v5526_v11  ;;  %1667 = vmatprep.mubr.f32.mxu1 %v6900_v2  ;;  %v6051_v39 = vmul.f32 %v5147_v24, %v5945_v38 }
 0x494   :  { %4729 = vmatprep.subr.bf16.mxu1 %v5542_v16 }
 0x496   :  { %4156 = vmatmul.mubr.msk.f32.gmra.mrb[22].mxu1 %vm228_vm0, %v4148_v59 }
 0x497   :  { %4731 = vmatpush1.bf16.msra.mxu1 %v5551_v19  ;;  %1673 = vmatprep.mubr.f32.mxu1 %v6900_v2 }
 0x498   :  { %4733 = vmatprep.subr.bf16.mxu1 %v5557_v21  ;;  %v5149_v27 = vpop.eup %5148 }
 0x499   :  { %v6059_v22 = vmul.f32 %v5149_v27, %v5949_v42  ;;  %v6076_v42 = vld [vmem:[%s6881_s5] ss:$0 sm:$0xff] }
 0x49a   :  { %4157 = vmatmul.mubr.msk.f32.gmra.mrb[24].mxu1 %vm228_vm0, %v4149_v60 }
 0x49b   :  { %4735 = vmatpush1.bf16.msra.mxu1 %v5591_v32  ;;  %1679 = vmatprep.mubr.f32.mxu1 %v6900_v2 }
 0x49c   :  { %4737 = vmatprep.subr.bf16.mxu1 %v5604_v36 }
 0x49e   :  { %4158 = vmatmul.mubr.msk.f32.gmra.mrb[26].mxu1 %vm228_vm0, %v4150_v4 }
 0x49f   :  { %4739 = vmatpush1.bf16.msra.mxu1 %v5635_v44  ;;  %1762 = vmatprep.mubr.f32.mxu1 %v6900_v2 }
 0x4a0   :  { %4773 = vmatprep.subr.bf16.mxu1 %v5572_v26 }
 0x4a2   :  { %4159 = vmatmul.mubr.msk.f32.vlgmr.msra.gmra.mrb[20].mxu1 %vm103_vm1, %v6035_v13 }
 0x4a3   :  { %1768 = vmatprep.mubr.f32.mxu1 %v6900_v2  ;;  %4775 = vmatpush3.bf16.msra.mxu1 %v5572_v26 }
 0x4a4   :  { %4777 = vmatprep.subr.bf16.mxu1 %v5597_v34 }
 0x4a6   :  { %4160 = vmatmul.mubr.msk.f32.gmra.mrb[22].mxu1 %vm103_vm1, %v6043_v57 }
 0x4a7   :  { %1774 = vmatprep.mubr.f32.mxu1 %v6900_v2  ;;  %4779 = vmatpush3.bf16.msra.mxu1 %v5597_v34 }
 0x4a8   :  { %4781 = vmatprep.subr.bf16.mxu1 %v5621_v40 }
 0x4aa   :  { %4161 = vmatmul.mubr.msk.f32.gmra.mrb[24].mxu1 %vm103_vm1, %v6051_v39 }
 0x4ab   :  { %1780 = vmatprep.mubr.f32.mxu1 %v6900_v2  ;;  %4783 = vmatpush3.bf16.msra.mxu1 %v5621_v40 }
 0x4ac   :  { %4785 = vmatprep.subr.bf16.mxu1 %v5652_v47 }
 0x4ae   :  { %4162 = vmatmul.mubr.msk.f32.gmra.mrb[26].mxu1 %vm103_vm1, %v6059_v22 }
 0x4af   :  { %4787 = vmatpush3.bf16.msra.mxu1 %v5652_v47 }
 0x4b0   :  { %2509 = vmatprep.subr.mxu1 %v6068_v25 }
 0x557   :  { %v4482_v29 = vpop.f32.mrb[16].mxu1 }
 0x558   :  { %v1534_v30 = vpop.f32.mrb[17].mxu1  ;;  %v1540_v60 = vadd.f32 %v6076_v42, %v4482_v29 }
 0x559   :  { %v1535_v63 = vadd.f32 %v6076_v42, %v1534_v30 }
 0x561   :  { %v4485_v33 = vpop.f32.mrb[18].mxu1 }
 0x562   :  { %v1544_v38 = vpop.f32.mrb[19].mxu1 }
 0x575   :  { %v1764_v31 = vpop.f32.mrb[20].mxu1 }
 0x576   :  { %v1787_v35 = vadd.f32 %v1764_v31, %v5700_v54  ;;  %v1766_v9 = vpop.f32.mrb[21].mxu1  ;;  %v1545_v31 = vadd.f32 %v6076_v42, %v1544_v38 }
 0x577   :  { %v1788_v37 = vadd.f32 %v1766_v9, %v5702_v55 }
 0x578   :  { %v4163_v41 = vmul.f32 -1.442695, %v1787_v35 }
 0x579   :  { %v4164_v49 = vmul.f32 -1.442695, %v1788_v37  ;;  %v1770_v51 = vpop.f32.mrb[22].mxu1 }
 0x57a   :  { %5150 = vpow2.f32 %v4163_v41  ;;  %v1789_v14 = vadd.f32 %v1770_v51, %v5700_v54  ;;  %v1772_v56 = vpop.f32.mrb[23].mxu1 }
 0x57b   :  { %5152 = vpow2.f32 %v4164_v49  ;;  %v1790_v1 = vadd.f32 %v1772_v56, %v5702_v55 }
 0x57c   :  { %v4165_v59 = vmul.f32 -1.442695, %v1789_v14  ;;  %5154 = vtanh.f32 %v1535_v63 }
 0x57d   :  { %v4166_v4 = vmul.f32 -1.442695, %v1790_v1  ;;  %v1776_v10 = vpop.f32.mrb[24].mxu1  ;;  %v1550_v1 = vadd.f32 %v6076_v42, %v4485_v33 }
 0x57e   :  { %5156 = vpow2.f32 %v4165_v59  ;;  %v1791_v15 = vadd.f32 %v1776_v10, %v5700_v54  ;;  %v1778_v24 = vpop.f32.mrb[25].mxu1  ;;  %v1563_v10 = vpop.permute.xlu0 %1562 }
 0x57f   :  { %5158 = vpow2.f32 %v4166_v4  ;;  %v1792_v27 = vadd.f32 %v1778_v24, %v5702_v55 }
 0x580   :  { %v4167_v30 = vmul.f32 -1.442695, %v1791_v15  ;;  %5160 = vtanh.f32 %v1540_v60 }
 0x581   :  { %v4168_v35 = vmul.f32 -1.442695, %v1792_v27  ;;  %v1782_v9 = vpop.f32.mrb[26].mxu1 }
 0x582   :  { %5162 = vpow2.f32 %v4167_v30  ;;  %v1793_v37 = vadd.f32 %v1782_v9, %v5700_v54  ;;  %v1784_v29 = vpop.f32.mrb[27].mxu1  ;;  %v1567_v9 = vpop.permute.xlu1 %1566 }
 0x583   :  { %5164 = vpow2.f32 %v4168_v35  ;;  %v1794_v41 = vadd.f32 %v1784_v29, %v5702_v55 }
 0x584   :  { %v5151_v63 = vpop.eup %5150  ;;  %v4169_v49 = vmul.f32 -1.442695, %v1793_v37  ;;  %5166 = vtanh.f32 %v1545_v31 }
 0x585   :  { %v5153_v51 = vpop.eup %5152  ;;  %v1819_v14 = vadd.f32 1.0, %v5151_v63  ;;  %v4170_v56 = vmul.f32 -1.442695, %v1794_v41 }
 0x586   :  { %v1820_v59 = vadd.f32 1.0, %v5153_v51  ;;  %5168 = vpow2.f32 %v4169_v49  ;;  %v5155_v38 = vpop.eup %5154 }
 0x587   :  { %5170 = vrcp.f32 %v1819_v14  ;;  %v1557_v31 = vsub.f32 %v5979_v50, %v5155_v38  ;;  %v1577_v35 = vmul.f32 %v5155_v38, %v1563_v10 }
 0x588   :  { %v5157_v60 = vpop.eup %5156  ;;  %5172 = vrcp.f32 %v1820_v59 }
 0x589   :  { %v5159_v4 = vpop.eup %5158  ;;  %v1821_v15 = vadd.f32 1.0, %v5157_v60  ;;  %5174 = vpow2.f32 %v4170_v56  ;;  %v1581_v14 = vadd.f32 %v1577_v35, %v1557_v31 }
 0x58a   :  { %5176 = vtanh.f32 %v1550_v1  ;;  %v1822_v24 = vadd.f32 1.0, %v5159_v4  ;;  %v5161_v27 = vpop.eup %5160  ;;  %v1571_v1 = vpop.permute.xlu1 %1570 }
 0x58b   :  { %5178 = vrcp.f32 %v1821_v15  ;;  %v1558_v49 = vsub.f32 %v5983_v52, %v5161_v27  ;;  %v1578_v51 = vmul.f32 %v5161_v27, %v1567_v9  ;;  %v1575_v27 = vpop.permute.xlu0 %1574 }
 0x58c   :  { %v5163_v30 = vpop.eup %5162  ;;  %5180 = vrcp.f32 %v1822_v24 }
 0x58d   :  { %v5165_v33 = vpop.eup %5164  ;;  %v1823_v37 = vadd.f32 1.0, %v5163_v30  ;;  %v1582_v15 = vadd.f32 %v1578_v51, %v1558_v49 }
 0x58e   :  { %v1824_v29 = vadd.f32 1.0, %v5165_v33  ;;  %v5167_v41 = vpop.eup %5166 }
 0x58f   :  { %5182 = vrcp.f32 %v1823_v37  ;;  %v1559_v24 = vsub.f32 %v5993_v58, %v5167_v41  ;;  %v1579_v30 = vmul.f32 %v5167_v41, %v1571_v1 }
 0x590   :  { %v5169_v63 = vpop.eup %5168  ;;  %5184 = vrcp.f32 %v1824_v29 }
 0x591   :  { %v5171_v56 = vpop.eup %5170  ;;  %v1825_v59 = vadd.f32 1.0, %v5169_v63  ;;  %v1583_v63 = vadd.f32 %v1579_v30, %v1559_v24 }
 0x592   :  { %v6090_v60 = vpop.eup %5172  ;;  %v1843_v50 = vmul.f32 %v5171_v56, %v1581_v14 }
 0x593   :  { %v5175_v38 = vpop.eup %5174  ;;  %5186 = vrcp.f32 %v1825_v59  ;;  %v1847_v4 = vmul.f32 %v6090_v60, %v5171_v56 }
 0x594   :  { %v5177_v10 = vpop.eup %5176  ;;  %v1826_v33 = vadd.f32 1.0, %v5175_v38 }
 0x595   :  { %v5179_v52 = vpop.eup %5178  ;;  %1855 = vrot.lane.b32.xlu1 %v1847_v4, %s5405_s25  ;;  %v1560_v37 = vsub.f32 %v5998_v46, %v5177_v10  ;;  %v1580_v29 = vmul.f32 %v5177_v10, %v1575_v27  ;;  %v6890_v46 = vmov 4   ;;  %v4171_v27 = vld [vmem:[%s6876_s0 + $0x80] sm:$0xff] }
 0x596   :  { %v6095_v31 = vpop.eup %5180  ;;  %5188 = vrcp.f32 %v1826_v33  ;;  %v1844_v35 = vmul.f32 %v5179_v52, %v1582_v15  ;;  %4980 = vset.pattern.permute.xlu0 %v6890_v46  ;;  %4979 = vset.pattern.permute.xlu1 %v6890_v46 }
 0x597   :  { %v1848_v9 = vmul.f32 %v6095_v31, %v5179_v52  ;;  %v1584_v51 = vadd.f32 %v1580_v29, %v1560_v37  ;;  %v4174_v37 = vld [vmem:[%s6876_s0 + $0x98] sm:$0xff] }
 0x599   :  { %v5183_v14 = vpop.eup %5182  ;;  %1857 = vrot.lane.b32.xlu0 %v1848_v9, %s5405_s25  ;;  %v4173_v9 = vld [vmem:[%s6876_s0 + $0x90] sm:$0xff] }
 0x59a   :  { %v6100_v58 = vpop.eup %5184  ;;  %v1845_v41 = vmul.f32 %v5183_v14, %v1583_v63 }
 0x59b   :  { %v1849_v49 = vmul.f32 %v6100_v58, %v5183_v14 }
 0x59d   :  { %v5187_v56 = vpop.eup %5186  ;;  %1859 = vrot.lane.b32.xlu1 %v1849_v49, %s5405_s25 }
 0x59e   :  { %v1846_v1 = vmul.f32 %v5187_v56, %v1584_v51 }
 0x5a0   :  { %v6104_v59 = vpop.eup %5188 }
 0x5a1   :  { %v1850_v38 = vmul.f32 %v6104_v59, %v5187_v56  ;;  %2018 = vperm.xlu1 %4979, %v5964_v0  }
 0x5a3   :  { %1861 = vrot.lane.b32.xlu0 %v1850_v38, %s5405_s25 }
 0x5a5   :  { %2026 = vperm.xlu1 %4979, %v5976_v48  }
 0x5a7   :  { %2022 = vperm.xlu0 %4980, %v5958_v5  }
 0x5a9   :  { %2030 = vperm.xlu1 %4979, %v5970_v43  }
 0x607   :  { %v1856_v4 = vpop.permute.xlu1 %1855 }
 0x608   :  { %v6114_v10 = vadd.f32 %v1856_v4, %v1843_v50 }
 0x60a   :  { %4502 = vmatprep.mubr.msk.f32.mxu0 %vm103_vm1, %v6114_v10  ;;  %5190 = vtanh.f32 %v6114_v10 }
 0x60b   :  { %v1858_v15 = vpop.permute.xlu0 %1857 }
 0x60c   :  { %v6118_v24 = vadd.f32 %v1858_v15, %v1844_v35  ;;  %v4172_v35 = vld [vmem:[%s6876_s0 + $0x88] sm:$0xff] }
 0x60e   :  { %4503 = vmatmul.mubr.msk.f32.vlgmr.msra.gmra.mrb[20].mxu0 %vm103_vm1, %v6118_v24  ;;  %5192 = vtanh.f32 %v6118_v24 }
 0x60f   :  { %v1860_v30 = vpop.permute.xlu1 %1859  ;;  %2054 = vmatpush1.msra.mxu0 %v5990_v28 }
 0x610   :  { %v6123_v33 = vadd.f32 %v1860_v30, %v1845_v41  ;;  %4757 = vmatprep.subr.bf16.mxu0 %v5516_v8 }
 0x612   :  { %4505 = vmatprep.mubr.msk.f32.mxu0 %vm103_vm1, %v6123_v33  ;;  %5194 = vtanh.f32 %v6123_v33 }
 0x614   :  { %v5191_v29 = vpop.eup %5190 }
 0x615   :  { %v1862_v50 = vpop.permute.xlu0 %1861  ;;  %v6165_v63 = vmul.f32 %v5191_v29, %v6090_v60 }
 0x616   :  { %v6128_v52 = vadd.f32 %v1862_v50, %v1846_v1 }
 0x618   :  { %4506 = vmatmul.mubr.msk.f32.gmra.mrb[22].mxu0 %vm103_vm1, %v6128_v52  ;;  %5196 = vtanh.f32 %v6128_v52  ;;  %v5193_v14 = vpop.eup %5192 }
 0x619   :  { %2117 = vmatprep.mubr.f32.mxu0 %v6900_v2  ;;  %v6173_v41 = vmul.f32 %v5193_v14, %v6095_v31 }
 0x61c   :  { %4179 = vmatmul.mubr.msk.f32.vlgmr.msra.gmra.mrb[24].mxu0 %vm228_vm0, %v4171_v27  ;;  %v5195_v49 = vpop.eup %5194 }
 0x61d   :  { %4759 = vmatpush1.bf16.msra.mxu0 %v5526_v11  ;;  %2123 = vmatprep.mubr.f32.mxu0 %v6900_v2  ;;  %v6181_v60 = vmul.f32 %v5195_v49, %v6100_v58 }
 0x61e   :  { %4761 = vmatprep.subr.bf16.mxu0 %v5542_v16 }
 0x620   :  { %4180 = vmatmul.mubr.msk.f32.gmra.mrb[26].mxu0 %vm228_vm0, %v4172_v35 }
 0x621   :  { %4763 = vmatpush1.bf16.msra.mxu0 %v5551_v19  ;;  %2129 = vmatprep.mubr.f32.mxu0 %v6900_v2 }
 0x622   :  { %4765 = vmatprep.subr.bf16.mxu0 %v5557_v21  ;;  %v5197_v51 = vpop.eup %5196 }
 0x623   :  { %v6189_v31 = vmul.f32 %v5197_v51, %v6104_v59 }
 0x624   :  { %4181 = vmatmul.mubr.msk.f32.gmra.mrb[28].mxu0 %vm228_vm0, %v4173_v9 }
 0x625   :  { %4767 = vmatpush1.bf16.msra.mxu0 %v5591_v32  ;;  %2135 = vmatprep.mubr.f32.mxu0 %v6900_v2 }
 0x626   :  { %4769 = vmatprep.subr.bf16.mxu0 %v5604_v36 }
 0x628   :  { %4182 = vmatmul.mubr.msk.f32.gmra.mrb[30].mxu0 %vm228_vm0, %v4174_v37 }
 0x629   :  { %4771 = vmatpush1.bf16.msra.mxu0 %v5635_v44  ;;  %2218 = vmatprep.mubr.f32.mxu0 %v6900_v2 }
 0x62a   :  { %4805 = vmatprep.subr.bf16.mxu0 %v5572_v26 }
 0x62c   :  { %4183 = vmatmul.mubr.msk.f32.vlgmr.msra.gmra.mrb[24].mxu0 %vm103_vm1, %v6165_v63 }
 0x62d   :  { %2224 = vmatprep.mubr.f32.mxu0 %v6900_v2  ;;  %4807 = vmatpush3.bf16.msra.mxu0 %v5572_v26 }
 0x62e   :  { %4809 = vmatprep.subr.bf16.mxu0 %v5597_v34 }
 0x630   :  { %4184 = vmatmul.mubr.msk.f32.gmra.mrb[26].mxu0 %vm103_vm1, %v6173_v41 }
 0x631   :  { %2230 = vmatprep.mubr.f32.mxu0 %v6900_v2  ;;  %4811 = vmatpush3.bf16.msra.mxu0 %v5597_v34 }
 0x632   :  { %4813 = vmatprep.subr.bf16.mxu0 %v5621_v40 }
 0x634   :  { %4185 = vmatmul.mubr.msk.f32.gmra.mrb[28].mxu0 %vm103_vm1, %v6181_v60 }
 0x635   :  { %2236 = vmatprep.mubr.f32.mxu0 %v6900_v2  ;;  %4815 = vmatpush3.bf16.msra.mxu0 %v5621_v40 }
 0x636   :  { %4817 = vmatprep.subr.bf16.mxu0 %v5652_v47 }
 0x638   :  { %4186 = vmatmul.mubr.msk.f32.gmra.mrb[30].mxu0 %vm103_vm1, %v6189_v31 }
 0x639   :  { %4819 = vmatpush3.bf16.msra.mxu0 %v5652_v47 }
 0x63a   :  { %2965 = vmatprep.subr.mxu0 %v6068_v25 }
 0x6e1   :  { %v4504_v58 = vpop.f32.mrb[20].mxu0 }
 0x6e2   :  { %v1990_v56 = vpop.f32.mrb[21].mxu0  ;;  %v1996_v51 = vadd.f32 %v6076_v42, %v4504_v58 }
 0x6e3   :  { %v1991_v27 = vadd.f32 %v6076_v42, %v1990_v56 }
 0x6eb   :  { %v4507_v1 = vpop.f32.mrb[22].mxu0 }
 0x6ec   :  { %v2000_v38 = vpop.f32.mrb[23].mxu0 }
 0x6ff   :  { %v2220_v4 = vpop.f32.mrb[24].mxu0 }
 0x700   :  { %v2243_v15 = vadd.f32 %v2220_v4, %v5700_v54  ;;  %v2222_v30 = vpop.f32.mrb[25].mxu0 }
 0x701   :  { %v2244_v59 = vadd.f32 %v2222_v30, %v5702_v55 }
 0x702   :  { %v4187_v50 = vmul.f32 -1.442695, %v2243_v15 }
 0x703   :  { %v4188_v35 = vmul.f32 -1.442695, %v2244_v59  ;;  %v2226_v9 = vpop.f32.mrb[26].mxu0 }
 0x704   :  { %5198 = vpow2.f32 %v4187_v50  ;;  %v2245_v37 = vadd.f32 %v2226_v9, %v5700_v54  ;;  %v2228_v29 = vpop.f32.mrb[27].mxu0  ;;  %v2001_v50 = vadd.f32 %v6076_v42, %v2000_v38 }
 0x705   :  { %5200 = vpow2.f32 %v4188_v35  ;;  %v2246_v14 = vadd.f32 %v2228_v29, %v5702_v55 }
 0x706   :  { %v4189_v49 = vmul.f32 -1.442695, %v2245_v37  ;;  %5202 = vtanh.f32 %v1991_v27 }
 0x707   :  { %v4190_v4 = vmul.f32 -1.442695, %v2246_v14  ;;  %v2232_v46 = vpop.f32.mrb[28].mxu0 }
 0x708   :  { %5204 = vpow2.f32 %v4189_v49  ;;  %v2247_v15 = vadd.f32 %v2232_v46, %v5700_v54  ;;  %v2234_v30 = vpop.f32.mrb[29].mxu0 }
 0x709   :  { %5206 = vpow2.f32 %v4190_v4  ;;  %v2248_v56 = vadd.f32 %v2234_v30, %v5702_v55 }
 0x70a   :  { %v4191_v59 = vmul.f32 -1.442695, %v2247_v15  ;;  %5208 = vtanh.f32 %v1996_v51  ;;  %v2006_v15 = vadd.f32 %v6076_v42, %v4507_v1 }
 0x70b   :  { %v4192_v35 = vmul.f32 -1.442695, %v2248_v56  ;;  %v2238_v9 = vpop.f32.mrb[30].mxu0 }
 0x70c   :  { %5210 = vpow2.f32 %v4191_v59  ;;  %v2249_v37 = vadd.f32 %v2238_v9, %v5700_v54  ;;  %v2240_v58 = vpop.f32.mrb[31].mxu0  ;;  %v2019_v59 = vpop.permute.xlu1 %2018 }
 0x70d   :  { %5212 = vpow2.f32 %v4192_v35  ;;  %v2250_v27 = vadd.f32 %v2240_v58, %v5702_v55 }
 0x70e   :  { %v5199_v29 = vpop.eup %5198  ;;  %v4193_v14 = vmul.f32 -1.442695, %v2249_v37  ;;  %5214 = vtanh.f32 %v2001_v50 }
 0x70f   :  { %v5201_v46 = vpop.eup %5200  ;;  %v2275_v49 = vadd.f32 1.0, %v5199_v29  ;;  %v4194_v4 = vmul.f32 -1.442695, %v2250_v27  ;;  %v2023_v29 = vpop.permute.xlu0 %2022 }
 0x710   :  { %v2276_v51 = vadd.f32 1.0, %v5201_v46  ;;  %5216 = vpow2.f32 %v4193_v14  ;;  %v5203_v38 = vpop.eup %5202  ;;  %v2027_v45 = vpop.permute.xlu1 %2026 }
 0x711   :  { %5218 = vrcp.f32 %v2275_v49  ;;  %v2013_v50 = vsub.f32 %v6114_v10, %v5203_v38  ;;  %v2033_v27 = vmul.f32 %v5203_v38, %v2019_v59 }
 0x712   :  { %v5205_v30 = vpop.eup %5204  ;;  %5220 = vrcp.f32 %v2276_v51 }
 0x713   :  { %v5207_v56 = vpop.eup %5206  ;;  %v2277_v9 = vadd.f32 1.0, %v5205_v30  ;;  %5222 = vpow2.f32 %v4194_v4 }
 0x714   :  { %5224 = vtanh.f32 %v2006_v15  ;;  %v2278_v35 = vadd.f32 1.0, %v5207_v56  ;;  %v5209_v58 = vpop.eup %5208  ;;  %v2037_v15 = vadd.f32 %v2033_v27, %v2013_v50 }
 0x715   :  { %5226 = vrcp.f32 %v2277_v9  ;;  %v2014_v30 = vsub.f32 %v6118_v24, %v5209_v58  ;;  %v2034_v4 = vmul.f32 %v5209_v58, %v2023_v29  ;;  %v2031_v24 = vpop.permute.xlu1 %2030 }
 0x716   :  { %v5211_v37 = vpop.eup %5210  ;;  %5228 = vrcp.f32 %v2278_v35 }
 0x717   :  { %v5213_v1 = vpop.eup %5212  ;;  %v2279_v14 = vadd.f32 1.0, %v5211_v37  ;;  %v2038_v37 = vadd.f32 %v2034_v4, %v2014_v30 }
 0x718   :  { %v2280_v46 = vadd.f32 1.0, %v5213_v1  ;;  %v5215_v49 = vpop.eup %5214 }
 0x719   :  { %5230 = vrcp.f32 %v2279_v14  ;;  %v2015_v1 = vsub.f32 %v6123_v33, %v5215_v49  ;;  %v2035_v14 = vmul.f32 %v5215_v49, %v2027_v45 }
 0x71a   :  { %v5217_v51 = vpop.eup %5216  ;;  %5232 = vrcp.f32 %v2280_v46 }
 0x71b   :  { %v5219_v56 = vpop.eup %5218  ;;  %v2281_v9 = vadd.f32 1.0, %v5217_v51  ;;  %v2039_v29 = vadd.f32 %v2035_v14, %v2015_v1  ;;  %v4198_v1 = vld [vmem:[%s6876_s0 + $0xb8] sm:$0xff] }
 0x71c   :  { %v6210_v53 = vpop.eup %5220  ;;  %v2299_v10 = vmul.f32 %v5219_v56, %v2037_v15 }
 0x71d   :  { %v5223_v38 = vpop.eup %5222  ;;  %5234 = vrcp.f32 %v2281_v9  ;;  %v2303_v59 = vmul.f32 %v6210_v53, %v5219_v56 }
 0x71e   :  { %v5225_v35 = vpop.eup %5224  ;;  %v2282_v61 = vadd.f32 1.0, %v5223_v38 }
 0x71f   :  { %v5227_v7 = vpop.eup %5226  ;;  %2311 = vrot.lane.b32.xlu0 %v2303_v59, %s5405_s25  ;;  %v2016_v46 = vsub.f32 %v6128_v52, %v5225_v35  ;;  %v2036_v51 = vmul.f32 %v5225_v35, %v2031_v24  ;;  %v6904_v52 = vmov 5  }
 0x720   :  { %v6215_v58 = vpop.eup %5228  ;;  %5236 = vrcp.f32 %v2282_v61  ;;  %v2300_v50 = vmul.f32 %v5227_v7, %v2038_v37  ;;  %4982 = vset.pattern.permute.xlu1 %v6904_v52  ;;  %4981 = vset.pattern.permute.xlu0 %v6904_v52 }
 0x721   :  { %v2304_v27 = vmul.f32 %v6215_v58, %v5227_v7  ;;  %v2040_v30 = vadd.f32 %v2036_v51, %v2016_v46 }
 0x723   :  { %v5231_v15 = vpop.eup %5230  ;;  %2313 = vrot.lane.b32.xlu1 %v2304_v27, %s5405_s25 }
 0x724   :  { %v6220_v33 = vpop.eup %5232  ;;  %v2301_v45 = vmul.f32 %v5231_v15, %v2039_v29 }
 0x725   :  { %v2305_v49 = vmul.f32 %v6220_v33, %v5231_v15 }
 0x727   :  { %v5235_v4 = vpop.eup %5234  ;;  %2315 = vrot.lane.b32.xlu0 %v2305_v49, %s5405_s25 }
 0x728   :  { %v2302_v61 = vmul.f32 %v5235_v4, %v2040_v30 }
 0x72a   :  { %v6224_v56 = vpop.eup %5236 }
 0x72b   :  { %v2306_v7 = vmul.f32 %v6224_v56, %v5235_v4  ;;  %2474 = vperm.xlu0 %4981, %v5964_v0  }
 0x72d   :  { %2317 = vrot.lane.b32.xlu1 %v2306_v7, %s5405_s25 }
 0x72f   :  { %2486 = vperm.xlu0 %4981, %v5970_v43  }
 0x731   :  { %2478 = vperm.xlu1 %4982, %v5958_v5  }
 0x735   :  { %2482 = vperm.xlu1 %4982, %v5976_v48   ;;  %v4195_v48 = vld [vmem:[%s6876_s0 + $0xa0] sm:$0xff] }
 0x791   :  { %v2312_v9 = vpop.permute.xlu0 %2311 }
 0x792   :  { %v6234_v38 = vadd.f32 %v2312_v9, %v2299_v10  ;;  %v4197_v10 = vld [vmem:[%s6876_s0 + $0xb0] sm:$0xff] }
 0x794   :  { %4524 = vmatprep.mubr.msk.f32.mxu1 %vm103_vm1, %v6234_v38  ;;  %5238 = vtanh.f32 %v6234_v38 }
 0x795   :  { %v2314_v59 = vpop.permute.xlu1 %2313 }
 0x796   :  { %v6238_v35 = vadd.f32 %v2314_v59, %v2300_v50 }
 0x798   :  { %4525 = vmatmul.mubr.msk.f32.vlgmr.msra.gmra.mrb[28].mxu1 %vm103_vm1, %v6238_v35  ;;  %5240 = vtanh.f32 %v6238_v35 }
 0x799   :  { %v2316_v37 = vpop.permute.xlu0 %2315  ;;  %2510 = vmatpush1.msra.mxu1 %v5990_v28  ;;  %v4196_v28 = vld [vmem:[%s6876_s0 + $0xa8] sm:$0xff] }
 0x79a   :  { %v6243_v5 = vadd.f32 %v2316_v37, %v2301_v45  ;;  %4789 = vmatprep.subr.bf16.mxu1 %v5516_v8 }
 0x79c   :  { %4527 = vmatprep.mubr.msk.f32.mxu1 %vm103_vm1, %v6243_v5  ;;  %5242 = vtanh.f32 %v6243_v5 }
 0x79e   :  { %v5239_v14 = vpop.eup %5238 }
 0x79f   :  { %v2318_v0 = vpop.permute.xlu1 %2317  ;;  %v6285_v24 = vmul.f32 %v5239_v14, %v6210_v53 }
 0x7a0   :  { %v6248_v43 = vadd.f32 %v2318_v0, %v2302_v61 }
 0x7a2   :  { %4528 = vmatmul.mubr.msk.f32.gmra.mrb[30].mxu1 %vm103_vm1, %v6248_v43  ;;  %5244 = vtanh.f32 %v6248_v43  ;;  %v5241_v50 = vpop.eup %5240 }
 0x7a3   :  { %2573 = vmatprep.mubr.f32.mxu1 %v6900_v2  ;;  %v6293_v27 = vmul.f32 %v5241_v50, %v6215_v58 }
 0x7a6   :  { %4203 = vmatmul.mubr.msk.f32.vlgmr.msra.gmra.mrb[32].mxu1 %vm228_vm0, %v4195_v48  ;;  %v5243_v29 = vpop.eup %5242 }
 0x7a7   :  { %4791 = vmatpush1.bf16.msra.mxu1 %v5526_v11  ;;  %2579 = vmatprep.mubr.f32.mxu1 %v6900_v2  ;;  %v6301_v53 = vmul.f32 %v5243_v29, %v6220_v33 }
 0x7a8   :  { %4793 = vmatprep.subr.bf16.mxu1 %v5542_v16 }
 0x7aa   :  { %4204 = vmatmul.mubr.msk.f32.gmra.mrb[34].mxu1 %vm228_vm0, %v4196_v28 }
 0x7ab   :  { %4795 = vmatpush1.bf16.msra.mxu1 %v5551_v19  ;;  %2585 = vmatprep.mubr.f32.mxu1 %v6900_v2 }
 0x7ac   :  { %4797 = vmatprep.subr.bf16.mxu1 %v5557_v21  ;;  %v5245_v46 = vpop.eup %5244 }
 0x7ae   :  { %4205 = vmatmul.mubr.msk.f32.gmra.mrb[36].mxu1 %vm228_vm0, %v4197_v10 }
 0x7af   :  { %4799 = vmatpush1.bf16.msra.mxu1 %v5591_v32  ;;  %2591 = vmatprep.mubr.f32.mxu1 %v6900_v2 }
 0x7b0   :  { %4801 = vmatprep.subr.bf16.mxu1 %v5604_v36 }
 0x7b2   :  { %4206 = vmatmul.mubr.msk.f32.gmra.mrb[38].mxu1 %vm228_vm0, %v4198_v1 }
 0x7b3   :  { %4803 = vmatpush1.bf16.msra.mxu1 %v5635_v44  ;;  %2674 = vmatprep.mubr.f32.mxu1 %v6900_v2 }
 0x7b4   :  { %4837 = vmatprep.subr.bf16.mxu1 %v5572_v26 }
 0x7b6   :  { %4207 = vmatmul.mubr.msk.f32.vlgmr.msra.gmra.mrb[32].mxu1 %vm103_vm1, %v6285_v24 }
 0x7b7   :  { %2680 = vmatprep.mubr.f32.mxu1 %v6900_v2  ;;  %4839 = vmatpush3.bf16.msra.mxu1 %v5572_v26  ;;  %v6309_v26 = vmul.f32 %v5245_v46, %v6224_v56 }
 0x7b8   :  { %4841 = vmatprep.subr.bf16.mxu1 %v5597_v34 }
 0x7b9   :  { %6916 = vst [vmem:[#allocation2_spill] sm:$0xff] %v6309_v26 }
 0x7ba   :  { %4208 = vmatmul.mubr.msk.f32.gmra.mrb[34].mxu1 %vm103_vm1, %v6293_v27 }
 0x7bb   :  { %2686 = vmatprep.mubr.f32.mxu1 %v6900_v2  ;;  %4843 = vmatpush3.bf16.msra.mxu1 %v5597_v34 }
 0x7bc   :  { %4845 = vmatprep.subr.bf16.mxu1 %v5621_v40 }
 0x7be   :  { %4209 = vmatmul.mubr.msk.f32.gmra.mrb[36].mxu1 %vm103_vm1, %v6301_v53 }
 0x7bf   :  { %2692 = vmatprep.mubr.f32.mxu1 %v6900_v2  ;;  %4847 = vmatpush3.bf16.msra.mxu1 %v5621_v40 }
 0x7c0   :  { %4849 = vmatprep.subr.bf16.mxu1 %v5652_v47 }
 0x7c2   :  { %4210 = vmatmul.mubr.msk.f32.gmra.mrb[38].mxu1 %vm103_vm1, %v6309_v26 }
 0x7c3   :  { %4851 = vmatpush3.bf16.msra.mxu1 %v5652_v47 }
 0x7c4   :  { %3421 = vmatprep.subr.mxu1 %v6068_v25 }
 0x86b   :  { %v4526_v34 = vpop.f32.mrb[28].mxu1 }
 0x86c   :  { %v2446_v58 = vpop.f32.mrb[29].mxu1  ;;  %v2452_v59 = vadd.f32 %v6076_v42, %v4526_v34 }
 0x86d   :  { %v2447_v4 = vadd.f32 %v6076_v42, %v2446_v58 }
 0x875   :  { %v4529_v51 = vpop.f32.mrb[30].mxu1 }
 0x876   :  { %v2456_v15 = vpop.f32.mrb[31].mxu1 }
 0x877   :  { %v2457_v14 = vadd.f32 %v6076_v42, %v2456_v15 }
 0x889   :  { %v2676_v33 = vpop.f32.mrb[32].mxu1 }
 0x88a   :  { %v2699_v45 = vadd.f32 %v2676_v33, %v5700_v54  ;;  %v2678_v40 = vpop.f32.mrb[33].mxu1 }
 0x88b   :  { %v2700_v49 = vadd.f32 %v2678_v40, %v5702_v55 }
 0x88c   :  { %v4211_v30 = vmul.f32 -1.442695, %v2699_v45 }
 0x88d   :  { %v4212_v61 = vmul.f32 -1.442695, %v2700_v49  ;;  %v2682_v56 = vpop.f32.mrb[34].mxu1 }
 0x88e   :  { %5246 = vpow2.f32 %v4211_v30  ;;  %v2701_v47 = vadd.f32 %v2682_v56, %v5700_v54  ;;  %v2684_v7 = vpop.f32.mrb[35].mxu1 }
 0x88f   :  { %5248 = vpow2.f32 %v4212_v61  ;;  %v2702_v25 = vadd.f32 %v2684_v7, %v5702_v55  ;;  %v2475_v7 = vpop.permute.xlu0 %2474 }
 0x890   :  { %v4213_v9 = vmul.f32 -1.442695, %v2701_v47  ;;  %5250 = vtanh.f32 %v2447_v4  ;;  %v2462_v4 = vadd.f32 %v6076_v42, %v4529_v51  ;;  %v2479_v51 = vpop.permute.xlu1 %2478 }
 0x891   :  { %v4214_v37 = vmul.f32 -1.442695, %v2702_v25  ;;  %v2688_v0 = vpop.f32.mrb[36].mxu1 }
 0x892   :  { %5252 = vpow2.f32 %v4213_v9  ;;  %v2703_v48 = vadd.f32 %v2688_v0, %v5700_v54  ;;  %v2690_v28 = vpop.f32.mrb[37].mxu1 }
 0x893   :  { %5254 = vpow2.f32 %v4214_v37  ;;  %v2704_v10 = vadd.f32 %v2690_v28, %v5702_v55 }
 0x894   :  { %v4215_v1 = vmul.f32 -1.442695, %v2703_v48  ;;  %5256 = vtanh.f32 %v2452_v59 }
 0x895   :  { %v4216_v50 = vmul.f32 -1.442695, %v2704_v10  ;;  %v2694_v29 = vpop.f32.mrb[38].mxu1 }
 0x896   :  { %5258 = vpow2.f32 %v4215_v1  ;;  %v2705_v46 = vadd.f32 %v2694_v29, %v5700_v54  ;;  %v2696_v34 = vpop.f32.mrb[39].mxu1 }
 0x897   :  { %5260 = vpow2.f32 %v4216_v50  ;;  %v2706_v58 = vadd.f32 %v2696_v34, %v5702_v55 }
 0x898   :  { %v5247_v33 = vpop.eup %5246  ;;  %v4217_v45 = vmul.f32 -1.442695, %v2705_v46  ;;  %5262 = vtanh.f32 %v2457_v14 }
 0x899   :  { %v5249_v40 = vpop.eup %5248  ;;  %v2731_v49 = vadd.f32 1.0, %v5247_v33  ;;  %v4218_v30 = vmul.f32 -1.442695, %v2706_v58  ;;  %v2483_v58 = vpop.permute.xlu1 %2482 }
 0x89a   :  { %v2732_v61 = vadd.f32 1.0, %v5249_v40  ;;  %5264 = vpow2.f32 %v4217_v45  ;;  %v5251_v15 = vpop.eup %5250 }
 0x89b   :  { %5266 = vrcp.f32 %v2731_v49  ;;  %v2469_v0 = vsub.f32 %v6234_v38, %v5251_v15  ;;  %v2489_v48 = vmul.f32 %v5251_v15, %v2475_v7 }
 0x89c   :  { %v5253_v56 = vpop.eup %5252  ;;  %5268 = vrcp.f32 %v2732_v61 }
 0x89d   :  { %v5255_v47 = vpop.eup %5254  ;;  %v2733_v25 = vadd.f32 1.0, %v5253_v56  ;;  %5270 = vpow2.f32 %v4218_v30  ;;  %v2493_v46 = vadd.f32 %v2489_v48, %v2469_v0 }
 0x89e   :  { %5272 = vtanh.f32 %v2462_v4  ;;  %v2734_v9 = vadd.f32 1.0, %v5255_v47  ;;  %v5257_v59 = vpop.eup %5256  ;;  %v2487_v47 = vpop.permute.xlu0 %2486 }
 0x89f   :  { %5274 = vrcp.f32 %v2733_v25  ;;  %v2470_v50 = vsub.f32 %v6238_v35, %v5257_v59  ;;  %v2490_v29 = vmul.f32 %v5257_v59, %v2479_v51 }
 0x8a0   :  { %v5259_v37 = vpop.eup %5258  ;;  %5276 = vrcp.f32 %v2734_v9 }
 0x8a1   :  { %v5261_v42 = vpop.eup %5260  ;;  %v2735_v28 = vadd.f32 1.0, %v5259_v37  ;;  %v2494_v4 = vadd.f32 %v2490_v29, %v2470_v50  ;;  %v6353_v29 = vld [vmem:[%s6879_s1] sm:$0xff] }
 0x8a2   :  { %v2736_v10 = vadd.f32 1.0, %v5261_v42  ;;  %v5263_v1 = vpop.eup %5262 }
 0x8a3   :  { %5278 = vrcp.f32 %v2735_v28  ;;  %v2471_v61 = vsub.f32 %v6243_v5, %v5263_v1  ;;  %v2491_v15 = vmul.f32 %v5263_v1, %v2483_v58  ;;  %v6917_v58 = vmov 0  }
 0x8a4   :  { %v5265_v14 = vpop.eup %5264  ;;  %5280 = vrcp.f32 %v2736_v10 }
 0x8a5   :  { %v5267_v34 = vpop.eup %5266  ;;  %v2737_v33 = vadd.f32 1.0, %v5265_v14  ;;  %v2495_v0 = vadd.f32 %v2491_v15, %v2471_v61  ;;  %v6387_v15 = vld [vmem:[%s6875_s7] sm:$0xff] }
 0x8a6   :  { %v6330_v45 = vpop.eup %5268  ;;  %v2755_v38 = vmul.f32 %v5267_v34, %v2493_v46  ;;  %v6359_v46 = vld [vmem:[%s6879_s1 + $0x8] sm:$0xff] }
 0x8a7   :  { %v5271_v40 = vpop.eup %5270  ;;  %5282 = vrcp.f32 %v2737_v33  ;;  %v2759_v49 = vmul.f32 %v6330_v45, %v5267_v34  ;;  %v6365_v34 = vld [vmem:[%s6879_s1 + $0x10] sm:$0xff]  ;;  %v6372_v33 = vld [vmem:[%s6879_s1 + $0x18] sm:$0xff] }
 0x8a8   :  { %v5273_v30 = vpop.eup %5272  ;;  %v2738_v56 = vadd.f32 1.0, %v5271_v40 }
 0x8a9   :  { %v5275_v35 = vpop.eup %5274  ;;  %2767 = vrot.lane.b32.xlu1 %v2759_v49, %s5405_s25  ;;  %v2472_v59 = vsub.f32 %v6248_v43, %v5273_v30  ;;  %v2492_v37 = vmul.f32 %v5273_v30, %v2487_v47  ;;  %v6902_v43 = vmov 6   ;;  %v4219_v47 = vld [vmem:[%s6876_s0 + $0xc0] sm:$0xff] }
 0x8aa   :  { %v6335_v7 = vpop.eup %5276  ;;  %5284 = vrcp.f32 %v2738_v56  ;;  %v2756_v25 = vmul.f32 %v5275_v35, %v2494_v4  ;;  %4984 = vset.pattern.permute.xlu0 %v6902_v43  ;;  %4983 = vset.pattern.permute.xlu1 %v6902_v43 }
 0x8ab   :  { %v2760_v9 = vmul.f32 %v6335_v7, %v5275_v35  ;;  %v2496_v28 = vadd.f32 %v2492_v37, %v2472_v59  ;;  %v4222_v59 = vld [vmem:[%s6876_s0 + $0xd8] sm:$0xff] }
 0x8ad   :  { %v5279_v48 = vpop.eup %5278  ;;  %2769 = vrot.lane.b32.xlu0 %v2760_v9, %s5405_s25  ;;  %v4221_v9 = vld [vmem:[%s6876_s0 + $0xd0] sm:$0xff] }
 0x8ae   :  { %v6340_v5 = vpop.eup %5280  ;;  %v2757_v42 = vmul.f32 %v5279_v48, %v2495_v0 }
 0x8af   :  { %v2761_v51 = vmul.f32 %v6340_v5, %v5279_v48 }
 0x8b1   :  { %v5283_v10 = vpop.eup %5282  ;;  %2771 = vrot.lane.b32.xlu1 %v2761_v51, %s5405_s25 }
 0x8b2   :  { %v2758_v1 = vmul.f32 %v5283_v10, %v2496_v28 }
 0x8b4   :  { %v6344_v14 = vpop.eup %5284 }
 0x8b5   :  { %v2762_v50 = vmul.f32 %v6344_v14, %v5283_v10  ;;  %2930 = vperm.xlu1 %4983, %v6353_v29  }
 0x8b7   :  { %2773 = vrot.lane.b32.xlu0 %v2762_v50, %s5405_s25 }
 0x8b9   :  { %2938 = vperm.xlu1 %4983, %v6365_v34  }
 0x8bb   :  { %2934 = vperm.xlu0 %4984, %v6359_v46  }
 0x8bd   :  { %2942 = vperm.xlu1 %4983, %v6372_v33  }
 0x8bf   :  { %4985 = vset.pattern.permute.xlu0 %v6917_v58 }
 0x8c1   :  { %4986 = vset.pattern.permute.xlu1 %v6917_v58 }
 0x91b   :  { %v2768_v40 = vpop.permute.xlu1 %2767 }
 0x91c   :  { %v6376_v49 = vadd.f32 %v2768_v40, %v2755_v38 }
 0x91e   :  { %4546 = vmatprep.mubr.msk.f32.mxu0 %vm103_vm1, %v6376_v49  ;;  %5286 = vtanh.f32 %v6376_v49 }
 0x91f   :  { %v2770_v30 = vpop.permute.xlu0 %2769 }
 0x920   :  { %v6380_v4 = vadd.f32 %v2770_v30, %v2756_v25  ;;  %v4220_v25 = vld [vmem:[%s6876_s0 + $0xc8] sm:$0xff] }
 0x922   :  { %4547 = vmatmul.mubr.msk.f32.vlgmr.msra.gmra.mrb[32].mxu0 %vm103_vm1, %v6380_v4  ;;  %5288 = vtanh.f32 %v6380_v4 }
 0x923   :  { %v2772_v61 = vpop.permute.xlu1 %2771  ;;  %2966 = vmatpush1.msra.mxu0 %v6387_v15 }
 0x924   :  { %v6390_v56 = vadd.f32 %v2772_v61, %v2757_v42  ;;  %4821 = vmatprep.subr.bf16.mxu0 %v5516_v8 }
 0x926   :  { %4549 = vmatprep.mubr.msk.f32.mxu0 %vm103_vm1, %v6390_v56  ;;  %5290 = vtanh.f32 %v6390_v56 }
 0x928   :  { %v5287_v37 = vpop.eup %5286 }
 0x929   :  { %v2774_v38 = vpop.permute.xlu0 %2773  ;;  %v6432_v0 = vmul.f32 %v5287_v37, %v6330_v45 }
 0x92a   :  { %v6395_v35 = vadd.f32 %v2774_v38, %v2758_v1 }
 0x92c   :  { %4550 = vmatmul.mubr.msk.f32.gmra.mrb[34].mxu0 %vm103_vm1, %v6395_v35  ;;  %5292 = vtanh.f32 %v6395_v35  ;;  %v5289_v48 = vpop.eup %5288 }
 0x92d   :  { %3029 = vmatprep.mubr.f32.mxu0 %v6900_v2  ;;  %v6438_v42 = vmul.f32 %v5289_v48, %v6335_v7 }
 0x930   :  { %4227 = vmatmul.mubr.msk.f32.vlgmr.msra.gmra.mrb[36].mxu0 %vm228_vm0, %v4219_v47  ;;  %v5291_v51 = vpop.eup %5290  ;;  %v6459_v47 = vld [vmem:[%s6881_s5] ss:$0 sm:$0xff] }
 0x931   :  { %4823 = vmatpush1.bf16.msra.mxu0 %v5526_v11  ;;  %3035 = vmatprep.mubr.f32.mxu0 %v6900_v2  ;;  %v6444_v28 = vmul.f32 %v5291_v51, %v6340_v5 }
 0x932   :  { %4825 = vmatprep.subr.bf16.mxu0 %v5542_v16 }
 0x933   :  { %6918 = vst [vmem:[#allocation3_spill] sm:$0xff] %v6444_v28 }
 0x934   :  { %4228 = vmatmul.mubr.msk.f32.gmra.mrb[38].mxu0 %vm228_vm0, %v4220_v25 }
 0x935   :  { %4827 = vmatpush1.bf16.msra.mxu0 %v5551_v19  ;;  %3041 = vmatprep.mubr.f32.mxu0 %v6900_v2 }
 0x936   :  { %4829 = vmatprep.subr.bf16.mxu0 %v5557_v21  ;;  %v5293_v45 = vpop.eup %5292 }
 0x937   :  { %v6450_v10 = vmul.f32 %v5293_v45, %v6344_v14 }
 0x938   :  { %4229 = vmatmul.mubr.msk.f32.gmra.mrb[40].mxu0 %vm228_vm0, %v4221_v9 }
 0x939   :  { %4831 = vmatpush1.bf16.msra.mxu0 %v5591_v32  ;;  %3047 = vmatprep.mubr.f32.mxu0 %v6900_v2  ;;  %6919 = vst [vmem:[#allocation4_spill] sm:$0xff] %v6450_v10 }
 0x93a   :  { %4833 = vmatprep.subr.bf16.mxu0 %v5604_v36 }
 0x93c   :  { %4230 = vmatmul.mubr.msk.f32.gmra.mrb[42].mxu0 %vm228_vm0, %v4222_v59 }
 0x93d   :  { %4835 = vmatpush1.bf16.msra.mxu0 %v5635_v44  ;;  %3130 = vmatprep.mubr.f32.mxu0 %v6900_v2 }
 0x940   :  { %4231 = vmatmul.mubr.msk.f32.vlgmr.msra.gmra.mrb[36].mxu0 %vm103_vm1, %v6432_v0 }
 0x941   :  { %3136 = vmatprep.mubr.f32.mxu0 %v6900_v2 }
 0x944   :  { %4232 = vmatmul.mubr.msk.f32.gmra.mrb[38].mxu0 %vm103_vm1, %v6438_v42 }
 0x945   :  { %3142 = vmatprep.mubr.f32.mxu0 %v6900_v2 }
 0x948   :  { %4233 = vmatmul.mubr.msk.f32.gmra.mrb[40].mxu0 %vm103_vm1, %v6444_v28 }
 0x949   :  { %3148 = vmatprep.mubr.f32.mxu0 %v6900_v2 }
 0x94c   :  { %4234 = vmatmul.mubr.msk.f32.gmra.mrb[42].mxu0 %vm103_vm1, %v6450_v10 }
 0x9f5   :  { %v4548_v7 = vpop.f32.mrb[32].mxu0 }
 0x9f6   :  { %v2902_v1 = vpop.f32.mrb[33].mxu0  ;;  %v2908_v45 = vadd.f32 %v6459_v47, %v4548_v7 }
 0x9f7   :  { %v2903_v14 = vadd.f32 %v6459_v47, %v2902_v1 }
 0x9ff   :  { %v4551_v50 = vpop.f32.mrb[34].mxu0 }
 0xa00   :  { %v2912_v58 = vpop.f32.mrb[35].mxu0 }
 0xa13   :  { %v3132_v40 = vpop.f32.mrb[36].mxu0 }
 0xa14   :  { %v3155_v5 = vadd.f32 %v3132_v40, %v5700_v54  ;;  %v3134_v30 = vpop.f32.mrb[37].mxu0 }
 0xa15   :  { %v3156_v61 = vadd.f32 %v3134_v30, %v5702_v55 }
 0xa16   :  { %v4235_v38 = vmul.f32 -1.442695, %v3155_v5 }
 0xa17   :  { %v4236_v25 = vmul.f32 -1.442695, %v3156_v61  ;;  %v3138_v9 = vpop.f32.mrb[38].mxu0 }
 0xa18   :  { %5294 = vpow2.f32 %v4235_v38  ;;  %v3157_v59 = vadd.f32 %v3138_v9, %v5700_v54  ;;  %v3140_v37 = vpop.f32.mrb[39].mxu0  ;;  %v2913_v38 = vadd.f32 %v6459_v47, %v2912_v58 }
 0xa19   :  { %5296 = vpow2.f32 %v4236_v25  ;;  %v3158_v48 = vadd.f32 %v3140_v37, %v5702_v55 }
 0xa1a   :  { %v4237_v51 = vmul.f32 -1.442695, %v3157_v59  ;;  %5298 = vtanh.f32 %v2903_v14 }
 0xa1b   :  { %v4238_v40 = vmul.f32 -1.442695, %v3158_v48  ;;  %v3144_v5 = vpop.f32.mrb[40].mxu0 }
 0xa1c   :  { %5300 = vpow2.f32 %v4237_v51  ;;  %v3159_v30 = vadd.f32 %v3144_v5, %v5700_v54  ;;  %v3146_v2 = vpop.f32.mrb[41].mxu0 }
 0xa1d   :  { %5302 = vpow2.f32 %v4238_v40  ;;  %v3160_v1 = vadd.f32 %v3146_v2, %v5702_v55  ;;  %v2918_v2 = vadd.f32 %v6459_v47, %v4551_v50 }
 0xa1e   :  { %v4239_v61 = vmul.f32 -1.442695, %v3159_v30  ;;  %5304 = vtanh.f32 %v2908_v45 }
 0xa1f   :  { %v4240_v25 = vmul.f32 -1.442695, %v3160_v1  ;;  %v3150_v9 = vpop.f32.mrb[42].mxu0 }
 0xa20   :  { %5306 = vpow2.f32 %v4239_v61  ;;  %v3161_v59 = vadd.f32 %v3150_v9, %v5700_v54  ;;  %v3152_v7 = vpop.f32.mrb[43].mxu0  ;;  %v2931_v61 = vpop.permute.xlu1 %2930 }
 0xa21   :  { %5308 = vpow2.f32 %v4240_v25  ;;  %v3162_v14 = vadd.f32 %v3152_v7, %v5702_v55 }
 0xa22   :  { %v5295_v37 = vpop.eup %5294  ;;  %v4241_v48 = vmul.f32 -1.442695, %v3161_v59  ;;  %5310 = vtanh.f32 %v2913_v38 }
 0xa23   :  { %v5297_v51 = vpop.eup %5296  ;;  %v3187_v40 = vadd.f32 1.0, %v5295_v37  ;;  %v4242_v5 = vmul.f32 -1.442695, %v3162_v14  ;;  %v2935_v37 = vpop.permute.xlu0 %2934 }
 0xa24   :  { %v3188_v45 = vadd.f32 1.0, %v5297_v51  ;;  %5312 = vpow2.f32 %v4241_v48  ;;  %v5299_v58 = vpop.eup %5298  ;;  %v2939_v43 = vpop.permute.xlu1 %2938 }
 0xa25   :  { %5314 = vrcp.f32 %v3187_v40  ;;  %v2925_v38 = vsub.f32 %v6376_v49, %v5299_v58  ;;  %v2945_v14 = vmul.f32 %v5299_v58, %v2931_v61 }
 0xa26   :  { %v5301_v30 = vpop.eup %5300  ;;  %5316 = vrcp.f32 %v3188_v45 }
 0xa27   :  { %v5303_v1 = vpop.eup %5302  ;;  %v3189_v9 = vadd.f32 1.0, %v5301_v30  ;;  %5318 = vpow2.f32 %v4242_v5 }
 0xa28   :  { %5320 = vtanh.f32 %v2918_v2  ;;  %v3190_v25 = vadd.f32 1.0, %v5303_v1  ;;  %v5305_v7 = vpop.eup %5304  ;;  %v2949_v2 = vadd.f32 %v2945_v14, %v2925_v38 }
 0xa29   :  { %5322 = vrcp.f32 %v3189_v9  ;;  %v2926_v30 = vsub.f32 %v6380_v4, %v5305_v7  ;;  %v2946_v5 = vmul.f32 %v5305_v7, %v2935_v37  ;;  %v2943_v7 = vpop.permute.xlu1 %2942 }
 0xa2a   :  { %v5307_v59 = vpop.eup %5306  ;;  %5324 = vrcp.f32 %v3190_v25 }
 0xa2b   :  { %v5309_v50 = vpop.eup %5308  ;;  %v3191_v48 = vadd.f32 1.0, %v5307_v59  ;;  %v2950_v59 = vadd.f32 %v2946_v5, %v2926_v30 }
 0xa2c   :  { %v3192_v51 = vadd.f32 1.0, %v5309_v50  ;;  %v5311_v40 = vpop.eup %5310 }
 0xa2d   :  { %5326 = vrcp.f32 %v3191_v48  ;;  %v2927_v50 = vsub.f32 %v6390_v56, %v5311_v40  ;;  %v2947_v48 = vmul.f32 %v5311_v40, %v2939_v43 }
 0xa2e   :  { %v5313_v45 = vpop.eup %5312  ;;  %5328 = vrcp.f32 %v3192_v51 }
 0xa2f   :  { %v5315_v1 = vpop.eup %5314  ;;  %v3193_v9 = vadd.f32 1.0, %v5313_v45  ;;  %v2951_v51 = vadd.f32 %v2947_v48, %v2927_v50  ;;  %v6523_v50 = vld [vmem:[%s6882_s2 + $0x18] sm:$0xff]  ;;  %v6921_v48 = vmov 2  }
 0xa30   :  { %v6473_v52 = vpop.eup %5316  ;;  %v6475_v49 = vmul.f32 %v5315_v1, %v2949_v2 }
 0xa31   :  { %v5319_v58 = vpop.eup %5318  ;;  %5330 = vrcp.f32 %v3193_v9  ;;  %v3215_v61 = vmul.f32 %v6473_v52, %v5315_v1 }
 0xa32   :  { %v5321_v25 = vpop.eup %5320  ;;  %v3194_v10 = vadd.f32 1.0, %v5319_v58 }
 0xa33   :  { %v5323_v4 = vpop.eup %5322  ;;  %3223 = vrot.lane.b32.xlu0 %v3215_v61, %s5405_s25  ;;  %v2928_v45 = vsub.f32 %v6395_v35, %v5321_v25  ;;  %v2948_v2 = vmul.f32 %v5321_v25, %v2943_v7  ;;  %v6508_v61 = vld [vmem:[%s6882_s2 + $0x8] sm:$0xff]  ;;  %v6920_v25 = vmov 1   ;;  %v6907_v7 = vmov 7  }
 0xa34   :  { %v6480_v38 = vpop.eup %5324  ;;  %5332 = vrcp.f32 %v3194_v10  ;;  %v6482_v14 = vmul.f32 %v5323_v4, %v2950_v59  ;;  %v6496_v10 = vld [vmem:[%s6882_s2] sm:$0xff]  ;;  %v6516_v59 = vld [vmem:[%s6882_s2 + $0x10] sm:$0xff] }
 0xa35   :  { %v3216_v37 = vmul.f32 %v6480_v38, %v5323_v4  ;;  %v2952_v5 = vadd.f32 %v2948_v2, %v2928_v45  ;;  %v6922_v4 = vmov 3  }
 0xa37   :  { %v5327_v30 = vpop.eup %5326  ;;  %3225 = vrot.lane.b32.xlu1 %v3216_v37, %s5405_s25  ;;  %v6923_v37 = vmov 4  }
 0xa38   :  { %v6487_v43 = vpop.eup %5328  ;;  %v6489_v56 = vmul.f32 %v5327_v30, %v2951_v51  ;;  %v6924_v51 = vmov 5  }
 0xa39   :  { %v3217_v40 = vmul.f32 %v6487_v43, %v5327_v30 }
 0xa3b   :  { %v5331_v1 = vpop.eup %5330  ;;  %3227 = vrot.lane.b32.xlu0 %v3217_v40, %s5405_s25 }
 0xa3c   :  { %v6498_v35 = vmul.f32 %v5331_v1, %v2952_v5 }
 0xa3e   :  { %v6500_v9 = vpop.eup %5332 }
 0xa3f   :  { %513 = vperm.xlu0 %4985, %v6496_v10   ;;  %v3218_v58 = vmul.f32 %v6500_v9, %v5331_v1 }
 0xa41   :  { %3229 = vrot.lane.b32.xlu1 %v3218_v58, %s5405_s25 }
 0xa43   :  { %4987 = vset.pattern.permute.xlu0 %v6920_v25 }
 0xa44   :  { %972 = vperm.xlu0 %4987, %v6496_v10  }
 0xa45   :  { %518 = vperm.xlu1 %4986, %v6508_v61  }
 0xa48   :  { %980 = vperm.xlu0 %4987, %v6516_v59  }
 0xa49   :  { %523 = vperm.xlu1 %4986, %v6516_v59  }
 0xa4c   :  { %4989 = vset.pattern.permute.xlu0 %v6921_v48 }
 0xa4d   :  { %528 = vperm.xlu1 %4986, %v6523_v50   ;;  %1428 = vperm.xlu0 %4989, %v6496_v10  }
 0xa51   :  { %4988 = vset.pattern.permute.xlu1 %v6920_v25  ;;  %1440 = vperm.xlu0 %4989, %v6523_v50  }
 0xa52   :  { %976 = vperm.xlu1 %4988, %v6508_v61  }
 0xa55   :  { %4992 = vset.pattern.permute.xlu0 %v6922_v4 }
 0xa56   :  { %984 = vperm.xlu1 %4988, %v6523_v50   ;;  %1888 = vperm.xlu0 %4992, %v6508_v61  }
 0xa5a   :  { %4990 = vset.pattern.permute.xlu1 %v6921_v48  ;;  %1892 = vperm.xlu0 %4992, %v6516_v59  }
 0xa5b   :  { %1432 = vperm.xlu1 %4990, %v6508_v61  }
 0xa5e   :  { %4995 = vset.pattern.permute.xlu0 %v6907_v7 }
 0xa5f   :  { %1436 = vperm.xlu1 %4990, %v6516_v59   ;;  %3394 = vperm.xlu0 %4995, %v6365_v34   ;;  %v6925_v34 = vmov 6  }
 0xa63   :  { %4991 = vset.pattern.permute.xlu1 %v6922_v4  ;;  %4998 = vset.pattern.permute.xlu0 %v6923_v37 }
 0xa64   :  { %1884 = vperm.xlu1 %4991, %v6496_v10   ;;  %2344 = vperm.xlu0 %4998, %v6508_v61  }
 0xa68   :  { %4993 = vset.pattern.permute.xlu1 %v6907_v7  ;;  %5000 = vset.pattern.permute.xlu0 %v6924_v51 }
 0xa69   :  { %3386 = vperm.xlu1 %4993, %v6353_v29   ;;  %2796 = vperm.xlu0 %5000, %v6496_v10  }
 0xa6d   :  { %3390 = vperm.xlu1 %4993, %v6359_v46   ;;  %2808 = vperm.xlu0 %5000, %v6523_v50  }
 0xa71   :  { %4994 = vset.pattern.permute.xlu1 %v6922_v4  ;;  %5003 = vset.pattern.permute.xlu0 %v6925_v34 }
 0xa72   :  { %1896 = vperm.xlu1 %4994, %v6523_v50  }
 0xa76   :  { %4996 = vset.pattern.permute.xlu1 %v6923_v37 }
 0xa77   :  { %2340 = vperm.xlu1 %4996, %v6496_v10  }
 0xa7b   :  { %4997 = vset.pattern.permute.xlu1 %v6907_v7 }
 0xa7c   :  { %3398 = vperm.xlu1 %4997, %v6372_v33  }
 0xa80   :  { %4999 = vset.pattern.permute.xlu1 %v6923_v37 }
 0xa81   :  { %2348 = vperm.xlu1 %4999, %v6516_v59  }
 0xa85   :  { %2352 = vperm.xlu1 %4999, %v6523_v50  }
 0xa89   :  { %5001 = vset.pattern.permute.xlu1 %v6924_v51 }
 0xa8a   :  { %2800 = vperm.xlu1 %5001, %v6508_v61  }
 0xa8e   :  { %2804 = vperm.xlu1 %5001, %v6516_v59  }
 0xa92   :  { %5002 = vset.pattern.permute.xlu1 %v6925_v34 }
 0xa93   :  { %3252 = vperm.xlu1 %5002, %v6496_v10  }
 0xa97   :  { %3256 = vperm.xlu1 %5002, %v6508_v61  }
 0xaa5   :  { %v3224_v29 = vpop.permute.xlu0 %3223 }
 0xaa6   :  { %v6567_v46 = vadd.f32 %v3224_v29, %v6475_v49 }
 0xaa8   :  { %4568 = vmatprep.mubr.msk.f32.mxu1 %vm103_vm1, %v6567_v46  ;;  %5334 = vtanh.f32 %v6567_v46 }
 0xaa9   :  { %v3226_v33 = vpop.permute.xlu1 %3225 }
 0xaaa   :  { %v6572_v45 = vadd.f32 %v3226_v33, %v6482_v14  ;;  %v6926_v14 = vmov 0.0  }
 0xaac   :  { %4569 = vmatmul.mubr.msk.f32.vlgmr.msra.gmra.mrb[40].mxu1 %vm103_vm1, %v6572_v45  ;;  %5336 = vtanh.f32 %v6572_v45 }
 0xaad   :  { %v3228_v2 = vpop.permute.xlu0 %3227  ;;  %3422 = vmatpush1.msra.mxu1 %v6387_v15  ;;  %v4243_v15 = vld [vmem:[%s6876_s0 + $0xe0] sm:$0xff] }
 0xaae   :  { %v6578_v30 = vadd.f32 %v3228_v2, %v6489_v56  ;;  %4853 = vmatprep.subr.bf16.mxu1 %v5516_v8  ;;  %v4244_v8 = vld [vmem:[%s6876_s0 + $0xe8] sm:$0xff] }
 0xab0   :  { %4571 = vmatprep.mubr.msk.f32.mxu1 %vm103_vm1, %v6578_v30  ;;  %5338 = vtanh.f32 %v6578_v30 }
 0xab3   :  { %v3230_v49 = vpop.permute.xlu1 %3229 }
 0xab4   :  { %v6584_v40 = vadd.f32 %v3230_v49, %v6498_v35 }
 0xab6   :  { %4572 = vmatmul.mubr.msk.f32.gmra.mrb[42].mxu1 %vm103_vm1, %v6584_v40  ;;  %5340 = vtanh.f32 %v6584_v40 }
 0xab7   :  { %3485 = vmatprep.mubr.f32.mxu1 %v6926_v14 }
 0xaba   :  { %4251 = vmatmul.mubr.msk.f32.vlgmr.msra.gmra.mrb[44].mxu1 %vm228_vm0, %v4243_v15 }
 0xabb   :  { %4855 = vmatpush1.bf16.msra.mxu1 %v5526_v11  ;;  %3491 = vmatprep.mubr.f32.mxu1 %v6926_v14  ;;  %v4245_v11 = vld [vmem:[%s6876_s0 + $0xf0] sm:$0xff] }
 0xabc   :  { %4857 = vmatprep.subr.bf16.mxu1 %v5542_v16  ;;  %v4246_v16 = vld [vmem:[%s6876_s0 + $0xf8] sm:$0xff] }
 0xabe   :  { %4252 = vmatmul.mubr.msk.f32.gmra.mrb[46].mxu1 %vm228_vm0, %v4244_v8  ;;  %v6651_v37 = vpop.permute.xlu0 %513 }
 0xabf   :  { %4859 = vmatpush1.bf16.msra.mxu1 %v5551_v19  ;;  %3497 = vmatprep.mubr.f32.mxu1 %v6926_v14  ;;  %v5335_v19 = vpop.eup %5334 }
 0xac0   :  { %4861 = vmatprep.subr.bf16.mxu1 %v5557_v21  ;;  %v6621_v21 = vmul.f32 %v5335_v19, %v6473_v52 }
 0xac2   :  { %4253 = vmatmul.mubr.msk.f32.gmra.mrb[48].mxu1 %vm228_vm0, %v4245_v11  ;;  %6927 = vst [vmem:[#allocation5_spill] sm:$0xff] %v6621_v21 }
 0xac3   :  { %4863 = vmatpush1.bf16.msra.mxu1 %v5591_v32  ;;  %3503 = vmatprep.mubr.f32.mxu1 %v6926_v14  ;;  %v5337_v32 = vpop.eup %5336 }
 0xac4   :  { %4865 = vmatprep.subr.bf16.mxu1 %v5604_v36  ;;  %v6627_v36 = vmul.f32 %v5337_v32, %v6480_v38  ;;  %v5339_v56 = vpop.eup %5338  ;;  %v6643_v38 = vpop.permute.xlu1 %518 }
 0xac5   :  { %v5341_v52 = vpop.eup %5340 }
 0xac6   :  { %4254 = vmatmul.mubr.msk.f32.gmra.mrb[50].mxu1 %vm228_vm0, %v4246_v16  ;;  %6928 = vst [vmem:[#allocation6_spill] sm:$0xff] %v6627_v36  ;;  %v6639_v5 = vmul.f32 %v5341_v52, %v6500_v9  ;;  %v6655_v9 = vpop.permute.xlu0 %972 }
 0xac7   :  { %4867 = vmatpush1.bf16.msra.mxu1 %v5635_v44  ;;  %3586 = vmatprep.mubr.f32.mxu1 %v6926_v14  ;;  %v6633_v44 = vmul.f32 %v5339_v56, %v6487_v43 }
 0xac8   :  { %6930 = vst [vmem:[#allocation8_spill] sm:$0xff] %v6639_v5  ;;  %v6645_v58 = vpop.permute.xlu1 %523 }
 0xac9   :  { %6929 = vst [vmem:[#allocation7_spill] sm:$0xff] %v6633_v44 }
 0xaca   :  { %4255 = vmatmul.mubr.msk.f32.vlgmr.msra.gmra.mrb[44].mxu1 %vm103_vm1, %v6621_v21  ;;  %v6659_v33 = vpop.permute.xlu0 %980 }
 0xacb   :  { %3592 = vmatprep.mubr.f32.mxu1 %v6926_v14 }
 0xacc   :  { %v6647_v43 = vpop.permute.xlu1 %528 }
 0xace   :  { %4256 = vmatmul.mubr.msk.f32.gmra.mrb[46].mxu1 %vm103_vm1, %v6627_v36  ;;  %v6668_v7 = vpop.permute.xlu0 %1428 }
 0xacf   :  { %3598 = vmatprep.mubr.f32.mxu1 %v6926_v14 }
 0xad1   :  { %v6649_v4 = vpop.permute.xlu1 %976 }
 0xad2   :  { %4257 = vmatmul.mubr.msk.f32.gmra.mrb[48].mxu1 %vm103_vm1, %v6633_v44 }
 0xad3   :  { %3604 = vmatprep.mubr.f32.mxu1 %v6926_v14 }
 0xad5   :  { %v6653_v51 = vpop.permute.xlu1 %984 }
 0xad6   :  { %4258 = vmatmul.mubr.msk.f32.gmra.mrb[50].mxu1 %vm103_vm1, %v6639_v5 }
 0xada   :  { %v6657_v34 = vpop.permute.xlu1 %1432 }
 0xade   :  { %v6662_v14 = vpop.permute.xlu1 %1436 }
 0xae3   :  { %v6670_v5 = vpop.permute.xlu1 %1884 }
 0xb7f   :  { %v4570_v1 = vpop.f32.mrb[40].mxu1 }
 0xb80   :  { %v3358_v35 = vpop.f32.mrb[41].mxu1  ;;  %v3364_v44 = vadd.f32 %v6459_v47, %v4570_v1 }
 0xb81   :  { %v3359_v11 = vadd.f32 %v6459_v47, %v3358_v35 }
 0xb89   :  { %v4573_v25 = vpop.f32.mrb[42].mxu1 }
 0xb8a   :  { %v3368_v48 = vpop.f32.mrb[43].mxu1 }
 0xb9d   :  { %v3588_v29 = vpop.f32.mrb[44].mxu1 }
 0xb9e   :  { %v3611_v2 = vadd.f32 %v3588_v29, %v5700_v54  ;;  %v3590_v49 = vpop.f32.mrb[45].mxu1 }
 0xb9f   :  { %v3612_v15 = vadd.f32 %v3590_v49, %v5702_v55 }
 0xba0   :  { %v4259_v8 = vmul.f32 -1.442695, %v3611_v2 }
 0xba1   :  { %v4260_v16 = vmul.f32 -1.442695, %v3612_v15  ;;  %v3594_v19 = vpop.f32.mrb[46].mxu1 }
 0xba2   :  { %5342 = vpow2.f32 %v4259_v8  ;;  %v3613_v32 = vadd.f32 %v3594_v19, %v5700_v54  ;;  %v3596_v56 = vpop.f32.mrb[47].mxu1 }
 0xba3   :  { %5344 = vpow2.f32 %v4260_v16  ;;  %v3614_v52 = vadd.f32 %v3596_v56, %v5702_v55  ;;  %v6675_v16 = vpop.permute.xlu0 %1440  ;;  %v3387_v56 = vpop.permute.xlu1 %3386 }
 0xba4   :  { %v4261_v29 = vmul.f32 -1.442695, %v3613_v32  ;;  %5346 = vtanh.f32 %v3359_v11  ;;  %v3369_v32 = vadd.f32 %v6459_v47, %v3368_v48 }
 0xba5   :  { %v4262_v2 = vmul.f32 -1.442695, %v3614_v52  ;;  %v3600_v49 = vpop.f32.mrb[48].mxu1 }
 0xba6   :  { %5348 = vpow2.f32 %v4261_v29  ;;  %v3615_v35 = vadd.f32 %v3600_v49, %v5700_v54  ;;  %v3602_v15 = vpop.f32.mrb[49].mxu1 }
 0xba7   :  { %5350 = vpow2.f32 %v4262_v2  ;;  %v3616_v8 = vadd.f32 %v3602_v15, %v5702_v55 }
 0xba8   :  { %v4263_v19 = vmul.f32 -1.442695, %v3615_v35  ;;  %5352 = vtanh.f32 %v3364_v44  ;;  %v3374_v35 = vadd.f32 %v6459_v47, %v4573_v25 }
 0xba9   :  { %v4264_v36 = vmul.f32 -1.442695, %v3616_v8  ;;  %v3606_v21 = vpop.f32.mrb[50].mxu1  ;;  %v6681_v8 = vpop.permute.xlu0 %1888 }
 0xbaa   :  { %5354 = vpow2.f32 %v4263_v19  ;;  %v3617_v1 = vadd.f32 %v3606_v21, %v5700_v54  ;;  %v3608_v11 = vpop.f32.mrb[51].mxu1  ;;  %v3391_v19 = vpop.permute.xlu1 %3390 }
 0xbab   :  { %5356 = vpow2.f32 %v4264_v36  ;;  %v3618_v52 = vadd.f32 %v3608_v11, %v5702_v55 }
 0xbac   :  { %v5343_v29 = vpop.eup %5342  ;;  %v4265_v2 = vmul.f32 -1.442695, %v3617_v1  ;;  %5358 = vtanh.f32 %v3369_v32 }
 0xbad   :  { %v5345_v49 = vpop.eup %5344  ;;  %v3643_v15 = vadd.f32 1.0, %v5343_v29  ;;  %v4266_v26 = vmul.f32 -1.442695, %v3618_v52  ;;  %v6684_v52 = vpop.permute.xlu0 %1892 }
 0xbae   :  { %v3644_v44 = vadd.f32 1.0, %v5345_v49  ;;  %5360 = vpow2.f32 %v4265_v2  ;;  %v5347_v48 = vpop.eup %5346  ;;  %v6686_v29 = vpop.permute.xlu1 %1896 }
 0xbaf   :  { %5362 = vrcp.f32 %v3643_v15  ;;  %v3381_v47 = vsub.f32 %v6567_v46, %v5347_v48  ;;  %v3401_v25 = vmul.f32 %v5347_v48, %v3387_v56 }
 0xbb0   :  { %v5349_v54 = vpop.eup %5348  ;;  %5364 = vrcp.f32 %v3644_v44 }
 0xbb1   :  { %v5351_v21 = vpop.eup %5350  ;;  %v3645_v36 = vadd.f32 1.0, %v5349_v54  ;;  %5366 = vpow2.f32 %v4266_v26  ;;  %v3405_v26 = vadd.f32 %v3401_v25, %v3381_v47  ;;  %v3395_v48 = vpop.permute.xlu0 %3394 }
 0xbb2   :  { %5368 = vtanh.f32 %v3374_v35  ;;  %v3646_v55 = vadd.f32 1.0, %v5351_v21  ;;  %v5353_v1 = vpop.eup %5352  ;;  %v6693_v28 = vpop.permute.xlu1 %2340 }
 0xbb3   :  { %5370 = vrcp.f32 %v3645_v36  ;;  %v3382_v35 = vsub.f32 %v6572_v45, %v5353_v1  ;;  %v3402_v54 = vmul.f32 %v5353_v1, %v3391_v19 }
 0xbb4   :  { %v5355_v32 = vpop.eup %5354  ;;  %5372 = vrcp.f32 %v3646_v55 }
 0xbb5   :  { %v5357_v11 = vpop.eup %5356  ;;  %v3647_v2 = vadd.f32 1.0, %v5355_v32 }
 0xbb6   :  { %v3648_v49 = vadd.f32 1.0, %v5357_v11  ;;  %v5359_v15 = vpop.eup %5358 }
 0xbb7   :  { %5374 = vrcp.f32 %v3647_v2  ;;  %v3383_v47 = vsub.f32 %v6578_v30, %v5359_v15  ;;  %v3403_v45 = vmul.f32 %v5359_v15, %v3395_v48 }
 0xbb8   :  { %v5361_v44 = vpop.eup %5360  ;;  %5376 = vrcp.f32 %v3648_v49  ;;  %v3406_v49 = vadd.f32 %v3402_v54, %v3382_v35 }
 0xbb9   :  { %v5363_v21 = vpop.eup %5362  ;;  %v3649_v36 = vadd.f32 1.0, %v5361_v44  ;;  %v3399_v44 = vpop.permute.xlu1 %3398 }
 0xbba   :  { %v6689_v55 = vpop.eup %5364  ;;  %v6691_v46 = vmul.f32 %v5363_v21, %v3405_v26 }
 0xbbb   :  { %6931 = vst [vmem:[#allocation9_spill] sm:$0xff] %v6689_v55  ;;  %v5367_v56 = vpop.eup %5366  ;;  %5378 = vrcp.f32 %v3649_v36  ;;  %v3671_v32 = vmul.f32 %v6689_v55, %v5363_v21  ;;  %v3407_v36 = vadd.f32 %v3403_v45, %v3383_v47  ;;  %v3862_v47 = vld [vmem:[%s6883_s11 + $0x18] sm:$0xff] }
 0xbbc   :  { %v5369_v11 = vpop.eup %5368  ;;  %v3650_v2 = vadd.f32 1.0, %v5367_v56 }
 0xbbd   :  { %v5371_v19 = vpop.eup %5370  ;;  %3679 = vrot.lane.b32.xlu1 %v3671_v32, %s5405_s25  ;;  %v3384_v21 = vsub.f32 %v6584_v40, %v5369_v11  ;;  %v3404_v55 = vmul.f32 %v5369_v11, %v3399_v44  ;;  %v6932_v32 = vmov 7  }
 0xbbe   :  { %v6698_v1 = vpop.eup %5372  ;;  %5380 = vrcp.f32 %v3650_v2  ;;  %v6700_v25 = vmul.f32 %v5371_v19, %v3406_v49 }
 0xbbf   :  { %v3672_v26 = vmul.f32 %v6698_v1, %v5371_v19  ;;  %v3408_v54 = vadd.f32 %v3404_v55, %v3384_v21  ;;  %v3859_v55 = vld [vmem:[%s6883_s11] sm:$0xff]  ;;  %v3732_v19 = vld [vmem:[%s6884_s9 + $0x8] sm:$0xff] }
 0xbc1   :  { %v5375_v56 = vpop.eup %5374  ;;  %3260 = vperm.xlu1 %5002, %v6516_v59   ;;  %3681 = vrot.lane.b32.xlu0 %v3672_v26, %s5405_s25  ;;  %v531_v26 = vmul.f32 %v6651_v37, %v5765_v12 }
 0xbc2   :  { %v6706_v30 = vpop.eup %5376  ;;  %v6708_v15 = vmul.f32 %v5375_v56, %v3407_v36 }
 0xbc3   :  { %v3673_v35 = vmul.f32 %v6706_v30, %v5375_v56  ;;  %v967_v36 = vsub.f32 %v5890_v6, %v531_v26  ;;  %v533_v56 = vmul.f32 %v6645_v58, %v5786_v20 }
 0xbc5   :  { %v5379_v48 = vpop.eup %5378  ;;  %5004 = vset.pattern.permute.xlu1 %v6932_v32  ;;  %3683 = vrot.lane.b32.xlu0 %v3673_v35, %s5405_s25  ;;  %v987_v21 = vmul.f32 %v6655_v9, %v967_v36 }
 0xbc6   :  { %3708 = vperm.xlu1 %5004, %v6496_v10   ;;  %v6714_v40 = vmul.f32 %v5379_v48, %v3408_v54  ;;  %v3860_v10 = vld [vmem:[%s6883_s11 + $0x8] sm:$0xff] }
 0xbc7   :  { %v6729_v49 = vpack.c.bf16 %v3860_v10, %v3859_v55 }
 0xbc8   :  { %v6716_v11 = vpop.eup %5380 }
 0xbc9   :  { %v3674_v2 = vmul.f32 %v6716_v11, %v5379_v48  ;;  %4888 = vmatprep.subr.bf16.mxu1 %v6729_v49  ;;  %v991_v48 = vadd.f32 %v987_v21, %v531_v26 }
 0xbca   :  { %3712 = vperm.xlu1 %5004, %v6508_v61   ;;  %4890 = vmatpush3.bf16.msra.mxu1 %v6729_v49  ;;  %v3861_v61 = vld [vmem:[%s6883_s11 + $0x10] sm:$0xff] }
 0xbcb   :  { %3685 = vrot.lane.b32.xlu0 %v3674_v2, %s5405_s25  ;;  %v6740_v45 = vpack.c.bf16 %v3862_v47, %v3861_v61  ;;  %v1423_v37 = vsub.f32 %v6035_v13, %v991_v48 }
 0xbcd   :  { %4889 = vmatprep.subr.bf16.mxu1 %v6740_v45  ;;  %v1443_v6 = vmul.f32 %v6668_v7, %v1423_v37 }
 0xbce   :  { %3720 = vperm.xlu1 %5004, %v6523_v50   ;;  %4891 = vmatpush3.bf16.msra.mxu1 %v6740_v45 }
 0xbcf   :  { %3264 = vperm.xlu0 %5003, %v6523_v50   ;;  %v3731_v50 = vld [vmem:[%s6884_s9] sm:$0xff]  ;;  %v1447_v58 = vadd.f32 %v1443_v6, %v991_v48 }
 0xbd0   :  { %v4868_v44 = vpack.c.bf16 %v3732_v19, %v3731_v50 }
 0xbd1   :  { %v1879_v10 = vsub.f32 %v6165_v63, %v1447_v58 }
 0xbd2   :  { %4869 = vmatprep.subr.bf16.mxu0 %v4868_v44 }
 0xbd3   :  { %5005 = vset.pattern.permute.xlu0 %v6932_v32  ;;  %4871 = vmatpush3.bf16.msra.mxu0 %v4868_v44  ;;  %v969_v32 = vsub.f32 %v5906_v62, %v533_v56 }
 0xbd4   :  { %3716 = vperm.xlu0 %5005, %v6516_v59   ;;  %v532_v59 = vmul.f32 %v6643_v38, %v5776_v17  ;;  %v2349_v17 = vpop.permute.xlu1 %2348 }
 0xbd5   :  { %v989_v12 = vmul.f32 %v6659_v33, %v969_v32 }
 0xbd6   :  { %v968_v35 = vsub.f32 %v5898_v3, %v532_v59  ;;  %v534_v3 = vmul.f32 %v6647_v43, %v5795_v23 }
 0xbd7   :  { %v993_v9 = vadd.f32 %v989_v12, %v533_v56 }
 0xbd8   :  { %v988_v54 = vmul.f32 %v6649_v4, %v968_v35  ;;  %v2353_v4 = vpop.permute.xlu1 %2352  ;;  %v970_v33 = vsub.f32 %v5914_v18, %v534_v3 }
 0xbd9   :  { %v1425_v62 = vsub.f32 %v6051_v39, %v993_v9 }
 0xbda   :  { %v992_v2 = vadd.f32 %v988_v54, %v532_v59  ;;  %v990_v7 = vmul.f32 %v6653_v51, %v970_v33  ;;  %v2345_v59 = vpop.permute.xlu0 %2344 }
 0xbdb   :  { %v1445_v13 = vmul.f32 %v6662_v14, %v1425_v62 }
 0xbdc   :  { %v1424_v38 = vsub.f32 %v6043_v57, %v992_v2  ;;  %v2801_v61 = vpop.permute.xlu1 %2800  ;;  %v994_v23 = vadd.f32 %v990_v7, %v534_v3  ;;  %v6936_v7 = vld [vmem:[#allocation6_spill] sm:$0xff] }
 0xbdd   :  { %v1449_v47 = vadd.f32 %v1445_v13, %v993_v9 }
 0xbde   :  { %v1444_v20 = vmul.f32 %v6657_v34, %v1424_v38  ;;  %v1899_v34 = vmul.f32 %v6670_v5, %v1879_v10  ;;  %v1426_v18 = vsub.f32 %v6059_v22, %v994_v23  ;;  %v2797_v56 = vpop.permute.xlu0 %2796 }
 0xbdf   :  { %v1881_v39 = vsub.f32 %v6181_v60, %v1449_v47 }
 0xbe0   :  { %v1448_v55 = vadd.f32 %v1444_v20, %v992_v2  ;;  %v1903_v43 = vadd.f32 %v1899_v34, %v1447_v58  ;;  %v2805_v19 = vpop.permute.xlu1 %2804  ;;  %v1446_v5 = vmul.f32 %v6675_v16, %v1426_v18 }
 0xbe2   :  { %v1880_v57 = vsub.f32 %v6173_v41, %v1448_v55  ;;  %v2335_v63 = vsub.f32 %v6285_v24, %v1903_v43  ;;  %v1901_v41 = vmul.f32 %v6684_v52, %v1881_v39  ;;  %v1450_v21 = vadd.f32 %v1446_v5, %v994_v23  ;;  %v6939_v5 = vld [vmem:[#allocation4_spill] sm:$0xff] }
 0xbe4   :  { %v1900_v50 = vmul.f32 %v6681_v8, %v1880_v57  ;;  %v2355_v51 = vmul.f32 %v6693_v28, %v2335_v63  ;;  %v3253_v26 = vpop.permute.xlu1 %3252  ;;  %v1905_v8 = vadd.f32 %v1901_v41, %v1449_v47  ;;  %v1882_v28 = vsub.f32 %v6189_v31, %v1450_v21  ;;  %v6933_v31 = vld [vmem:[#allocation3_spill] sm:$0xff]  ;;  %v3734_v47 = vld [vmem:[%s6884_s9 + $0x18] sm:$0xff] }
 0xbe6   :  { %v1904_v14 = vadd.f32 %v1900_v50, %v1448_v55  ;;  %v2359_v36 = vadd.f32 %v2355_v51, %v1903_v43  ;;  %v2337_v35 = vsub.f32 %v6301_v53, %v1905_v8  ;;  %v1902_v16 = vmul.f32 %v6686_v29, %v1882_v28  ;;  %v6935_v55 = vld [vmem:[#allocation5_spill] sm:$0xff] }
 0xbe7   :  { %v6937_v50 = vld [vmem:[#allocation9_spill] sm:$0xff] }
 0xbe8   :  { %v2336_v44 = vsub.f32 %v6293_v27, %v1904_v14  ;;  %v2791_v22 = vsub.f32 %v6432_v0, %v2359_v36  ;;  %v3257_v24 = vpop.permute.xlu1 %3256  ;;  %v2357_v52 = vmul.f32 %v2349_v17, %v2337_v35  ;;  %v2809_v27 = vpop.permute.xlu0 %2808  ;;  %v1906_v6 = vadd.f32 %v1902_v16, %v1450_v21  ;;  %v6934_v17 = vld [vmem:[#allocation2_spill] sm:$0xff] }
 0xbea   :  { %v2356_v60 = vmul.f32 %v2345_v59, %v2336_v44  ;;  %v2811_v48 = vmul.f32 %v2797_v56, %v2791_v22  ;;  %v2361_v12 = vadd.f32 %v2357_v52, %v1905_v8  ;;  %v2338_v3 = vsub.f32 %v6934_v17, %v1906_v6 }
 0xbec   :  { %v2360_v54 = vadd.f32 %v2356_v60, %v1904_v14  ;;  %v2815_v0 = vadd.f32 %v2811_v48, %v2359_v36  ;;  %v2793_v20 = vsub.f32 %v6933_v31, %v2361_v12  ;;  %v2358_v33 = vmul.f32 %v2353_v4, %v2338_v3 }
 0xbee   :  { %v2792_v37 = vsub.f32 %v6438_v42, %v2360_v54  ;;  %v2813_v58 = vmul.f32 %v2805_v19, %v2793_v20  ;;  %v3247_v62 = vsub.f32 %v6935_v55, %v2815_v0  ;;  %v6938_v19 = vld [vmem:[#allocation7_spill] sm:$0xff] }
 0xbf0   :  { %v2812_v38 = vmul.f32 %v2801_v61, %v2792_v37  ;;  %v3267_v13 = vmul.f32 %v3253_v26, %v3247_v62  ;;  %v2817_v10 = vadd.f32 %v2813_v58, %v2361_v12  ;;  %v3733_v61 = vld [vmem:[%s6884_s9 + $0x10] sm:$0xff]  ;;  %s5413_s9 = smov 96  }
 0xbf1   :  { %v4872_v39 = vpack.c.bf16 %v3734_v47, %v3733_v61 }
 0xbf2   :  { %v2816_v29 = vadd.f32 %v2812_v38, %v2360_v54  ;;  %v3271_v23 = vadd.f32 %v3267_v13, %v2815_v0  ;;  %v3249_v18 = vsub.f32 %v6938_v19, %v2817_v10 }
 0xbf3   :  { %4873 = vmatprep.subr.bf16.mxu0 %v4872_v39 }
 0xbf4   :  { %v3248_v57 = vsub.f32 %v6936_v7, %v2816_v29  ;;  %4875 = vmatpush3.bf16.msra.mxu0 %v4872_v39  ;;  %v4279_v39 = vld [vmem:[%s6888_s12] ss:$0 sm:$0xff] }
 0xbf5   :  { %4877 = vmatprep.subr.bf16.mxu0 %v6729_v49 }
 0xbf6   :  { %v3268_v43 = vmul.f32 %v3257_v24, %v3248_v57 }
 0xbf8   :  { %v3272_v26 = vadd.f32 %v3268_v43, %v2816_v29  ;;  %v3858_v29 = vld [vmem:[%s6885_s10 + $0x8] sm:$0xff] }
 0xc2f   :  { %v3680_v32 = vpop.permute.xlu1 %3679 }
 0xc30   :  { %v3691_v2 = vadd.f32 %v3680_v32, %v6691_v46 }
 0xc32   :  { %5382 = vtanh.f32 %v3691_v2 }
 0xc33   :  { %v3682_v53 = vpop.permute.xlu0 %3681 }
 0xc34   :  { %v3692_v9 = vadd.f32 %v3682_v53, %v6700_v25  ;;  %v2362_v25 = vadd.f32 %v2358_v33, %v1906_v6  ;;  %v3856_v33 = vld [vmem:[%s6886_s3 + $0x18] sm:$0xff] }
 0xc36   :  { %5384 = vtanh.f32 %v3692_v9  ;;  %v2794_v44 = vsub.f32 %v6939_v5, %v2362_v25 }
 0xc37   :  { %v3684_v46 = vpop.permute.xlu0 %3683 }
 0xc38   :  { %v3693_v42 = vadd.f32 %v3684_v46, %v6708_v15  ;;  %v2814_v60 = vmul.f32 %v2809_v27, %v2794_v44  ;;  %v3853_v46 = vld [vmem:[%s6886_s3] sm:$0xff] }
 0xc3a   :  { %5386 = vtanh.f32 %v3693_v42  ;;  %v2818_v54 = vadd.f32 %v2814_v60, %v2362_v25 }
 0xc3c   :  { %v5383_v34 = vpop.eup %5382 }
 0xc3d   :  { %v3686_v4 = vpop.permute.xlu0 %3685  ;;  %v3699_v15 = vmul.f32 %v5383_v34, %v6937_v50 }
 0xc3e   :  { %v3694_v51 = vadd.f32 %v3686_v4, %v6714_v40 }
 0xc3f   :  { %v3703_v14 = vsub.f32 %v3699_v15, %v3271_v23 }
 0xc40   :  { %v5385_v63 = vpop.eup %5384  ;;  %v3261_v41 = vpop.permute.xlu1 %3260  ;;  %5388 = vtanh.f32 %v3694_v51 }
 0xc41   :  { %v3269_v59 = vmul.f32 %v3261_v41, %v3249_v18  ;;  %v3700_v36 = vmul.f32 %v5385_v63, %v6698_v1  ;;  %v6940_v1 = vld [vmem:[#allocation8_spill] sm:$0xff] }
 0xc42   :  { %v3250_v32 = vsub.f32 %v6940_v1, %v2818_v54 }
 0xc43   :  { %v3704_v8 = vsub.f32 %v3700_v36, %v3272_v26  ;;  %v3273_v56 = vadd.f32 %v3269_v59, %v2817_v10 }
 0xc44   :  { %v5387_v21 = vpop.eup %5386 }
 0xc45   :  { %v3709_v22 = vpop.permute.xlu1 %3708  ;;  %v3701_v35 = vmul.f32 %v5387_v21, %v6706_v30 }
 0xc46   :  { %v3723_v24 = vmul.f32 %v3709_v22, %v3703_v14 }
 0xc47   :  { %v3705_v40 = vsub.f32 %v3701_v35, %v3273_v56 }
 0xc48   :  { %v3727_v28 = vadd.f32 %v3723_v24, %v3271_v23 }
 0xc49   :  { %v3713_v52 = vpop.permute.xlu1 %3712 }
 0xc4a   :  { %v3724_v16 = vmul.f32 %v3713_v52, %v3704_v8  ;;  %3739 = vrot.lane.b32.xlu1 %v3727_v28, %s5413_s9  ;;  %v5389_v2 = vpop.eup %5388 }
 0xc4b   :  { %v3702_v6 = vmul.f32 %v5389_v2, %v6716_v11  ;;  %v3857_v11 = vld [vmem:[%s6885_s10] sm:$0xff] }
 0xc4c   :  { %v3728_v48 = vadd.f32 %v3724_v16, %v3272_v26  ;;  %v4884_v58 = vpack.c.bf16 %v3858_v29, %v3857_v11 }
 0xc4d   :  { %v3721_v38 = vpop.permute.xlu1 %3720 }
 0xc4e   :  { %v3265_v12 = vpop.permute.xlu0 %3264  ;;  %3741 = vrot.lane.b32.xlu0 %v3728_v48, %s5413_s9 }
 0xc4f   :  { %v3270_v37 = vmul.f32 %v3265_v12, %v3250_v32 }
 0xc51   :  { %v3274_v27 = vadd.f32 %v3270_v37, %v2818_v54 }
 0xc53   :  { %v3706_v0 = vsub.f32 %v3702_v6, %v3274_v27  ;;  %v3717_v30 = vpop.permute.xlu0 %3716 }
 0xc54   :  { %v3725_v53 = vmul.f32 %v3717_v30, %v3705_v40 }
 0xc55   :  { %v3726_v9 = vmul.f32 %v3721_v38, %v3706_v0 }
 0xc56   :  { %v3729_v31 = vadd.f32 %v3725_v53, %v3273_v56 }
 0xc57   :  { %v3730_v20 = vadd.f32 %v3726_v9, %v3274_v27 }
 0xc58   :  { %4599 = vmatprep.mubr.msk.f32.mxu1 %vm3747_vm2, %v3729_v31  ;;  %3743 = vrot.lane.b32.xlu1 %v3729_v31, %s5413_s9 }
 0xc59   :  { %3745 = vrot.lane.b32.xlu0 %v3730_v20, %s5413_s9  ;;  %4600 = vmatmul.mubr.msk.f32.vlgmr.msra.gmra.mrb[52].mxu1 %vm3747_vm2, %v3730_v20 }
 0xcbc   :  { %v3740_v17 = vpop.permute.xlu1 %3739 }
 0xcbd   :  { %4582 = vmatprep.mubr.msk.f32.mxu0 %vm3747_vm2, %v3740_v17 }
 0xcc0   :  { %v3742_v3 = vpop.permute.xlu0 %3741 }
 0xcc1   :  { %4583 = vmatmul.mubr.msk.f32.vlgmr.msra.gmra.mrb[44].mxu0 %vm3747_vm2, %v3742_v3 }
 0xcc2   :  { %4879 = vmatpush3.bf16.msra.mxu0 %v6729_v49  ;;  %v3854_v49 = vld [vmem:[%s6886_s3 + $0x8] sm:$0xff] }
 0xcc3   :  { %4881 = vmatprep.subr.bf16.mxu0 %v6740_v45 }
 0xcc6   :  { %4883 = vmatpush3.bf16.msra.mxu0 %v6740_v45  ;;  %v3855_v45 = vld [vmem:[%s6886_s3 + $0x10] sm:$0xff] }
 0xcc7   :  { %4885 = vmatprep.subr.bf16.mxu0 %v4884_v58 }
 0xcca   :  { %v3744_v55 = vpop.permute.xlu1 %3743 }
 0xccb   :  { %v3746_v62 = vpop.permute.xlu0 %3745  ;;  %4585 = vmatprep.mubr.msk.f32.mxu0 %vm3747_vm2, %v3744_v55 }
 0xccc   :  { %4586 = vmatmul.mubr.msk.f32.gmra.mrb[46].mxu0 %vm3747_vm2, %v3746_v62 }
 0xccd   :  { %4596 = vmatprep.mubr.msk.f32.mxu0 %vm3747_vm2, %v3727_v28 }
 0xcd0   :  { %4597 = vmatmul.mubr.msk.f32.vlgmr.msra.gmra.mrb[48].mxu0 %vm3747_vm2, %v3728_v48 }
 0xcd1   :  { %4887 = vmatpush3.bf16.msra.mxu0 %v4884_v58  ;;  %4606 = vmatprep.mubr.msk.f32.mxu0 %vm3956_vm3, %v3853_v46 }
 0xcd8   :  { %4607 = vmatmul.mubr.msk.f32.vlgmr.msra.gmra.mrb[48].mxu0 %vm3956_vm3, %v3854_v49 }
 0xcd9   :  { %4609 = vmatprep.mubr.msk.f32.mxu0 %vm3956_vm3, %v3855_v45 }
 0xcdc   :  { %4610 = vmatmul.mubr.msk.f32.gmra.mrb[50].mxu0 %vm3956_vm3, %v3856_v33 }
 0xd2c   :  { %v4601_v42 = vpop.f32.mrb[52].mxu1 }
 0xd2d   :  { %v3947_v13 = vpop.f32.mrb[53].mxu1 }
 0xd94   :  { %v4584_v10 = vpop.f32.mrb[44].mxu0 }
 0xd95   :  { %vm3842_vm4 = vcmp.gt.f32.partialorder %v4584_v10, 0.0  ;;  %v3846_v7 = vmul.f32 0.01, %v4584_v10  ;;  %v3822_v57 = vpop.f32.mrb[45].mxu0 }
 0xd96   :  { %vm3841_vm6 = vcmp.gt.f32.partialorder %v3822_v57, 0.0  ;;  %v3845_v34 = vmul.f32 0.01, %v3822_v57 }
 0xd97   :  { %v3850_v25 = vsel %vm3842_vm4, %v4584_v10, %v3846_v7 }
 0xd98   :  { %4075 = vst.msk [vmem:[%s6887_s14 + $0x8] sm:$0xff] %vm4073_vm5, %v3850_v25  ;;  %v3849_v61 = vsel %vm3841_vm6, %v3822_v57, %v3845_v34 }
 0xd99   :  { %4074 = vst.msk [vmem:[%s6887_s14] sm:$0xff] %vm4073_vm5, %v3849_v61 }
 0xd9f   :  { %v4587_v47 = vpop.f32.mrb[46].mxu0 }
 0xda0   :  { %vm3844_vm7 = vcmp.gt.f32.partialorder %v4587_v47, 0.0  ;;  %v3848_v23 = vmul.f32 0.01, %v4587_v47  ;;  %v3832_v43 = vpop.f32.mrb[47].mxu0 }
 0xda1   :  { %vm3843_vm8 = vcmp.gt.f32.partialorder %v3832_v43, 0.0  ;;  %v3847_v4 = vmul.f32 0.01, %v3832_v43 }
 0xda2   :  { %v3852_v50 = vsel %vm3844_vm7, %v4587_v47, %v3848_v23 }
 0xda3   :  { %4077 = vst.msk [vmem:[%s6887_s14 + $0x18] sm:$0xff] %vm4073_vm5, %v3852_v50  ;;  %v3851_v15 = vsel %vm3843_vm8, %v3832_v43, %v3847_v4 }
 0xda4   :  { %4076 = vst.msk [vmem:[%s6887_s14 + $0x10] sm:$0xff] %vm4073_vm5, %v3851_v15 }
 0xdab   :  { %v4608_v19 = vpop.f32.mrb[48].mxu0 }
 0xdac   :  { %v4062_v18 = vadd.f32 %v4608_v19, %v4279_v39  ;;  %v4035_v14 = vpop.f32.mrb[49].mxu0 }
 0xdad   :  { %v4061_v63 = vadd.f32 %v4279_v39, %v4035_v14 }
 0xdae   :  { %v4066_v51 = vmax.f32 %v4062_v18, 0.0 }
 0xdaf   :  { %v4065_v41 = vmax.f32 %v4061_v63, 0.0  ;;  %v4611_v5 = vpop.f32.mrb[50].mxu0 }
 0xdb0   :  { %4070 = vst.msk [vmem:[%s6889_s13 + $0x8] sm:$0xff] %vm3747_vm2, %v4066_v51  ;;  %v4051_v44 = vadd.f32 %v4611_v5, %v4601_v42  ;;  %v4045_v26 = vpop.f32.mrb[51].mxu0 }
 0xdb1   :  { %4069 = vst.msk [vmem:[%s6889_s13] sm:$0xff] %vm3747_vm2, %v4065_v41  ;;  %v4046_v59 = vadd.f32 %v4045_v26, %v3947_v13 }
 0xdb2   :  { %v4064_v36 = vadd.f32 %v4279_v39, %v4051_v44 }
 0xdb3   :  { %v4063_v8 = vadd.f32 %v4279_v39, %v4046_v59 }
 0xdb4   :  { %v4068_v21 = vmax.f32 %v4064_v36, 0.0 }
 0xdb5   :  { %v4067_v60 = vmax.f32 %v4063_v8, 0.0 }
 0xdb6   :  { %4072 = vst.msk [vmem:[%s6889_s13 + $0x18] sm:$0xff] %vm3747_vm2, %v4068_v21 }
 0xdb7   :  { %4071 = vst.msk [vmem:[%s6889_s13 + $0x10] sm:$0xff] %vm3747_vm2, %v4067_v60 }

</bundles_post_ra>
